<compile_context>
chip_gen: v5e
topology: v5e:2x2
jax: 0.10.0
libtpu: 0.0.40
codegen_flags: <defaults>
</compile_context>

<pallas_src>
import functools
import math

import jax
import jax.numpy as jnp
from jax import lax
from jax.experimental import pallas as pl
from jax.experimental.pallas import tpu as pltpu

KSIZE = 7
PAD = (KSIZE - 1) // 2
EPS = 1e-6
INV_SQRT2 = 1.0 / math.sqrt(2.0)


def _pick_strip_rows(H):
    """Largest strip height <= 8 that divides H."""
    for t in (8, 7, 6, 5, 4, 3, 2, 1):
        if H % t == 0:
            return t
    return 1


# ---------------------------------------------------------------------------
# Fused kernel: one (batch, strip) grid step computes TH output rows of the
# whole block:  LN1 -> (dw7x7 a, b, c; a*b + c) -> gamma1 -> +x
#               -> LN2 -> Linear(C,4C) -> GELU -> Linear(4C,C) -> gamma2 -> +.
# ---------------------------------------------------------------------------
def _quadra_block_kernel(x_ref, ln1w_ref, ln1b_ref,
                         w1_ref, b1_ref, w2_ref, b2_ref, w3_ref, b3_ref,
                         g1_ref, ln2w_ref, ln2b_ref,
                         pw1_ref, pb1_ref, pw2_ref, pb2_ref, g2_ref,
                         o_ref, pad_ref, *, th):
    H, W, C = x_ref.shape[1], x_ref.shape[2], x_ref.shape[3]
    win = th + 2 * PAD                      # strip rows + conv halo
    row0 = pl.program_id(1) * th            # first image row of this strip

    ln1w = ln1w_ref[...]                    # (1, C)
    ln1b = ln1b_ref[...]
    g1 = g1_ref[...]

    # Zero only the 3-column left/right borders of the padded scratch; the
    # interior (including the out-of-image halo rows) is fully rewritten below.
    zeros_border = jnp.zeros((win, PAD, C), jnp.float32)
    pad_ref[:, pl.ds(0, PAD), :] = zeros_border
    pad_ref[:, pl.ds(PAD + W, PAD), :] = zeros_border

    # ---- LN1 (channels_first) of the strip rows + 3-row halo ---------------
    def fill_row(r, carry):
        img_row = row0 - PAD + r
        valid = jnp.logical_and(img_row >= 0, img_row < H)
        src = x_ref[0, jnp.clip(img_row, 0, H - 1)]          # (W, C)
        mu = jnp.mean(src, axis=-1, keepdims=True)
        var = jnp.mean((src - mu) ** 2, axis=-1, keepdims=True)
        xn = (src - mu) * lax.rsqrt(var + EPS) * ln1w + ln1b
        pad_ref[r, pl.ds(PAD, W), :] = jnp.where(valid, xn, 0.0)
        return carry

    lax.fori_loop(0, win, fill_row, 0)

    # ---- QuadraConv_dw: 3 depthwise 7x7 convs, a*b + c, one row at a time ---
    # Row-sized (W, C) accumulators stay in vregs across the 147 taps; bias is
    # fused into tap (0, 0).
    def conv_row(t, carry):
        p0 = pad_ref[t, pl.ds(0, W), :]                      # (W, C)
        acc_a = p0 * w1_ref[0] + b1_ref[0]
        acc_b = p0 * w2_ref[0] + b2_ref[0]
        acc_c = p0 * w3_ref[0] + b3_ref[0]
        for ki in range(KSIZE):
            for kj in range(KSIZE):
                if ki == 0 and kj == 0:
                    continue
                patch = pad_ref[t + ki, pl.ds(kj, W), :]     # (W, C)
                idx = ki * KSIZE + kj
                acc_a = acc_a + patch * w1_ref[idx]
                acc_b = acc_b + patch * w2_ref[idx]
                acc_c = acc_c + patch * w3_ref[idx]
        quad = acc_a * acc_b + acc_c                         # a*b + c
        xres = x_ref[0, row0 + t]                            # (W, C) residual
        o_ref[0, t] = xres + g1 * quad                       # stage-1 output row
        return carry

    lax.fori_loop(0, th, conv_row, 0)

    # ---- Stage 2: LN2 -> MLP (bf16 MXU matmuls, f32 acc) -> gamma2 -> +x1 ---
    x1 = o_ref[0]                                            # (th, W, C)
    mu = jnp.mean(x1, axis=-1, keepdims=True)
    var = jnp.mean((x1 - mu) ** 2, axis=-1, keepdims=True)
    xn = (x1 - mu) * lax.rsqrt(var + EPS) * ln2w_ref[...] + ln2b_ref[...]

    h = xn.reshape(th * W, C).astype(jnp.bfloat16)
    y = jnp.dot(h, pw1_ref[...], preferred_element_type=jnp.float32) + pb1_ref[...]
    y = 0.5 * y * (1.0 + lax.erf(y * INV_SQRT2))             # exact erf-GELU
    y = jnp.dot(y.astype(jnp.bfloat16), pw2_ref[...],
                preferred_element_type=jnp.float32) + pb2_ref[...]
    o_ref[0] = x1 + y.reshape(th, W, C) * g2_ref[...]


# ---------------------------------------------------------------------------
# Wrappers
# ---------------------------------------------------------------------------
def quadra_block1_dw_nhwc(x_nhwc, params):
    B, H, W, C = x_nhwc.shape
    x = x_nhwc.astype(jnp.float32)
    th = _pick_strip_rows(H)
    n_strips = H // th
    hidden = params["pw1"].shape[1]

    vec = lambda p: p.reshape(1, C).astype(jnp.float32)
    cw = lambda p: p.reshape(KSIZE * KSIZE, 1, C).astype(jnp.float32)

    const2 = lambda shape: pl.BlockSpec(shape, lambda b, s: (0, 0))
    const3 = lambda shape: pl.BlockSpec(shape, lambda b, s: (0, 0, 0))
    # The whole (H, W, C) image stays resident in VMEM for a given batch
    # element (its block index does not depend on the strip index), so it is
    # DMA'd from HBM only once per batch element while outputs are strip-tiled.
    x_spec = pl.BlockSpec((1, H, W, C), lambda b, s: (b, 0, 0, 0))
    out_spec = pl.BlockSpec((1, th, W, C), lambda b, s: (b, s, 0, 0))

    kernel = functools.partial(_quadra_block_kernel, th=th)

    fn = pl.pallas_call(
        kernel,
        out_shape=jax.ShapeDtypeStruct((B, H, W, C), jnp.float32),
        grid_spec=pltpu.PrefetchScalarGridSpec(
            num_scalar_prefetch=0,
            grid=(B, n_strips),
            in_specs=[
                x_spec,                                            # x (NHWC)
                const2((1, C)), const2((1, C)),                    # ln1 w, b
                const3((KSIZE * KSIZE, 1, C)), const2((1, C)),     # conv1 w, b
                const3((KSIZE * KSIZE, 1, C)), const2((1, C)),     # conv2 w, b
                const3((KSIZE * KSIZE, 1, C)), const2((1, C)),     # conv3 w, b
                const2((1, C)),                                    # gamma1
                const2((1, C)), const2((1, C)),                    # ln2 w, b
                const2((C, hidden)), const2((1, hidden)),          # pwconv1 (bf16 w)
                const2((hidden, C)), const2((1, C)),               # pwconv2 (bf16 w)
                const2((1, C)),                                    # gamma2
            ],
            out_specs=out_spec,
            scratch_shapes=[
                pltpu.VMEM((th + 2 * PAD, W + 2 * PAD, C), jnp.float32),
            ],
        ),
        compiler_params=pltpu.CompilerParams(
            dimension_semantics=("parallel", "arbitrary"),   # batch -> megacore
            vmem_limit_bytes=48 * 1024 * 1024,
        ),
    )

    return fn(
        x,
        vec(params["ln1_w"]), vec(params["ln1_b"]),
        cw(params["cw1"]), vec(params["cb1"]),
        cw(params["cw2"]), vec(params["cb2"]),
        cw(params["cw3"]), vec(params["cb3"]),
        vec(params["gamma1"]),
        vec(params["ln2_w"]), vec(params["ln2_b"]),
        params["pw1"].astype(jnp.bfloat16),
        params["pb1"].reshape(1, hidden).astype(jnp.float32),
        params["pw2"].astype(jnp.bfloat16),
        params["pb2"].reshape(1, C).astype(jnp.float32),
        vec(params["gamma2"]),
    )


def quadra_block1_dw(x_nchw, params):
    """NCHW public API (matches the torch module).  The two transposes are the
    only extra HBM passes; call quadra_block1_dw_nhwc directly to avoid them."""
    out = quadra_block1_dw_nhwc(jnp.transpose(x_nchw, (0, 2, 3, 1)), params)
    return jnp.transpose(out, (0, 3, 1, 2)).astype(x_nchw.dtype)


# ---------------------------------------------------------------------------
# Pure-JAX reference (for verification)
# ---------------------------------------------------------------------------
def reference(x_nchw, params):
    x = x_nchw.astype(jnp.float32)
    B, C, H, W = x.shape

    u = jnp.mean(x, axis=1, keepdims=True)
    s = jnp.mean((x - u) ** 2, axis=1, keepdims=True)
    xn = (x - u) / jnp.sqrt(s + EPS)
    xn = params["ln1_w"][None, :, None, None] * xn + params["ln1_b"][None, :, None, None]

    def dwconv(inp, w_hwc, b):
        w = w_hwc[:, :, None, :]                           # HWIO (7,7,1,C)
        inp_nhwc = jnp.transpose(inp, (0, 2, 3, 1))
        out = lax.conv_general_dilated(
            inp_nhwc, w, (1, 1), ((PAD, PAD), (PAD, PAD)),
            dimension_numbers=("NHWC", "HWIO", "NHWC"),
            feature_group_count=C)
        out = out + b[None, None, None, :]
        return jnp.transpose(out, (0, 3, 1, 2))

    a = dwconv(xn, params["cw1"], params["cb1"])
    b = dwconv(xn, params["cw2"], params["cb2"])
    c = dwconv(xn, params["cw3"], params["cb3"])
    x = x + params["gamma1"][None, :, None, None] * (a * b + c)

    inp = x
    xl = jnp.transpose(x, (0, 2, 3, 1))
    mu = jnp.mean(xl, -1, keepdims=True)
    var = jnp.mean((xl - mu) ** 2, -1, keepdims=True)
    xl = (xl - mu) / jnp.sqrt(var + EPS)
    xl = xl * params["ln2_w"] + params["ln2_b"]
    y = xl @ params["pw1"] + params["pb1"]
    y = 0.5 * y * (1.0 + lax.erf(y * INV_SQRT2))
    y = y @ params["pw2"] + params["pb2"]
    y = y * params["gamma2"]
    return inp + jnp.transpose(y, (0, 3, 1, 2))


def make_params(dim, layer_scale_init_value=1e-6, seed=0):
    keys = jax.random.split(jax.random.PRNGKey(seed), 12)
    f32 = jnp.float32
    return {
        "ln1_w": jnp.ones((dim,), f32),
        "ln1_b": jnp.zeros((dim,), f32),
        # depthwise conv weights stored as (7, 7, C): w[ki, kj, c] == torch w[c, 0, ki, kj]
        "cw1": 0.1 * jax.random.normal(keys[0], (KSIZE, KSIZE, dim), f32),
        "cb1": 0.1 * jax.random.normal(keys[1], (dim,), f32),
        "cw2": 0.1 * jax.random.normal(keys[2], (KSIZE, KSIZE, dim), f32),
        "cb2": 0.1 * jax.random.normal(keys[3], (dim,), f32),
        "cw3": 0.1 * jax.random.normal(keys[4], (KSIZE, KSIZE, dim), f32),
        "cb3": 0.1 * jax.random.normal(keys[5], (dim,), f32),
        "ln2_w": jnp.ones((dim,), f32),
        "ln2_b": jnp.zeros((dim,), f32),
        # Linear weights stored transposed relative to torch: (in, out)
        "pw1": 0.1 * jax.random.normal(keys[6], (dim, 4 * dim), f32),
        "pb1": 0.1 * jax.random.normal(keys[7], (4 * dim,), f32),
        "pw2": 0.1 * jax.random.normal(keys[8], (4 * dim, dim), f32),
        "pb2": 0.1 * jax.random.normal(keys[9], (dim,), f32),
        "gamma1": layer_scale_init_value * jnp.ones((dim,), f32),
        "gamma2": layer_scale_init_value * jnp.ones((dim,), f32),
    }


if __name__ == "__main__":
    B, C, H, W = 2, 4, 16, 16
    key = jax.random.PRNGKey(0)
    x = jax.random.normal(key, (B, C, H, W), jnp.float32)
    params = make_params(C, layer_scale_init_value=1e-6)

    # Check A: gamma1=1, gamma2=1e-6 -> stage 1 (f32 conv, strips, halo) is
    # fully exercised and checked tightly; the bf16 MLP is suppressed by gamma2.
    pa = dict(params)
    pa["gamma1"] = jnp.ones((C,), jnp.float32)
    out_a = jax.block_until_ready(quadra_block1_dw(x, pa))
    ref_a = reference(x, pa)
    assert out_a.shape == (B, C, H, W)
    err_a = float(jnp.max(jnp.abs(out_a - ref_a)))
    assert jnp.allclose(out_a, ref_a, rtol=1e-4, atol=1e-4), f"stage-1 mismatch {err_a:e}"

    # Check B: gamma1=gamma2=1 -> stage 2 (LN2 + bf16 MXU MLP) exercised; looser
    # tolerance because the matmul operands are bf16 (f32 accumulation).
    pb = dict(params)
    pb["gamma1"] = jnp.ones((C,), jnp.float32)
    pb["gamma2"] = jnp.ones((C,), jnp.float32)
    out_b = jax.block_until_ready(quadra_block1_dw(x, pb))
    ref_b = reference(x, pb)
    err_b = float(jnp.max(jnp.abs(out_b - ref_b)))
    assert jnp.allclose(out_b, ref_b, rtol=5e-2, atol=5e-2), f"stage-2 mismatch {err_b:e}"

    # Check C: odd (non power-of-two) spatial size, multiple strips, C=8.
    B2, C2, H2, W2 = 1, 8, 12, 12
    x2 = jax.random.normal(jax.random.PRNGKey(1), (B2, C2, H2, W2), jnp.float32)
    p2 = make_params(C2, layer_scale_init_value=1e-6, seed=3)
    p2["gamma1"] = jnp.ones((C2,), jnp.float32)   # keep gamma2=1e-6 -> tight check
    out_c = jax.block_until_ready(quadra_block1_dw(x2, p2))
    ref_c = reference(x2, p2)
    err_c = float(jnp.max(jnp.abs(out_c - ref_c)))
    assert jnp.allclose(out_c, ref_c, rtol=1e-4, atol=1e-4), f"odd-shape mismatch {err_c:e}"

    print("KERNEL_OK")
</pallas_src>

<mosaic_0001>
module attributes {stable_mosaic.version = 11 : i64} {
  func.func @_quadra_block_kernel(%arg0: i32, %arg1: i32, %arg2: memref<1x16x16x4xf32, #tpu.memory_space<vmem>>, %arg3: memref<1x4xf32, #tpu.memory_space<vmem>>, %arg4: memref<1x4xf32, #tpu.memory_space<vmem>>, %arg5: memref<49x1x4xf32, #tpu.memory_space<vmem>>, %arg6: memref<1x4xf32, #tpu.memory_space<vmem>>, %arg7: memref<49x1x4xf32, #tpu.memory_space<vmem>>, %arg8: memref<1x4xf32, #tpu.memory_space<vmem>>, %arg9: memref<49x1x4xf32, #tpu.memory_space<vmem>>, %arg10: memref<1x4xf32, #tpu.memory_space<vmem>>, %arg11: memref<1x4xf32, #tpu.memory_space<vmem>>, %arg12: memref<1x4xf32, #tpu.memory_space<vmem>>, %arg13: memref<1x4xf32, #tpu.memory_space<vmem>>, %arg14: memref<4x16xbf16, #tpu.memory_space<vmem>>, %arg15: memref<1x16xf32, #tpu.memory_space<vmem>>, %arg16: memref<16x4xbf16, #tpu.memory_space<vmem>>, %arg17: memref<1x4xf32, #tpu.memory_space<vmem>>, %arg18: memref<1x4xf32, #tpu.memory_space<vmem>>, %arg19: memref<1x8x16x4xf32, #tpu.memory_space<vmem>>, %arg20: memref<14x22x4xf32, #tpu.memory_space<vmem>>) attributes {dimension_semantics = [#tpu.dimension_semantics<parallel>, #tpu.dimension_semantics<arbitrary>], iteration_bounds = array<i64: 2, 2>, scalar_prefetch = 0 : i64, scratch_operands = 1 : i64, tpu.core_type = #tpu.core_type<tc>, window_params = [{transform_indices = @transform_0, window_bounds = array<i64: 1, 16, 16, 4>}, {pipeline_mode = #tpu.pipeline_mode<synchronous>, transform_indices = @transform_1, window_bounds = array<i64: 1, 4>}, {pipeline_mode = #tpu.pipeline_mode<synchronous>, transform_indices = @transform_2, window_bounds = array<i64: 1, 4>}, {pipeline_mode = #tpu.pipeline_mode<synchronous>, transform_indices = @transform_3, window_bounds = array<i64: 49, 1, 4>}, {pipeline_mode = #tpu.pipeline_mode<synchronous>, transform_indices = @transform_4, window_bounds = array<i64: 1, 4>}, {pipeline_mode = #tpu.pipeline_mode<synchronous>, transform_indices = @transform_5, window_bounds = array<i64: 49, 1, 4>}, {pipeline_mode = #tpu.pipeline_mode<synchronous>, transform_indices = @transform_6, window_bounds = array<i64: 1, 4>}, {pipeline_mode = #tpu.pipeline_mode<synchronous>, transform_indices = @transform_7, window_bounds = array<i64: 49, 1, 4>}, {pipeline_mode = #tpu.pipeline_mode<synchronous>, transform_indices = @transform_8, window_bounds = array<i64: 1, 4>}, {pipeline_mode = #tpu.pipeline_mode<synchronous>, transform_indices = @transform_9, window_bounds = array<i64: 1, 4>}, {pipeline_mode = #tpu.pipeline_mode<synchronous>, transform_indices = @transform_10, window_bounds = array<i64: 1, 4>}, {pipeline_mode = #tpu.pipeline_mode<synchronous>, transform_indices = @transform_11, window_bounds = array<i64: 1, 4>}, {pipeline_mode = #tpu.pipeline_mode<synchronous>, transform_indices = @transform_12, window_bounds = array<i64: 4, 16>}, {pipeline_mode = #tpu.pipeline_mode<synchronous>, transform_indices = @transform_13, window_bounds = array<i64: 1, 16>}, {pipeline_mode = #tpu.pipeline_mode<synchronous>, transform_indices = @transform_14, window_bounds = array<i64: 16, 4>}, {pipeline_mode = #tpu.pipeline_mode<synchronous>, transform_indices = @transform_15, window_bounds = array<i64: 1, 4>}, {pipeline_mode = #tpu.pipeline_mode<synchronous>, transform_indices = @transform_16, window_bounds = array<i64: 1, 4>}, {transform_indices = @transform_17, window_bounds = array<i64: 1, 8, 16, 4>}]} {
    %c8_i32 = arith.constant 8 : i32
    %0 = arith.muli %arg1, %c8_i32 : i32
    %c0 = arith.constant 0 : index
    %c0_0 = arith.constant 0 : index
    %1 = vector.load %arg3[%c0, %c0_0] : memref<1x4xf32, #tpu.memory_space<vmem>>, vector<1x4xf32>
    %c0_1 = arith.constant 0 : index
    %c0_2 = arith.constant 0 : index
    %2 = vector.load %arg4[%c0_1, %c0_2] : memref<1x4xf32, #tpu.memory_space<vmem>>, vector<1x4xf32>
    %c0_3 = arith.constant 0 : index
    %c0_4 = arith.constant 0 : index
    %3 = vector.load %arg11[%c0_3, %c0_4] : memref<1x4xf32, #tpu.memory_space<vmem>>, vector<1x4xf32>
    %cst = arith.constant 0.000000e+00 : f32
    %4 = vector.broadcast %cst : f32 to vector<14x3x4xf32>
    %c0_5 = arith.constant 0 : index
    %c0_6 = arith.constant 0 : index
    %c0_7 = arith.constant 0 : index
    %5 = vector.load %arg20[%c0_5, %c0_6, %c0_7] : memref<14x22x4xf32, #tpu.memory_space<vmem>>, vector<14x3x4xf32>
    tpu.vector_store %arg20[%c0_5, %c0_6, %c0_7], %4 {strides = array<i32>} : memref<14x22x4xf32, #tpu.memory_space<vmem>>, vector<14x3x4xf32>,
    %c0_8 = arith.constant 0 : index
    %c19 = arith.constant 19 : index
    %c0_9 = arith.constant 0 : index
    %6 = vector.load %arg20[%c0_8, %c19, %c0_9] : memref<14x22x4xf32, #tpu.memory_space<vmem>>, vector<14x3x4xf32>
    tpu.vector_store %arg20[%c0_8, %c19, %c0_9], %4 {strides = array<i32>} : memref<14x22x4xf32, #tpu.memory_space<vmem>>, vector<14x3x4xf32>,
    %c0_i32 = arith.constant 0 : i32
    %c14_i32 = arith.constant 14 : i32
    %7 = arith.addi %c0_i32, %c14_i32 : i32
    %c1_i32 = arith.constant 1 : i32
    scf.for %arg21 = %c0_i32 to %7 step %c1_i32  : i32 {
      %c3_i32 = arith.constant 3 : i32
      %67 = arith.subi %0, %c3_i32 : i32
      %68 = arith.addi %67, %arg21 : i32
      %c0_i32_47 = arith.constant 0 : i32
      %69 = arith.cmpi sge, %68, %c0_i32_47 : i32
      %c16_i32 = arith.constant 16 : i32
      %70 = arith.cmpi slt, %68, %c16_i32 : i32
      %71 = arith.andi %69, %70 : i1
      %c0_i32_48 = arith.constant 0 : i32
      %c15_i32 = arith.constant 15 : i32
      %72 = arith.maxsi %c0_i32_48, %68 : i32
      %73 = arith.minsi %c15_i32, %72 : i32
      %c0_49 = arith.constant 0 : index
      %74 = arith.index_cast %73 : i32 to index
      %c0_50 = arith.constant 0 : index
      %c0_51 = arith.constant 0 : index
      %75 = vector.load %arg2[%c0_49, %74, %c0_50, %c0_51] : memref<1x16x16x4xf32, #tpu.memory_space<vmem>>, vector<1x1x16x4xf32>
      %76 = vector.shape_cast %75 : vector<1x1x16x4xf32> to vector<16x4xf32>
      %cst_52 = arith.constant dense<0.000000e+00> : vector<16xf32>
      %77 = vector.multi_reduction <add>, %76, %cst_52 [1] : vector<16x4xf32> to vector<16xf32>
      %78 = vector.shape_cast %77 : vector<16xf32> to vector<16x1xf32>
      %cst_53 = arith.constant 4.000000e+00 : f32
      %79 = vector.broadcast %cst_53 : f32 to vector<16x1xf32>
      %80 = arith.divf %78, %79 : vector<16x1xf32>
      %81 = vector.broadcast %80 : vector<16x1xf32> to vector<16x4xf32>
      %82 = arith.subf %76, %81 : vector<16x4xf32>
      %83 = arith.mulf %82, %82 : vector<16x4xf32>
      %cst_54 = arith.constant dense<0.000000e+00> : vector<16xf32>
      %84 = vector.multi_reduction <add>, %83, %cst_54 [1] : vector<16x4xf32> to vector<16xf32>
      %85 = vector.shape_cast %84 : vector<16xf32> to vector<16x1xf32>
      %cst_55 = arith.constant 4.000000e+00 : f32
      %86 = vector.broadcast %cst_55 : f32 to vector<16x1xf32>
      %87 = arith.divf %85, %86 : vector<16x1xf32>
      %88 = vector.broadcast %80 : vector<16x1xf32> to vector<16x4xf32>
      %89 = arith.subf %76, %88 : vector<16x4xf32>
      %cst_56 = arith.constant 9.99999997E-7 : f32
      %90 = vector.broadcast %cst_56 : f32 to vector<16x1xf32>
      %91 = arith.addf %87, %90 : vector<16x1xf32>
      %92 = math.rsqrt %91 : vector<16x1xf32>
      %93 = vector.broadcast %92 : vector<16x1xf32> to vector<16x4xf32>
      %94 = arith.mulf %89, %93 : vector<16x4xf32>
      %95 = vector.broadcast %1 : vector<1x4xf32> to vector<16x4xf32>
      %96 = arith.mulf %94, %95 : vector<16x4xf32>
      %97 = vector.broadcast %2 : vector<1x4xf32> to vector<16x4xf32>
      %98 = arith.addf %96, %97 : vector<16x4xf32>
      %cst_57 = arith.constant 0.000000e+00 : f32
      %99 = vector.broadcast %cst_57 : f32 to vector<16x4xf32>
      %100 = arith.select %71, %98, %99 : vector<16x4xf32>
      %101 = arith.index_cast %arg21 : i32 to index
      %c3 = arith.constant 3 : index
      %c0_58 = arith.constant 0 : index
      %102 = vector.load %arg20[%101, %c3, %c0_58] : memref<14x22x4xf32, #tpu.memory_space<vmem>>, vector<1x16x4xf32>
      %103 = vector.shape_cast %102 : vector<1x16x4xf32> to vector<16x4xf32>
      %104 = vector.shape_cast %100 : vector<16x4xf32> to vector<1x16x4xf32>
      tpu.vector_store %arg20[%101, %c3, %c0_58], %104 {strides = array<i32>} : memref<14x22x4xf32, #tpu.memory_space<vmem>>, vector<1x16x4xf32>,
    }
    %c14_i32_10 = arith.constant 14 : i32
    %c0_i32_11 = arith.constant 0 : i32
    %c8_i32_12 = arith.constant 8 : i32
    %8 = arith.addi %c0_i32_11, %c8_i32_12 : i32
    %c1_i32_13 = arith.constant 1 : i32
    scf.for %arg21 = %c0_i32_11 to %8 step %c1_i32_13  : i32 {
      %67 = arith.index_cast %arg21 : i32 to index
      %c0_47 = arith.constant 0 : index
      %c0_48 = arith.constant 0 : index
      %68 = vector.load %arg20[%67, %c0_47, %c0_48] : memref<14x22x4xf32, #tpu.memory_space<vmem>>, vector<1x16x4xf32>
      %69 = vector.shape_cast %68 : vector<1x16x4xf32> to vector<16x4xf32>
      %c0_49 = arith.constant 0 : index
      %c0_50 = arith.constant 0 : index
      %c0_51 = arith.constant 0 : index
      %70 = vector.load %arg5[%c0_49, %c0_50, %c0_51] : memref<49x1x4xf32, #tpu.memory_space<vmem>>, vector<1x1x4xf32>
      %71 = vector.shape_cast %70 : vector<1x1x4xf32> to vector<1x4xf32>
      %72 = vector.broadcast %71 : vector<1x4xf32> to vector<16x4xf32>
      %73 = arith.mulf %69, %72 : vector<16x4xf32>
      %c0_52 = arith.constant 0 : index
      %c0_53 = arith.constant 0 : index
      %74 = vector.load %arg6[%c0_52, %c0_53] : memref<1x4xf32, #tpu.memory_space<vmem>>, vector<1x4xf32>
      %75 = vector.shape_cast %74 : vector<1x4xf32> to vector<4xf32>
      %76 = vector.shape_cast %75 : vector<4xf32> to vector<1x4xf32>
      %77 = vector.broadcast %76 : vector<1x4xf32> to vector<16x4xf32>
      %78 = arith.addf %73, %77 : vector<16x4xf32>
      %c0_54 = arith.constant 0 : index
      %c0_55 = arith.constant 0 : index
      %c0_56 = arith.constant 0 : index
      %79 = vector.load %arg7[%c0_54, %c0_55, %c0_56] : memref<49x1x4xf32, #tpu.memory_space<vmem>>, vector<1x1x4xf32>
      %80 = vector.shape_cast %79 : vector<1x1x4xf32> to vector<1x4xf32>
      %81 = vector.broadcast %80 : vector<1x4xf32> to vector<16x4xf32>
      %82 = arith.mulf %69, %81 : vector<16x4xf32>
      %c0_57 = arith.constant 0 : index
      %c0_58 = arith.constant 0 : index
      %83 = vector.load %arg8[%c0_57, %c0_58] : memref<1x4xf32, #tpu.memory_space<vmem>>, vector<1x4xf32>
      %84 = vector.shape_cast %83 : vector<1x4xf32> to vector<4xf32>
      %85 = vector.shape_cast %84 : vector<4xf32> to vector<1x4xf32>
      %86 = vector.broadcast %85 : vector<1x4xf32> to vector<16x4xf32>
      %87 = arith.addf %82, %86 : vector<16x4xf32>
      %c0_59 = arith.constant 0 : index
      %c0_60 = arith.constant 0 : index
      %c0_61 = arith.constant 0 : index
      %88 = vector.load %arg9[%c0_59, %c0_60, %c0_61] : memref<49x1x4xf32, #tpu.memory_space<vmem>>, vector<1x1x4xf32>
      %89 = vector.shape_cast %88 : vector<1x1x4xf32> to vector<1x4xf32>
      %90 = vector.broadcast %89 : vector<1x4xf32> to vector<16x4xf32>
      %91 = arith.mulf %69, %90 : vector<16x4xf32>
      %c0_62 = arith.constant 0 : index
      %c0_63 = arith.constant 0 : index
      %92 = vector.load %arg10[%c0_62, %c0_63] : memref<1x4xf32, #tpu.memory_space<vmem>>, vector<1x4xf32>
      %93 = vector.shape_cast %92 : vector<1x4xf32> to vector<4xf32>
      %94 = vector.shape_cast %93 : vector<4xf32> to vector<1x4xf32>
      %95 = vector.broadcast %94 : vector<1x4xf32> to vector<16x4xf32>
      %96 = arith.addf %91, %95 : vector<16x4xf32>
      %c0_i32_64 = arith.constant 0 : i32
      %97 = arith.addi %arg21, %c0_i32_64 : i32
      %98 = arith.index_cast %97 : i32 to index
      %c1 = arith.constant 1 : index
      %c0_65 = arith.constant 0 : index
      %99 = vector.load %arg20[%98, %c1, %c0_65] : memref<14x22x4xf32, #tpu.memory_space<vmem>>, vector<1x16x4xf32>
      %100 = vector.shape_cast %99 : vector<1x16x4xf32> to vector<16x4xf32>
      %c1_66 = arith.constant 1 : index
      %c0_67 = arith.constant 0 : index
      %c0_68 = arith.constant 0 : index
      %101 = vector.load %arg5[%c1_66, %c0_67, %c0_68] : memref<49x1x4xf32, #tpu.memory_space<vmem>>, vector<1x1x4xf32>
      %102 = vector.shape_cast %101 : vector<1x1x4xf32> to vector<1x4xf32>
      %103 = vector.broadcast %102 : vector<1x4xf32> to vector<16x4xf32>
      %104 = arith.mulf %100, %103 : vector<16x4xf32>
      %105 = arith.addf %78, %104 : vector<16x4xf32>
      %c1_69 = arith.constant 1 : index
      %c0_70 = arith.constant 0 : index
      %c0_71 = arith.constant 0 : index
      %106 = vector.load %arg7[%c1_69, %c0_70, %c0_71] : memref<49x1x4xf32, #tpu.memory_space<vmem>>, vector<1x1x4xf32>
      %107 = vector.shape_cast %106 : vector<1x1x4xf32> to vector<1x4xf32>
      %108 = vector.broadcast %107 : vector<1x4xf32> to vector<16x4xf32>
      %109 = arith.mulf %100, %108 : vector<16x4xf32>
      %110 = arith.addf %87, %109 : vector<16x4xf32>
      %c1_72 = arith.constant 1 : index
      %c0_73 = arith.constant 0 : index
      %c0_74 = arith.constant 0 : index
      %111 = vector.load %arg9[%c1_72, %c0_73, %c0_74] : memref<49x1x4xf32, #tpu.memory_space<vmem>>, vector<1x1x4xf32>
      %112 = vector.shape_cast %111 : vector<1x1x4xf32> to vector<1x4xf32>
      %113 = vector.broadcast %112 : vector<1x4xf32> to vector<16x4xf32>
      %114 = arith.mulf %100, %113 : vector<16x4xf32>
      %115 = arith.addf %96, %114 : vector<16x4xf32>
      %c0_i32_75 = arith.constant 0 : i32
      %116 = arith.addi %arg21, %c0_i32_75 : i32
      %117 = arith.index_cast %116 : i32 to index
      %c2 = arith.constant 2 : index
      %c0_76 = arith.constant 0 : index
      %118 = vector.load %arg20[%117, %c2, %c0_76] : memref<14x22x4xf32, #tpu.memory_space<vmem>>, vector<1x16x4xf32>
      %119 = vector.shape_cast %118 : vector<1x16x4xf32> to vector<16x4xf32>
      %c2_77 = arith.constant 2 : index
      %c0_78 = arith.constant 0 : index
      %c0_79 = arith.constant 0 : index
      %120 = vector.load %arg5[%c2_77, %c0_78, %c0_79] : memref<49x1x4xf32, #tpu.memory_space<vmem>>, vector<1x1x4xf32>
      %121 = vector.shape_cast %120 : vector<1x1x4xf32> to vector<1x4xf32>
      %122 = vector.broadcast %121 : vector<1x4xf32> to vector<16x4xf32>
      %123 = arith.mulf %119, %122 : vector<16x4xf32>
      %124 = arith.addf %105, %123 : vector<16x4xf32>
      %c2_80 = arith.constant 2 : index
      %c0_81 = arith.constant 0 : index
      %c0_82 = arith.constant 0 : index
      %125 = vector.load %arg7[%c2_80, %c0_81, %c0_82] : memref<49x1x4xf32, #tpu.memory_space<vmem>>, vector<1x1x4xf32>
      %126 = vector.shape_cast %125 : vector<1x1x4xf32> to vector<1x4xf32>
      %127 = vector.broadcast %126 : vector<1x4xf32> to vector<16x4xf32>
      %128 = arith.mulf %119, %127 : vector<16x4xf32>
      %129 = arith.addf %110, %128 : vector<16x4xf32>
      %c2_83 = arith.constant 2 : index
      %c0_84 = arith.constant 0 : index
      %c0_85 = arith.constant 0 : index
      %130 = vector.load %arg9[%c2_83, %c0_84, %c0_85] : memref<49x1x4xf32, #tpu.memory_space<vmem>>, vector<1x1x4xf32>
      %131 = vector.shape_cast %130 : vector<1x1x4xf32> to vector<1x4xf32>
      %132 = vector.broadcast %131 : vector<1x4xf32> to vector<16x4xf32>
      %133 = arith.mulf %119, %132 : vector<16x4xf32>
      %134 = arith.addf %115, %133 : vector<16x4xf32>
      %c0_i32_86 = arith.constant 0 : i32
      %135 = arith.addi %arg21, %c0_i32_86 : i32
      %136 = arith.index_cast %135 : i32 to index
      %c3 = arith.constant 3 : index
      %c0_87 = arith.constant 0 : index
      %137 = vector.load %arg20[%136, %c3, %c0_87] : memref<14x22x4xf32, #tpu.memory_space<vmem>>, vector<1x16x4xf32>
      %138 = vector.shape_cast %137 : vector<1x16x4xf32> to vector<16x4xf32>
      %c3_88 = arith.constant 3 : index
      %c0_89 = arith.constant 0 : index
      %c0_90 = arith.constant 0 : index
      %139 = vector.load %arg5[%c3_88, %c0_89, %c0_90] : memref<49x1x4xf32, #tpu.memory_space<vmem>>, vector<1x1x4xf32>
      %140 = vector.shape_cast %139 : vector<1x1x4xf32> to vector<1x4xf32>
      %141 = vector.broadcast %140 : vector<1x4xf32> to vector<16x4xf32>
      %142 = arith.mulf %138, %141 : vector<16x4xf32>
      %143 = arith.addf %124, %142 : vector<16x4xf32>
      %c3_91 = arith.constant 3 : index
      %c0_92 = arith.constant 0 : index
      %c0_93 = arith.constant 0 : index
      %144 = vector.load %arg7[%c3_91, %c0_92, %c0_93] : memref<49x1x4xf32, #tpu.memory_space<vmem>>, vector<1x1x4xf32>
      %145 = vector.shape_cast %144 : vector<1x1x4xf32> to vector<1x4xf32>
      %146 = vector.broadcast %145 : vector<1x4xf32> to vector<16x4xf32>
      %147 = arith.mulf %138, %146 : vector<16x4xf32>
      %148 = arith.addf %129, %147 : vector<16x4xf32>
      %c3_94 = arith.constant 3 : index
      %c0_95 = arith.constant 0 : index
      %c0_96 = arith.constant 0 : index
      %149 = vector.load %arg9[%c3_94, %c0_95, %c0_96] : memref<49x1x4xf32, #tpu.memory_space<vmem>>, vector<1x1x4xf32>
      %150 = vector.shape_cast %149 : vector<1x1x4xf32> to vector<1x4xf32>
      %151 = vector.broadcast %150 : vector<1x4xf32> to vector<16x4xf32>
      %152 = arith.mulf %138, %151 : vector<16x4xf32>
      %153 = arith.addf %134, %152 : vector<16x4xf32>
      %c0_i32_97 = arith.constant 0 : i32
      %154 = arith.addi %arg21, %c0_i32_97 : i32
      %155 = arith.index_cast %154 : i32 to index
      %c4 = arith.constant 4 : index
      %c0_98 = arith.constant 0 : index
      %156 = vector.load %arg20[%155, %c4, %c0_98] : memref<14x22x4xf32, #tpu.memory_space<vmem>>, vector<1x16x4xf32>
      %157 = vector.shape_cast %156 : vector<1x16x4xf32> to vector<16x4xf32>
      %c4_99 = arith.constant 4 : index
      %c0_100 = arith.constant 0 : index
      %c0_101 = arith.constant 0 : index
      %158 = vector.load %arg5[%c4_99, %c0_100, %c0_101] : memref<49x1x4xf32, #tpu.memory_space<vmem>>, vector<1x1x4xf32>
      %159 = vector.shape_cast %158 : vector<1x1x4xf32> to vector<1x4xf32>
      %160 = vector.broadcast %159 : vector<1x4xf32> to vector<16x4xf32>
      %161 = arith.mulf %157, %160 : vector<16x4xf32>
      %162 = arith.addf %143, %161 : vector<16x4xf32>
      %c4_102 = arith.constant 4 : index
      %c0_103 = arith.constant 0 : index
      %c0_104 = arith.constant 0 : index
      %163 = vector.load %arg7[%c4_102, %c0_103, %c0_104] : memref<49x1x4xf32, #tpu.memory_space<vmem>>, vector<1x1x4xf32>
      %164 = vector.shape_cast %163 : vector<1x1x4xf32> to vector<1x4xf32>
      %165 = vector.broadcast %164 : vector<1x4xf32> to vector<16x4xf32>
      %166 = arith.mulf %157, %165 : vector<16x4xf32>
      %167 = arith.addf %148, %166 : vector<16x4xf32>
      %c4_105 = arith.constant 4 : index
      %c0_106 = arith.constant 0 : index
      %c0_107 = arith.constant 0 : index
      %168 = vector.load %arg9[%c4_105, %c0_106, %c0_107] : memref<49x1x4xf32, #tpu.memory_space<vmem>>, vector<1x1x4xf32>
      %169 = vector.shape_cast %168 : vector<1x1x4xf32> to vector<1x4xf32>
      %170 = vector.broadcast %169 : vector<1x4xf32> to vector<16x4xf32>
      %171 = arith.mulf %157, %170 : vector<16x4xf32>
      %172 = arith.addf %153, %171 : vector<16x4xf32>
      %c0_i32_108 = arith.constant 0 : i32
      %173 = arith.addi %arg21, %c0_i32_108 : i32
      %174 = arith.index_cast %173 : i32 to index
      %c5 = arith.constant 5 : index
      %c0_109 = arith.constant 0 : index
      %175 = vector.load %arg20[%174, %c5, %c0_109] : memref<14x22x4xf32, #tpu.memory_space<vmem>>, vector<1x16x4xf32>
      %176 = vector.shape_cast %175 : vector<1x16x4xf32> to vector<16x4xf32>
      %c5_110 = arith.constant 5 : index
      %c0_111 = arith.constant 0 : index
      %c0_112 = arith.constant 0 : index
      %177 = vector.load %arg5[%c5_110, %c0_111, %c0_112] : memref<49x1x4xf32, #tpu.memory_space<vmem>>, vector<1x1x4xf32>
      %178 = vector.shape_cast %177 : vector<1x1x4xf32> to vector<1x4xf32>
      %179 = vector.broadcast %178 : vector<1x4xf32> to vector<16x4xf32>
      %180 = arith.mulf %176, %179 : vector<16x4xf32>
      %181 = arith.addf %162, %180 : vector<16x4xf32>
      %c5_113 = arith.constant 5 : index
      %c0_114 = arith.constant 0 : index
      %c0_115 = arith.constant 0 : index
      %182 = vector.load %arg7[%c5_113, %c0_114, %c0_115] : memref<49x1x4xf32, #tpu.memory_space<vmem>>, vector<1x1x4xf32>
      %183 = vector.shape_cast %182 : vector<1x1x4xf32> to vector<1x4xf32>
      %184 = vector.broadcast %183 : vector<1x4xf32> to vector<16x4xf32>
      %185 = arith.mulf %176, %184 : vector<16x4xf32>
      %186 = arith.addf %167, %185 : vector<16x4xf32>
      %c5_116 = arith.constant 5 : index
      %c0_117 = arith.constant 0 : index
      %c0_118 = arith.constant 0 : index
      %187 = vector.load %arg9[%c5_116, %c0_117, %c0_118] : memref<49x1x4xf32, #tpu.memory_space<vmem>>, vector<1x1x4xf32>
      %188 = vector.shape_cast %187 : vector<1x1x4xf32> to vector<1x4xf32>
      %189 = vector.broadcast %188 : vector<1x4xf32> to vector<16x4xf32>
      %190 = arith.mulf %176, %189 : vector<16x4xf32>
      %191 = arith.addf %172, %190 : vector<16x4xf32>
      %c0_i32_119 = arith.constant 0 : i32
      %192 = arith.addi %arg21, %c0_i32_119 : i32
      %193 = arith.index_cast %192 : i32 to index
      %c6 = arith.constant 6 : index
      %c0_120 = arith.constant 0 : index
      %194 = vector.load %arg20[%193, %c6, %c0_120] : memref<14x22x4xf32, #tpu.memory_space<vmem>>, vector<1x16x4xf32>
      %195 = vector.shape_cast %194 : vector<1x16x4xf32> to vector<16x4xf32>
      %c6_121 = arith.constant 6 : index
      %c0_122 = arith.constant 0 : index
      %c0_123 = arith.constant 0 : index
      %196 = vector.load %arg5[%c6_121, %c0_122, %c0_123] : memref<49x1x4xf32, #tpu.memory_space<vmem>>, vector<1x1x4xf32>
      %197 = vector.shape_cast %196 : vector<1x1x4xf32> to vector<1x4xf32>
      %198 = vector.broadcast %197 : vector<1x4xf32> to vector<16x4xf32>
      %199 = arith.mulf %195, %198 : vector<16x4xf32>
      %200 = arith.addf %181, %199 : vector<16x4xf32>
      %c6_124 = arith.constant 6 : index
      %c0_125 = arith.constant 0 : index
      %c0_126 = arith.constant 0 : index
      %201 = vector.load %arg7[%c6_124, %c0_125, %c0_126] : memref<49x1x4xf32, #tpu.memory_space<vmem>>, vector<1x1x4xf32>
      %202 = vector.shape_cast %201 : vector<1x1x4xf32> to vector<1x4xf32>
      %203 = vector.broadcast %202 : vector<1x4xf32> to vector<16x4xf32>
      %204 = arith.mulf %195, %203 : vector<16x4xf32>
      %205 = arith.addf %186, %204 : vector<16x4xf32>
      %c6_127 = arith.constant 6 : index
      %c0_128 = arith.constant 0 : index
      %c0_129 = arith.constant 0 : index
      %206 = vector.load %arg9[%c6_127, %c0_128, %c0_129] : memref<49x1x4xf32, #tpu.memory_space<vmem>>, vector<1x1x4xf32>
      %207 = vector.shape_cast %206 : vector<1x1x4xf32> to vector<1x4xf32>
      %208 = vector.broadcast %207 : vector<1x4xf32> to vector<16x4xf32>
      %209 = arith.mulf %195, %208 : vector<16x4xf32>
      %210 = arith.addf %191, %209 : vector<16x4xf32>
      %c1_i32_130 = arith.constant 1 : i32
      %211 = arith.addi %arg21, %c1_i32_130 : i32
      %212 = arith.index_cast %211 : i32 to index
      %c0_131 = arith.constant 0 : index
      %c0_132 = arith.constant 0 : index
      %213 = vector.load %arg20[%212, %c0_131, %c0_132] : memref<14x22x4xf32, #tpu.memory_space<vmem>>, vector<1x16x4xf32>
      %214 = vector.shape_cast %213 : vector<1x16x4xf32> to vector<16x4xf32>
      %c7 = arith.constant 7 : index
      %c0_133 = arith.constant 0 : index
      %c0_134 = arith.constant 0 : index
      %215 = vector.load %arg5[%c7, %c0_133, %c0_134] : memref<49x1x4xf32, #tpu.memory_space<vmem>>, vector<1x1x4xf32>
      %216 = vector.shape_cast %215 : vector<1x1x4xf32> to vector<1x4xf32>
      %217 = vector.broadcast %216 : vector<1x4xf32> to vector<16x4xf32>
      %218 = arith.mulf %214, %217 : vector<16x4xf32>
      %219 = arith.addf %200, %218 : vector<16x4xf32>
      %c7_135 = arith.constant 7 : index
      %c0_136 = arith.constant 0 : index
      %c0_137 = arith.constant 0 : index
      %220 = vector.load %arg7[%c7_135, %c0_136, %c0_137] : memref<49x1x4xf32, #tpu.memory_space<vmem>>, vector<1x1x4xf32>
      %221 = vector.shape_cast %220 : vector<1x1x4xf32> to vector<1x4xf32>
      %222 = vector.broadcast %221 : vector<1x4xf32> to vector<16x4xf32>
      %223 = arith.mulf %214, %222 : vector<16x4xf32>
      %224 = arith.addf %205, %223 : vector<16x4xf32>
      %c7_138 = arith.constant 7 : index
      %c0_139 = arith.constant 0 : index
      %c0_140 = arith.constant 0 : index
      %225 = vector.load %arg9[%c7_138, %c0_139, %c0_140] : memref<49x1x4xf32, #tpu.memory_space<vmem>>, vector<1x1x4xf32>
      %226 = vector.shape_cast %225 : vector<1x1x4xf32> to vector<1x4xf32>
      %227 = vector.broadcast %226 : vector<1x4xf32> to vector<16x4xf32>
      %228 = arith.mulf %214, %227 : vector<16x4xf32>
      %229 = arith.addf %210, %228 : vector<16x4xf32>
      %c1_i32_141 = arith.constant 1 : i32
      %230 = arith.addi %arg21, %c1_i32_141 : i32
      %231 = arith.index_cast %230 : i32 to index
      %c1_142 = arith.constant 1 : index
      %c0_143 = arith.constant 0 : index
      %232 = vector.load %arg20[%231, %c1_142, %c0_143] : memref<14x22x4xf32, #tpu.memory_space<vmem>>, vector<1x16x4xf32>
      %233 = vector.shape_cast %232 : vector<1x16x4xf32> to vector<16x4xf32>
      %c8 = arith.constant 8 : index
      %c0_144 = arith.constant 0 : index
      %c0_145 = arith.constant 0 : index
      %234 = vector.load %arg5[%c8, %c0_144, %c0_145] : memref<49x1x4xf32, #tpu.memory_space<vmem>>, vector<1x1x4xf32>
      %235 = vector.shape_cast %234 : vector<1x1x4xf32> to vector<1x4xf32>
      %236 = vector.broadcast %235 : vector<1x4xf32> to vector<16x4xf32>
      %237 = arith.mulf %233, %236 : vector<16x4xf32>
      %238 = arith.addf %219, %237 : vector<16x4xf32>
      %c8_146 = arith.constant 8 : index
      %c0_147 = arith.constant 0 : index
      %c0_148 = arith.constant 0 : index
      %239 = vector.load %arg7[%c8_146, %c0_147, %c0_148] : memref<49x1x4xf32, #tpu.memory_space<vmem>>, vector<1x1x4xf32>
      %240 = vector.shape_cast %239 : vector<1x1x4xf32> to vector<1x4xf32>
      %241 = vector.broadcast %240 : vector<1x4xf32> to vector<16x4xf32>
      %242 = arith.mulf %233, %241 : vector<16x4xf32>
      %243 = arith.addf %224, %242 : vector<16x4xf32>
      %c8_149 = arith.constant 8 : index
      %c0_150 = arith.constant 0 : index
      %c0_151 = arith.constant 0 : index
      %244 = vector.load %arg9[%c8_149, %c0_150, %c0_151] : memref<49x1x4xf32, #tpu.memory_space<vmem>>, vector<1x1x4xf32>
      %245 = vector.shape_cast %244 : vector<1x1x4xf32> to vector<1x4xf32>
      %246 = vector.broadcast %245 : vector<1x4xf32> to vector<16x4xf32>
      %247 = arith.mulf %233, %246 : vector<16x4xf32>
      %248 = arith.addf %229, %247 : vector<16x4xf32>
      %c1_i32_152 = arith.constant 1 : i32
      %249 = arith.addi %arg21, %c1_i32_152 : i32
      %250 = arith.index_cast %249 : i32 to index
      %c2_153 = arith.constant 2 : index
      %c0_154 = arith.constant 0 : index
      %251 = vector.load %arg20[%250, %c2_153, %c0_154] : memref<14x22x4xf32, #tpu.memory_space<vmem>>, vector<1x16x4xf32>
      %252 = vector.shape_cast %251 : vector<1x16x4xf32> to vector<16x4xf32>
      %c9 = arith.constant 9 : index
      %c0_155 = arith.constant 0 : index
      %c0_156 = arith.constant 0 : index
      %253 = vector.load %arg5[%c9, %c0_155, %c0_156] : memref<49x1x4xf32, #tpu.memory_space<vmem>>, vector<1x1x4xf32>
      %254 = vector.shape_cast %253 : vector<1x1x4xf32> to vector<1x4xf32>
      %255 = vector.broadcast %254 : vector<1x4xf32> to vector<16x4xf32>
      %256 = arith.mulf %252, %255 : vector<16x4xf32>
      %257 = arith.addf %238, %256 : vector<16x4xf32>
      %c9_157 = arith.constant 9 : index
      %c0_158 = arith.constant 0 : index
      %c0_159 = arith.constant 0 : index
      %258 = vector.load %arg7[%c9_157, %c0_158, %c0_159] : memref<49x1x4xf32, #tpu.memory_space<vmem>>, vector<1x1x4xf32>
      %259 = vector.shape_cast %258 : vector<1x1x4xf32> to vector<1x4xf32>
      %260 = vector.broadcast %259 : vector<1x4xf32> to vector<16x4xf32>
      %261 = arith.mulf %252, %260 : vector<16x4xf32>
      %262 = arith.addf %243, %261 : vector<16x4xf32>
      %c9_160 = arith.constant 9 : index
      %c0_161 = arith.constant 0 : index
      %c0_162 = arith.constant 0 : index
      %263 = vector.load %arg9[%c9_160, %c0_161, %c0_162] : memref<49x1x4xf32, #tpu.memory_space<vmem>>, vector<1x1x4xf32>
      %264 = vector.shape_cast %263 : vector<1x1x4xf32> to vector<1x4xf32>
      %265 = vector.broadcast %264 : vector<1x4xf32> to vector<16x4xf32>
      %266 = arith.mulf %252, %265 : vector<16x4xf32>
      %267 = arith.addf %248, %266 : vector<16x4xf32>
      %c1_i32_163 = arith.constant 1 : i32
      %268 = arith.addi %arg21, %c1_i32_163 : i32
      %269 = arith.index_cast %268 : i32 to index
      %c3_164 = arith.constant 3 : index
      %c0_165 = arith.constant 0 : index
      %270 = vector.load %arg20[%269, %c3_164, %c0_165] : memref<14x22x4xf32, #tpu.memory_space<vmem>>, vector<1x16x4xf32>
      %271 = vector.shape_cast %270 : vector<1x16x4xf32> to vector<16x4xf32>
      %c10 = arith.constant 10 : index
      %c0_166 = arith.constant 0 : index
      %c0_167 = arith.constant 0 : index
      %272 = vector.load %arg5[%c10, %c0_166, %c0_167] : memref<49x1x4xf32, #tpu.memory_space<vmem>>, vector<1x1x4xf32>
      %273 = vector.shape_cast %272 : vector<1x1x4xf32> to vector<1x4xf32>
      %274 = vector.broadcast %273 : vector<1x4xf32> to vector<16x4xf32>
      %275 = arith.mulf %271, %274 : vector<16x4xf32>
      %276 = arith.addf %257, %275 : vector<16x4xf32>
      %c10_168 = arith.constant 10 : index
      %c0_169 = arith.constant 0 : index
      %c0_170 = arith.constant 0 : index
      %277 = vector.load %arg7[%c10_168, %c0_169, %c0_170] : memref<49x1x4xf32, #tpu.memory_space<vmem>>, vector<1x1x4xf32>
      %278 = vector.shape_cast %277 : vector<1x1x4xf32> to vector<1x4xf32>
      %279 = vector.broadcast %278 : vector<1x4xf32> to vector<16x4xf32>
      %280 = arith.mulf %271, %279 : vector<16x4xf32>
      %281 = arith.addf %262, %280 : vector<16x4xf32>
      %c10_171 = arith.constant 10 : index
      %c0_172 = arith.constant 0 : index
      %c0_173 = arith.constant 0 : index
      %282 = vector.load %arg9[%c10_171, %c0_172, %c0_173] : memref<49x1x4xf32, #tpu.memory_space<vmem>>, vector<1x1x4xf32>
      %283 = vector.shape_cast %282 : vector<1x1x4xf32> to vector<1x4xf32>
      %284 = vector.broadcast %283 : vector<1x4xf32> to vector<16x4xf32>
      %285 = arith.mulf %271, %284 : vector<16x4xf32>
      %286 = arith.addf %267, %285 : vector<16x4xf32>
      %c1_i32_174 = arith.constant 1 : i32
      %287 = arith.addi %arg21, %c1_i32_174 : i32
      %288 = arith.index_cast %287 : i32 to index
      %c4_175 = arith.constant 4 : index
      %c0_176 = arith.constant 0 : index
      %289 = vector.load %arg20[%288, %c4_175, %c0_176] : memref<14x22x4xf32, #tpu.memory_space<vmem>>, vector<1x16x4xf32>
      %290 = vector.shape_cast %289 : vector<1x16x4xf32> to vector<16x4xf32>
      %c11 = arith.constant 11 : index
      %c0_177 = arith.constant 0 : index
      %c0_178 = arith.constant 0 : index
      %291 = vector.load %arg5[%c11, %c0_177, %c0_178] : memref<49x1x4xf32, #tpu.memory_space<vmem>>, vector<1x1x4xf32>
      %292 = vector.shape_cast %291 : vector<1x1x4xf32> to vector<1x4xf32>
      %293 = vector.broadcast %292 : vector<1x4xf32> to vector<16x4xf32>
      %294 = arith.mulf %290, %293 : vector<16x4xf32>
      %295 = arith.addf %276, %294 : vector<16x4xf32>
      %c11_179 = arith.constant 11 : index
      %c0_180 = arith.constant 0 : index
      %c0_181 = arith.constant 0 : index
      %296 = vector.load %arg7[%c11_179, %c0_180, %c0_181] : memref<49x1x4xf32, #tpu.memory_space<vmem>>, vector<1x1x4xf32>
      %297 = vector.shape_cast %296 : vector<1x1x4xf32> to vector<1x4xf32>
      %298 = vector.broadcast %297 : vector<1x4xf32> to vector<16x4xf32>
      %299 = arith.mulf %290, %298 : vector<16x4xf32>
      %300 = arith.addf %281, %299 : vector<16x4xf32>
      %c11_182 = arith.constant 11 : index
      %c0_183 = arith.constant 0 : index
      %c0_184 = arith.constant 0 : index
      %301 = vector.load %arg9[%c11_182, %c0_183, %c0_184] : memref<49x1x4xf32, #tpu.memory_space<vmem>>, vector<1x1x4xf32>
      %302 = vector.shape_cast %301 : vector<1x1x4xf32> to vector<1x4xf32>
      %303 = vector.broadcast %302 : vector<1x4xf32> to vector<16x4xf32>
      %304 = arith.mulf %290, %303 : vector<16x4xf32>
      %305 = arith.addf %286, %304 : vector<16x4xf32>
      %c1_i32_185 = arith.constant 1 : i32
      %306 = arith.addi %arg21, %c1_i32_185 : i32
      %307 = arith.index_cast %306 : i32 to index
      %c5_186 = arith.constant 5 : index
      %c0_187 = arith.constant 0 : index
      %308 = vector.load %arg20[%307, %c5_186, %c0_187] : memref<14x22x4xf32, #tpu.memory_space<vmem>>, vector<1x16x4xf32>
      %309 = vector.shape_cast %308 : vector<1x16x4xf32> to vector<16x4xf32>
      %c12 = arith.constant 12 : index
      %c0_188 = arith.constant 0 : index
      %c0_189 = arith.constant 0 : index
      %310 = vector.load %arg5[%c12, %c0_188, %c0_189] : memref<49x1x4xf32, #tpu.memory_space<vmem>>, vector<1x1x4xf32>
      %311 = vector.shape_cast %310 : vector<1x1x4xf32> to vector<1x4xf32>
      %312 = vector.broadcast %311 : vector<1x4xf32> to vector<16x4xf32>
      %313 = arith.mulf %309, %312 : vector<16x4xf32>
      %314 = arith.addf %295, %313 : vector<16x4xf32>
      %c12_190 = arith.constant 12 : index
      %c0_191 = arith.constant 0 : index
      %c0_192 = arith.constant 0 : index
      %315 = vector.load %arg7[%c12_190, %c0_191, %c0_192] : memref<49x1x4xf32, #tpu.memory_space<vmem>>, vector<1x1x4xf32>
      %316 = vector.shape_cast %315 : vector<1x1x4xf32> to vector<1x4xf32>
      %317 = vector.broadcast %316 : vector<1x4xf32> to vector<16x4xf32>
      %318 = arith.mulf %309, %317 : vector<16x4xf32>
      %319 = arith.addf %300, %318 : vector<16x4xf32>
      %c12_193 = arith.constant 12 : index
      %c0_194 = arith.constant 0 : index
      %c0_195 = arith.constant 0 : index
      %320 = vector.load %arg9[%c12_193, %c0_194, %c0_195] : memref<49x1x4xf32, #tpu.memory_space<vmem>>, vector<1x1x4xf32>
      %321 = vector.shape_cast %320 : vector<1x1x4xf32> to vector<1x4xf32>
      %322 = vector.broadcast %321 : vector<1x4xf32> to vector<16x4xf32>
      %323 = arith.mulf %309, %322 : vector<16x4xf32>
      %324 = arith.addf %305, %323 : vector<16x4xf32>
      %c1_i32_196 = arith.constant 1 : i32
      %325 = arith.addi %arg21, %c1_i32_196 : i32
      %326 = arith.index_cast %325 : i32 to index
      %c6_197 = arith.constant 6 : index
      %c0_198 = arith.constant 0 : index
      %327 = vector.load %arg20[%326, %c6_197, %c0_198] : memref<14x22x4xf32, #tpu.memory_space<vmem>>, vector<1x16x4xf32>
      %328 = vector.shape_cast %327 : vector<1x16x4xf32> to vector<16x4xf32>
      %c13 = arith.constant 13 : index
      %c0_199 = arith.constant 0 : index
      %c0_200 = arith.constant 0 : index
      %329 = vector.load %arg5[%c13, %c0_199, %c0_200] : memref<49x1x4xf32, #tpu.memory_space<vmem>>, vector<1x1x4xf32>
      %330 = vector.shape_cast %329 : vector<1x1x4xf32> to vector<1x4xf32>
      %331 = vector.broadcast %330 : vector<1x4xf32> to vector<16x4xf32>
      %332 = arith.mulf %328, %331 : vector<16x4xf32>
      %333 = arith.addf %314, %332 : vector<16x4xf32>
      %c13_201 = arith.constant 13 : index
      %c0_202 = arith.constant 0 : index
      %c0_203 = arith.constant 0 : index
      %334 = vector.load %arg7[%c13_201, %c0_202, %c0_203] : memref<49x1x4xf32, #tpu.memory_space<vmem>>, vector<1x1x4xf32>
      %335 = vector.shape_cast %334 : vector<1x1x4xf32> to vector<1x4xf32>
      %336 = vector.broadcast %335 : vector<1x4xf32> to vector<16x4xf32>
      %337 = arith.mulf %328, %336 : vector<16x4xf32>
      %338 = arith.addf %319, %337 : vector<16x4xf32>
      %c13_204 = arith.constant 13 : index
      %c0_205 = arith.constant 0 : index
      %c0_206 = arith.constant 0 : index
      %339 = vector.load %arg9[%c13_204, %c0_205, %c0_206] : memref<49x1x4xf32, #tpu.memory_space<vmem>>, vector<1x1x4xf32>
      %340 = vector.shape_cast %339 : vector<1x1x4xf32> to vector<1x4xf32>
      %341 = vector.broadcast %340 : vector<1x4xf32> to vector<16x4xf32>
      %342 = arith.mulf %328, %341 : vector<16x4xf32>
      %343 = arith.addf %324, %342 : vector<16x4xf32>
      %c2_i32 = arith.constant 2 : i32
      %344 = arith.addi %arg21, %c2_i32 : i32
      %345 = arith.index_cast %344 : i32 to index
      %c0_207 = arith.constant 0 : index
      %c0_208 = arith.constant 0 : index
      %346 = vector.load %arg20[%345, %c0_207, %c0_208] : memref<14x22x4xf32, #tpu.memory_space<vmem>>, vector<1x16x4xf32>
      %347 = vector.shape_cast %346 : vector<1x16x4xf32> to vector<16x4xf32>
      %c14 = arith.constant 14 : index
      %c0_209 = arith.constant 0 : index
      %c0_210 = arith.constant 0 : index
      %348 = vector.load %arg5[%c14, %c0_209, %c0_210] : memref<49x1x4xf32, #tpu.memory_space<vmem>>, vector<1x1x4xf32>
      %349 = vector.shape_cast %348 : vector<1x1x4xf32> to vector<1x4xf32>
      %350 = vector.broadcast %349 : vector<1x4xf32> to vector<16x4xf32>
      %351 = arith.mulf %347, %350 : vector<16x4xf32>
      %352 = arith.addf %333, %351 : vector<16x4xf32>
      %c14_211 = arith.constant 14 : index
      %c0_212 = arith.constant 0 : index
      %c0_213 = arith.constant 0 : index
      %353 = vector.load %arg7[%c14_211, %c0_212, %c0_213] : memref<49x1x4xf32, #tpu.memory_space<vmem>>, vector<1x1x4xf32>
      %354 = vector.shape_cast %353 : vector<1x1x4xf32> to vector<1x4xf32>
      %355 = vector.broadcast %354 : vector<1x4xf32> to vector<16x4xf32>
      %356 = arith.mulf %347, %355 : vector<16x4xf32>
      %357 = arith.addf %338, %356 : vector<16x4xf32>
      %c14_214 = arith.constant 14 : index
      %c0_215 = arith.constant 0 : index
      %c0_216 = arith.constant 0 : index
      %358 = vector.load %arg9[%c14_214, %c0_215, %c0_216] : memref<49x1x4xf32, #tpu.memory_space<vmem>>, vector<1x1x4xf32>
      %359 = vector.shape_cast %358 : vector<1x1x4xf32> to vector<1x4xf32>
      %360 = vector.broadcast %359 : vector<1x4xf32> to vector<16x4xf32>
      %361 = arith.mulf %347, %360 : vector<16x4xf32>
      %362 = arith.addf %343, %361 : vector<16x4xf32>
      %c2_i32_217 = arith.constant 2 : i32
      %363 = arith.addi %arg21, %c2_i32_217 : i32
      %364 = arith.index_cast %363 : i32 to index
      %c1_218 = arith.constant 1 : index
      %c0_219 = arith.constant 0 : index
      %365 = vector.load %arg20[%364, %c1_218, %c0_219] : memref<14x22x4xf32, #tpu.memory_space<vmem>>, vector<1x16x4xf32>
      %366 = vector.shape_cast %365 : vector<1x16x4xf32> to vector<16x4xf32>
      %c15 = arith.constant 15 : index
      %c0_220 = arith.constant 0 : index
      %c0_221 = arith.constant 0 : index
      %367 = vector.load %arg5[%c15, %c0_220, %c0_221] : memref<49x1x4xf32, #tpu.memory_space<vmem>>, vector<1x1x4xf32>
      %368 = vector.shape_cast %367 : vector<1x1x4xf32> to vector<1x4xf32>
      %369 = vector.broadcast %368 : vector<1x4xf32> to vector<16x4xf32>
      %370 = arith.mulf %366, %369 : vector<16x4xf32>
      %371 = arith.addf %352, %370 : vector<16x4xf32>
      %c15_222 = arith.constant 15 : index
      %c0_223 = arith.constant 0 : index
      %c0_224 = arith.constant 0 : index
      %372 = vector.load %arg7[%c15_222, %c0_223, %c0_224] : memref<49x1x4xf32, #tpu.memory_space<vmem>>, vector<1x1x4xf32>
      %373 = vector.shape_cast %372 : vector<1x1x4xf32> to vector<1x4xf32>
      %374 = vector.broadcast %373 : vector<1x4xf32> to vector<16x4xf32>
      %375 = arith.mulf %366, %374 : vector<16x4xf32>
      %376 = arith.addf %357, %375 : vector<16x4xf32>
      %c15_225 = arith.constant 15 : index
      %c0_226 = arith.constant 0 : index
      %c0_227 = arith.constant 0 : index
      %377 = vector.load %arg9[%c15_225, %c0_226, %c0_227] : memref<49x1x4xf32, #tpu.memory_space<vmem>>, vector<1x1x4xf32>
      %378 = vector.shape_cast %377 : vector<1x1x4xf32> to vector<1x4xf32>
      %379 = vector.broadcast %378 : vector<1x4xf32> to vector<16x4xf32>
      %380 = arith.mulf %366, %379 : vector<16x4xf32>
      %381 = arith.addf %362, %380 : vector<16x4xf32>
      %c2_i32_228 = arith.constant 2 : i32
      %382 = arith.addi %arg21, %c2_i32_228 : i32
      %383 = arith.index_cast %382 : i32 to index
      %c2_229 = arith.constant 2 : index
      %c0_230 = arith.constant 0 : index
      %384 = vector.load %arg20[%383, %c2_229, %c0_230] : memref<14x22x4xf32, #tpu.memory_space<vmem>>, vector<1x16x4xf32>
      %385 = vector.shape_cast %384 : vector<1x16x4xf32> to vector<16x4xf32>
      %c16 = arith.constant 16 : index
      %c0_231 = arith.constant 0 : index
      %c0_232 = arith.constant 0 : index
      %386 = vector.load %arg5[%c16, %c0_231, %c0_232] : memref<49x1x4xf32, #tpu.memory_space<vmem>>, vector<1x1x4xf32>
      %387 = vector.shape_cast %386 : vector<1x1x4xf32> to vector<1x4xf32>
      %388 = vector.broadcast %387 : vector<1x4xf32> to vector<16x4xf32>
      %389 = arith.mulf %385, %388 : vector<16x4xf32>
      %390 = arith.addf %371, %389 : vector<16x4xf32>
      %c16_233 = arith.constant 16 : index
      %c0_234 = arith.constant 0 : index
      %c0_235 = arith.constant 0 : index
      %391 = vector.load %arg7[%c16_233, %c0_234, %c0_235] : memref<49x1x4xf32, #tpu.memory_space<vmem>>, vector<1x1x4xf32>
      %392 = vector.shape_cast %391 : vector<1x1x4xf32> to vector<1x4xf32>
      %393 = vector.broadcast %392 : vector<1x4xf32> to vector<16x4xf32>
      %394 = arith.mulf %385, %393 : vector<16x4xf32>
      %395 = arith.addf %376, %394 : vector<16x4xf32>
      %c16_236 = arith.constant 16 : index
      %c0_237 = arith.constant 0 : index
      %c0_238 = arith.constant 0 : index
      %396 = vector.load %arg9[%c16_236, %c0_237, %c0_238] : memref<49x1x4xf32, #tpu.memory_space<vmem>>, vector<1x1x4xf32>
      %397 = vector.shape_cast %396 : vector<1x1x4xf32> to vector<1x4xf32>
      %398 = vector.broadcast %397 : vector<1x4xf32> to vector<16x4xf32>
      %399 = arith.mulf %385, %398 : vector<16x4xf32>
      %400 = arith.addf %381, %399 : vector<16x4xf32>
      %c2_i32_239 = arith.constant 2 : i32
      %401 = arith.addi %arg21, %c2_i32_239 : i32
      %402 = arith.index_cast %401 : i32 to index
      %c3_240 = arith.constant 3 : index
      %c0_241 = arith.constant 0 : index
      %403 = vector.load %arg20[%402, %c3_240, %c0_241] : memref<14x22x4xf32, #tpu.memory_space<vmem>>, vector<1x16x4xf32>
      %404 = vector.shape_cast %403 : vector<1x16x4xf32> to vector<16x4xf32>
      %c17 = arith.constant 17 : index
      %c0_242 = arith.constant 0 : index
      %c0_243 = arith.constant 0 : index
      %405 = vector.load %arg5[%c17, %c0_242, %c0_243] : memref<49x1x4xf32, #tpu.memory_space<vmem>>, vector<1x1x4xf32>
      %406 = vector.shape_cast %405 : vector<1x1x4xf32> to vector<1x4xf32>
      %407 = vector.broadcast %406 : vector<1x4xf32> to vector<16x4xf32>
      %408 = arith.mulf %404, %407 : vector<16x4xf32>
      %409 = arith.addf %390, %408 : vector<16x4xf32>
      %c17_244 = arith.constant 17 : index
      %c0_245 = arith.constant 0 : index
      %c0_246 = arith.constant 0 : index
      %410 = vector.load %arg7[%c17_244, %c0_245, %c0_246] : memref<49x1x4xf32, #tpu.memory_space<vmem>>, vector<1x1x4xf32>
      %411 = vector.shape_cast %410 : vector<1x1x4xf32> to vector<1x4xf32>
      %412 = vector.broadcast %411 : vector<1x4xf32> to vector<16x4xf32>
      %413 = arith.mulf %404, %412 : vector<16x4xf32>
      %414 = arith.addf %395, %413 : vector<16x4xf32>
      %c17_247 = arith.constant 17 : index
      %c0_248 = arith.constant 0 : index
      %c0_249 = arith.constant 0 : index
      %415 = vector.load %arg9[%c17_247, %c0_248, %c0_249] : memref<49x1x4xf32, #tpu.memory_space<vmem>>, vector<1x1x4xf32>
      %416 = vector.shape_cast %415 : vector<1x1x4xf32> to vector<1x4xf32>
      %417 = vector.broadcast %416 : vector<1x4xf32> to vector<16x4xf32>
      %418 = arith.mulf %404, %417 : vector<16x4xf32>
      %419 = arith.addf %400, %418 : vector<16x4xf32>
      %c2_i32_250 = arith.constant 2 : i32
      %420 = arith.addi %arg21, %c2_i32_250 : i32
      %421 = arith.index_cast %420 : i32 to index
      %c4_251 = arith.constant 4 : index
      %c0_252 = arith.constant 0 : index
      %422 = vector.load %arg20[%421, %c4_251, %c0_252] : memref<14x22x4xf32, #tpu.memory_space<vmem>>, vector<1x16x4xf32>
      %423 = vector.shape_cast %422 : vector<1x16x4xf32> to vector<16x4xf32>
      %c18 = arith.constant 18 : index
      %c0_253 = arith.constant 0 : index
      %c0_254 = arith.constant 0 : index
      %424 = vector.load %arg5[%c18, %c0_253, %c0_254] : memref<49x1x4xf32, #tpu.memory_space<vmem>>, vector<1x1x4xf32>
      %425 = vector.shape_cast %424 : vector<1x1x4xf32> to vector<1x4xf32>
      %426 = vector.broadcast %425 : vector<1x4xf32> to vector<16x4xf32>
      %427 = arith.mulf %423, %426 : vector<16x4xf32>
      %428 = arith.addf %409, %427 : vector<16x4xf32>
      %c18_255 = arith.constant 18 : index
      %c0_256 = arith.constant 0 : index
      %c0_257 = arith.constant 0 : index
      %429 = vector.load %arg7[%c18_255, %c0_256, %c0_257] : memref<49x1x4xf32, #tpu.memory_space<vmem>>, vector<1x1x4xf32>
      %430 = vector.shape_cast %429 : vector<1x1x4xf32> to vector<1x4xf32>
      %431 = vector.broadcast %430 : vector<1x4xf32> to vector<16x4xf32>
      %432 = arith.mulf %423, %431 : vector<16x4xf32>
      %433 = arith.addf %414, %432 : vector<16x4xf32>
      %c18_258 = arith.constant 18 : index
      %c0_259 = arith.constant 0 : index
      %c0_260 = arith.constant 0 : index
      %434 = vector.load %arg9[%c18_258, %c0_259, %c0_260] : memref<49x1x4xf32, #tpu.memory_space<vmem>>, vector<1x1x4xf32>
      %435 = vector.shape_cast %434 : vector<1x1x4xf32> to vector<1x4xf32>
      %436 = vector.broadcast %435 : vector<1x4xf32> to vector<16x4xf32>
      %437 = arith.mulf %423, %436 : vector<16x4xf32>
      %438 = arith.addf %419, %437 : vector<16x4xf32>
      %c2_i32_261 = arith.constant 2 : i32
      %439 = arith.addi %arg21, %c2_i32_261 : i32
      %440 = arith.index_cast %439 : i32 to index
      %c5_262 = arith.constant 5 : index
      %c0_263 = arith.constant 0 : index
      %441 = vector.load %arg20[%440, %c5_262, %c0_263] : memref<14x22x4xf32, #tpu.memory_space<vmem>>, vector<1x16x4xf32>
      %442 = vector.shape_cast %441 : vector<1x16x4xf32> to vector<16x4xf32>
      %c19_264 = arith.constant 19 : index
      %c0_265 = arith.constant 0 : index
      %c0_266 = arith.constant 0 : index
      %443 = vector.load %arg5[%c19_264, %c0_265, %c0_266] : memref<49x1x4xf32, #tpu.memory_space<vmem>>, vector<1x1x4xf32>
      %444 = vector.shape_cast %443 : vector<1x1x4xf32> to vector<1x4xf32>
      %445 = vector.broadcast %444 : vector<1x4xf32> to vector<16x4xf32>
      %446 = arith.mulf %442, %445 : vector<16x4xf32>
      %447 = arith.addf %428, %446 : vector<16x4xf32>
      %c19_267 = arith.constant 19 : index
      %c0_268 = arith.constant 0 : index
      %c0_269 = arith.constant 0 : index
      %448 = vector.load %arg7[%c19_267, %c0_268, %c0_269] : memref<49x1x4xf32, #tpu.memory_space<vmem>>, vector<1x1x4xf32>
      %449 = vector.shape_cast %448 : vector<1x1x4xf32> to vector<1x4xf32>
      %450 = vector.broadcast %449 : vector<1x4xf32> to vector<16x4xf32>
      %451 = arith.mulf %442, %450 : vector<16x4xf32>
      %452 = arith.addf %433, %451 : vector<16x4xf32>
      %c19_270 = arith.constant 19 : index
      %c0_271 = arith.constant 0 : index
      %c0_272 = arith.constant 0 : index
      %453 = vector.load %arg9[%c19_270, %c0_271, %c0_272] : memref<49x1x4xf32, #tpu.memory_space<vmem>>, vector<1x1x4xf32>
      %454 = vector.shape_cast %453 : vector<1x1x4xf32> to vector<1x4xf32>
      %455 = vector.broadcast %454 : vector<1x4xf32> to vector<16x4xf32>
      %456 = arith.mulf %442, %455 : vector<16x4xf32>
      %457 = arith.addf %438, %456 : vector<16x4xf32>
      %c2_i32_273 = arith.constant 2 : i32
      %458 = arith.addi %arg21, %c2_i32_273 : i32
      %459 = arith.index_cast %458 : i32 to index
      %c6_274 = arith.constant 6 : index
      %c0_275 = arith.constant 0 : index
      %460 = vector.load %arg20[%459, %c6_274, %c0_275] : memref<14x22x4xf32, #tpu.memory_space<vmem>>, vector<1x16x4xf32>
      %461 = vector.shape_cast %460 : vector<1x16x4xf32> to vector<16x4xf32>
      %c20 = arith.constant 20 : index
      %c0_276 = arith.constant 0 : index
      %c0_277 = arith.constant 0 : index
      %462 = vector.load %arg5[%c20, %c0_276, %c0_277] : memref<49x1x4xf32, #tpu.memory_space<vmem>>, vector<1x1x4xf32>
      %463 = vector.shape_cast %462 : vector<1x1x4xf32> to vector<1x4xf32>
      %464 = vector.broadcast %463 : vector<1x4xf32> to vector<16x4xf32>
      %465 = arith.mulf %461, %464 : vector<16x4xf32>
      %466 = arith.addf %447, %465 : vector<16x4xf32>
      %c20_278 = arith.constant 20 : index
      %c0_279 = arith.constant 0 : index
      %c0_280 = arith.constant 0 : index
      %467 = vector.load %arg7[%c20_278, %c0_279, %c0_280] : memref<49x1x4xf32, #tpu.memory_space<vmem>>, vector<1x1x4xf32>
      %468 = vector.shape_cast %467 : vector<1x1x4xf32> to vector<1x4xf32>
      %469 = vector.broadcast %468 : vector<1x4xf32> to vector<16x4xf32>
      %470 = arith.mulf %461, %469 : vector<16x4xf32>
      %471 = arith.addf %452, %470 : vector<16x4xf32>
      %c20_281 = arith.constant 20 : index
      %c0_282 = arith.constant 0 : index
      %c0_283 = arith.constant 0 : index
      %472 = vector.load %arg9[%c20_281, %c0_282, %c0_283] : memref<49x1x4xf32, #tpu.memory_space<vmem>>, vector<1x1x4xf32>
      %473 = vector.shape_cast %472 : vector<1x1x4xf32> to vector<1x4xf32>
      %474 = vector.broadcast %473 : vector<1x4xf32> to vector<16x4xf32>
      %475 = arith.mulf %461, %474 : vector<16x4xf32>
      %476 = arith.addf %457, %475 : vector<16x4xf32>
      %c3_i32 = arith.constant 3 : i32
      %477 = arith.addi %arg21, %c3_i32 : i32
      %478 = arith.index_cast %477 : i32 to index
      %c0_284 = arith.constant 0 : index
      %c0_285 = arith.constant 0 : index
      %479 = vector.load %arg20[%478, %c0_284, %c0_285] : memref<14x22x4xf32, #tpu.memory_space<vmem>>, vector<1x16x4xf32>
      %480 = vector.shape_cast %479 : vector<1x16x4xf32> to vector<16x4xf32>
      %c21 = arith.constant 21 : index
      %c0_286 = arith.constant 0 : index
      %c0_287 = arith.constant 0 : index
      %481 = vector.load %arg5[%c21, %c0_286, %c0_287] : memref<49x1x4xf32, #tpu.memory_space<vmem>>, vector<1x1x4xf32>
      %482 = vector.shape_cast %481 : vector<1x1x4xf32> to vector<1x4xf32>
      %483 = vector.broadcast %482 : vector<1x4xf32> to vector<16x4xf32>
      %484 = arith.mulf %480, %483 : vector<16x4xf32>
      %485 = arith.addf %466, %484 : vector<16x4xf32>
      %c21_288 = arith.constant 21 : index
      %c0_289 = arith.constant 0 : index
      %c0_290 = arith.constant 0 : index
      %486 = vector.load %arg7[%c21_288, %c0_289, %c0_290] : memref<49x1x4xf32, #tpu.memory_space<vmem>>, vector<1x1x4xf32>
      %487 = vector.shape_cast %486 : vector<1x1x4xf32> to vector<1x4xf32>
      %488 = vector.broadcast %487 : vector<1x4xf32> to vector<16x4xf32>
      %489 = arith.mulf %480, %488 : vector<16x4xf32>
      %490 = arith.addf %471, %489 : vector<16x4xf32>
      %c21_291 = arith.constant 21 : index
      %c0_292 = arith.constant 0 : index
      %c0_293 = arith.constant 0 : index
      %491 = vector.load %arg9[%c21_291, %c0_292, %c0_293] : memref<49x1x4xf32, #tpu.memory_space<vmem>>, vector<1x1x4xf32>
      %492 = vector.shape_cast %491 : vector<1x1x4xf32> to vector<1x4xf32>
      %493 = vector.broadcast %492 : vector<1x4xf32> to vector<16x4xf32>
      %494 = arith.mulf %480, %493 : vector<16x4xf32>
      %495 = arith.addf %476, %494 : vector<16x4xf32>
      %c3_i32_294 = arith.constant 3 : i32
      %496 = arith.addi %arg21, %c3_i32_294 : i32
      %497 = arith.index_cast %496 : i32 to index
      %c1_295 = arith.constant 1 : index
      %c0_296 = arith.constant 0 : index
      %498 = vector.load %arg20[%497, %c1_295, %c0_296] : memref<14x22x4xf32, #tpu.memory_space<vmem>>, vector<1x16x4xf32>
      %499 = vector.shape_cast %498 : vector<1x16x4xf32> to vector<16x4xf32>
      %c22 = arith.constant 22 : index
      %c0_297 = arith.constant 0 : index
      %c0_298 = arith.constant 0 : index
      %500 = vector.load %arg5[%c22, %c0_297, %c0_298] : memref<49x1x4xf32, #tpu.memory_space<vmem>>, vector<1x1x4xf32>
      %501 = vector.shape_cast %500 : vector<1x1x4xf32> to vector<1x4xf32>
      %502 = vector.broadcast %501 : vector<1x4xf32> to vector<16x4xf32>
      %503 = arith.mulf %499, %502 : vector<16x4xf32>
      %504 = arith.addf %485, %503 : vector<16x4xf32>
      %c22_299 = arith.constant 22 : index
      %c0_300 = arith.constant 0 : index
      %c0_301 = arith.constant 0 : index
      %505 = vector.load %arg7[%c22_299, %c0_300, %c0_301] : memref<49x1x4xf32, #tpu.memory_space<vmem>>, vector<1x1x4xf32>
      %506 = vector.shape_cast %505 : vector<1x1x4xf32> to vector<1x4xf32>
      %507 = vector.broadcast %506 : vector<1x4xf32> to vector<16x4xf32>
      %508 = arith.mulf %499, %507 : vector<16x4xf32>
      %509 = arith.addf %490, %508 : vector<16x4xf32>
      %c22_302 = arith.constant 22 : index
      %c0_303 = arith.constant 0 : index
      %c0_304 = arith.constant 0 : index
      %510 = vector.load %arg9[%c22_302, %c0_303, %c0_304] : memref<49x1x4xf32, #tpu.memory_space<vmem>>, vector<1x1x4xf32>
      %511 = vector.shape_cast %510 : vector<1x1x4xf32> to vector<1x4xf32>
      %512 = vector.broadcast %511 : vector<1x4xf32> to vector<16x4xf32>
      %513 = arith.mulf %499, %512 : vector<16x4xf32>
      %514 = arith.addf %495, %513 : vector<16x4xf32>
      %c3_i32_305 = arith.constant 3 : i32
      %515 = arith.addi %arg21, %c3_i32_305 : i32
      %516 = arith.index_cast %515 : i32 to index
      %c2_306 = arith.constant 2 : index
      %c0_307 = arith.constant 0 : index
      %517 = vector.load %arg20[%516, %c2_306, %c0_307] : memref<14x22x4xf32, #tpu.memory_space<vmem>>, vector<1x16x4xf32>
      %518 = vector.shape_cast %517 : vector<1x16x4xf32> to vector<16x4xf32>
      %c23 = arith.constant 23 : index
      %c0_308 = arith.constant 0 : index
      %c0_309 = arith.constant 0 : index
      %519 = vector.load %arg5[%c23, %c0_308, %c0_309] : memref<49x1x4xf32, #tpu.memory_space<vmem>>, vector<1x1x4xf32>
      %520 = vector.shape_cast %519 : vector<1x1x4xf32> to vector<1x4xf32>
      %521 = vector.broadcast %520 : vector<1x4xf32> to vector<16x4xf32>
      %522 = arith.mulf %518, %521 : vector<16x4xf32>
      %523 = arith.addf %504, %522 : vector<16x4xf32>
      %c23_310 = arith.constant 23 : index
      %c0_311 = arith.constant 0 : index
      %c0_312 = arith.constant 0 : index
      %524 = vector.load %arg7[%c23_310, %c0_311, %c0_312] : memref<49x1x4xf32, #tpu.memory_space<vmem>>, vector<1x1x4xf32>
      %525 = vector.shape_cast %524 : vector<1x1x4xf32> to vector<1x4xf32>
      %526 = vector.broadcast %525 : vector<1x4xf32> to vector<16x4xf32>
      %527 = arith.mulf %518, %526 : vector<16x4xf32>
      %528 = arith.addf %509, %527 : vector<16x4xf32>
      %c23_313 = arith.constant 23 : index
      %c0_314 = arith.constant 0 : index
      %c0_315 = arith.constant 0 : index
      %529 = vector.load %arg9[%c23_313, %c0_314, %c0_315] : memref<49x1x4xf32, #tpu.memory_space<vmem>>, vector<1x1x4xf32>
      %530 = vector.shape_cast %529 : vector<1x1x4xf32> to vector<1x4xf32>
      %531 = vector.broadcast %530 : vector<1x4xf32> to vector<16x4xf32>
      %532 = arith.mulf %518, %531 : vector<16x4xf32>
      %533 = arith.addf %514, %532 : vector<16x4xf32>
      %c3_i32_316 = arith.constant 3 : i32
      %534 = arith.addi %arg21, %c3_i32_316 : i32
      %535 = arith.index_cast %534 : i32 to index
      %c3_317 = arith.constant 3 : index
      %c0_318 = arith.constant 0 : index
      %536 = vector.load %arg20[%535, %c3_317, %c0_318] : memref<14x22x4xf32, #tpu.memory_space<vmem>>, vector<1x16x4xf32>
      %537 = vector.shape_cast %536 : vector<1x16x4xf32> to vector<16x4xf32>
      %c24 = arith.constant 24 : index
      %c0_319 = arith.constant 0 : index
      %c0_320 = arith.constant 0 : index
      %538 = vector.load %arg5[%c24, %c0_319, %c0_320] : memref<49x1x4xf32, #tpu.memory_space<vmem>>, vector<1x1x4xf32>
      %539 = vector.shape_cast %538 : vector<1x1x4xf32> to vector<1x4xf32>
      %540 = vector.broadcast %539 : vector<1x4xf32> to vector<16x4xf32>
      %541 = arith.mulf %537, %540 : vector<16x4xf32>
      %542 = arith.addf %523, %541 : vector<16x4xf32>
      %c24_321 = arith.constant 24 : index
      %c0_322 = arith.constant 0 : index
      %c0_323 = arith.constant 0 : index
      %543 = vector.load %arg7[%c24_321, %c0_322, %c0_323] : memref<49x1x4xf32, #tpu.memory_space<vmem>>, vector<1x1x4xf32>
      %544 = vector.shape_cast %543 : vector<1x1x4xf32> to vector<1x4xf32>
      %545 = vector.broadcast %544 : vector<1x4xf32> to vector<16x4xf32>
      %546 = arith.mulf %537, %545 : vector<16x4xf32>
      %547 = arith.addf %528, %546 : vector<16x4xf32>
      %c24_324 = arith.constant 24 : index
      %c0_325 = arith.constant 0 : index
      %c0_326 = arith.constant 0 : index
      %548 = vector.load %arg9[%c24_324, %c0_325, %c0_326] : memref<49x1x4xf32, #tpu.memory_space<vmem>>, vector<1x1x4xf32>
      %549 = vector.shape_cast %548 : vector<1x1x4xf32> to vector<1x4xf32>
      %550 = vector.broadcast %549 : vector<1x4xf32> to vector<16x4xf32>
      %551 = arith.mulf %537, %550 : vector<16x4xf32>
      %552 = arith.addf %533, %551 : vector<16x4xf32>
      %c3_i32_327 = arith.constant 3 : i32
      %553 = arith.addi %arg21, %c3_i32_327 : i32
      %554 = arith.index_cast %553 : i32 to index
      %c4_328 = arith.constant 4 : index
      %c0_329 = arith.constant 0 : index
      %555 = vector.load %arg20[%554, %c4_328, %c0_329] : memref<14x22x4xf32, #tpu.memory_space<vmem>>, vector<1x16x4xf32>
      %556 = vector.shape_cast %555 : vector<1x16x4xf32> to vector<16x4xf32>
      %c25 = arith.constant 25 : index
      %c0_330 = arith.constant 0 : index
      %c0_331 = arith.constant 0 : index
      %557 = vector.load %arg5[%c25, %c0_330, %c0_331] : memref<49x1x4xf32, #tpu.memory_space<vmem>>, vector<1x1x4xf32>
      %558 = vector.shape_cast %557 : vector<1x1x4xf32> to vector<1x4xf32>
      %559 = vector.broadcast %558 : vector<1x4xf32> to vector<16x4xf32>
      %560 = arith.mulf %556, %559 : vector<16x4xf32>
      %561 = arith.addf %542, %560 : vector<16x4xf32>
      %c25_332 = arith.constant 25 : index
      %c0_333 = arith.constant 0 : index
      %c0_334 = arith.constant 0 : index
      %562 = vector.load %arg7[%c25_332, %c0_333, %c0_334] : memref<49x1x4xf32, #tpu.memory_space<vmem>>, vector<1x1x4xf32>
      %563 = vector.shape_cast %562 : vector<1x1x4xf32> to vector<1x4xf32>
      %564 = vector.broadcast %563 : vector<1x4xf32> to vector<16x4xf32>
      %565 = arith.mulf %556, %564 : vector<16x4xf32>
      %566 = arith.addf %547, %565 : vector<16x4xf32>
      %c25_335 = arith.constant 25 : index
      %c0_336 = arith.constant 0 : index
      %c0_337 = arith.constant 0 : index
      %567 = vector.load %arg9[%c25_335, %c0_336, %c0_337] : memref<49x1x4xf32, #tpu.memory_space<vmem>>, vector<1x1x4xf32>
      %568 = vector.shape_cast %567 : vector<1x1x4xf32> to vector<1x4xf32>
      %569 = vector.broadcast %568 : vector<1x4xf32> to vector<16x4xf32>
      %570 = arith.mulf %556, %569 : vector<16x4xf32>
      %571 = arith.addf %552, %570 : vector<16x4xf32>
      %c3_i32_338 = arith.constant 3 : i32
      %572 = arith.addi %arg21, %c3_i32_338 : i32
      %573 = arith.index_cast %572 : i32 to index
      %c5_339 = arith.constant 5 : index
      %c0_340 = arith.constant 0 : index
      %574 = vector.load %arg20[%573, %c5_339, %c0_340] : memref<14x22x4xf32, #tpu.memory_space<vmem>>, vector<1x16x4xf32>
      %575 = vector.shape_cast %574 : vector<1x16x4xf32> to vector<16x4xf32>
      %c26 = arith.constant 26 : index
      %c0_341 = arith.constant 0 : index
      %c0_342 = arith.constant 0 : index
      %576 = vector.load %arg5[%c26, %c0_341, %c0_342] : memref<49x1x4xf32, #tpu.memory_space<vmem>>, vector<1x1x4xf32>
      %577 = vector.shape_cast %576 : vector<1x1x4xf32> to vector<1x4xf32>
      %578 = vector.broadcast %577 : vector<1x4xf32> to vector<16x4xf32>
      %579 = arith.mulf %575, %578 : vector<16x4xf32>
      %580 = arith.addf %561, %579 : vector<16x4xf32>
      %c26_343 = arith.constant 26 : index
      %c0_344 = arith.constant 0 : index
      %c0_345 = arith.constant 0 : index
      %581 = vector.load %arg7[%c26_343, %c0_344, %c0_345] : memref<49x1x4xf32, #tpu.memory_space<vmem>>, vector<1x1x4xf32>
      %582 = vector.shape_cast %581 : vector<1x1x4xf32> to vector<1x4xf32>
      %583 = vector.broadcast %582 : vector<1x4xf32> to vector<16x4xf32>
      %584 = arith.mulf %575, %583 : vector<16x4xf32>
      %585 = arith.addf %566, %584 : vector<16x4xf32>
      %c26_346 = arith.constant 26 : index
      %c0_347 = arith.constant 0 : index
      %c0_348 = arith.constant 0 : index
      %586 = vector.load %arg9[%c26_346, %c0_347, %c0_348] : memref<49x1x4xf32, #tpu.memory_space<vmem>>, vector<1x1x4xf32>
      %587 = vector.shape_cast %586 : vector<1x1x4xf32> to vector<1x4xf32>
      %588 = vector.broadcast %587 : vector<1x4xf32> to vector<16x4xf32>
      %589 = arith.mulf %575, %588 : vector<16x4xf32>
      %590 = arith.addf %571, %589 : vector<16x4xf32>
      %c3_i32_349 = arith.constant 3 : i32
      %591 = arith.addi %arg21, %c3_i32_349 : i32
      %592 = arith.index_cast %591 : i32 to index
      %c6_350 = arith.constant 6 : index
      %c0_351 = arith.constant 0 : index
      %593 = vector.load %arg20[%592, %c6_350, %c0_351] : memref<14x22x4xf32, #tpu.memory_space<vmem>>, vector<1x16x4xf32>
      %594 = vector.shape_cast %593 : vector<1x16x4xf32> to vector<16x4xf32>
      %c27 = arith.constant 27 : index
      %c0_352 = arith.constant 0 : index
      %c0_353 = arith.constant 0 : index
      %595 = vector.load %arg5[%c27, %c0_352, %c0_353] : memref<49x1x4xf32, #tpu.memory_space<vmem>>, vector<1x1x4xf32>
      %596 = vector.shape_cast %595 : vector<1x1x4xf32> to vector<1x4xf32>
      %597 = vector.broadcast %596 : vector<1x4xf32> to vector<16x4xf32>
      %598 = arith.mulf %594, %597 : vector<16x4xf32>
      %599 = arith.addf %580, %598 : vector<16x4xf32>
      %c27_354 = arith.constant 27 : index
      %c0_355 = arith.constant 0 : index
      %c0_356 = arith.constant 0 : index
      %600 = vector.load %arg7[%c27_354, %c0_355, %c0_356] : memref<49x1x4xf32, #tpu.memory_space<vmem>>, vector<1x1x4xf32>
      %601 = vector.shape_cast %600 : vector<1x1x4xf32> to vector<1x4xf32>
      %602 = vector.broadcast %601 : vector<1x4xf32> to vector<16x4xf32>
      %603 = arith.mulf %594, %602 : vector<16x4xf32>
      %604 = arith.addf %585, %603 : vector<16x4xf32>
      %c27_357 = arith.constant 27 : index
      %c0_358 = arith.constant 0 : index
      %c0_359 = arith.constant 0 : index
      %605 = vector.load %arg9[%c27_357, %c0_358, %c0_359] : memref<49x1x4xf32, #tpu.memory_space<vmem>>, vector<1x1x4xf32>
      %606 = vector.shape_cast %605 : vector<1x1x4xf32> to vector<1x4xf32>
      %607 = vector.broadcast %606 : vector<1x4xf32> to vector<16x4xf32>
      %608 = arith.mulf %594, %607 : vector<16x4xf32>
      %609 = arith.addf %590, %608 : vector<16x4xf32>
      %c4_i32 = arith.constant 4 : i32
      %610 = arith.addi %arg21, %c4_i32 : i32
      %611 = arith.index_cast %610 : i32 to index
      %c0_360 = arith.constant 0 : index
      %c0_361 = arith.constant 0 : index
      %612 = vector.load %arg20[%611, %c0_360, %c0_361] : memref<14x22x4xf32, #tpu.memory_space<vmem>>, vector<1x16x4xf32>
      %613 = vector.shape_cast %612 : vector<1x16x4xf32> to vector<16x4xf32>
      %c28 = arith.constant 28 : index
      %c0_362 = arith.constant 0 : index
      %c0_363 = arith.constant 0 : index
      %614 = vector.load %arg5[%c28, %c0_362, %c0_363] : memref<49x1x4xf32, #tpu.memory_space<vmem>>, vector<1x1x4xf32>
      %615 = vector.shape_cast %614 : vector<1x1x4xf32> to vector<1x4xf32>
      %616 = vector.broadcast %615 : vector<1x4xf32> to vector<16x4xf32>
      %617 = arith.mulf %613, %616 : vector<16x4xf32>
      %618 = arith.addf %599, %617 : vector<16x4xf32>
      %c28_364 = arith.constant 28 : index
      %c0_365 = arith.constant 0 : index
      %c0_366 = arith.constant 0 : index
      %619 = vector.load %arg7[%c28_364, %c0_365, %c0_366] : memref<49x1x4xf32, #tpu.memory_space<vmem>>, vector<1x1x4xf32>
      %620 = vector.shape_cast %619 : vector<1x1x4xf32> to vector<1x4xf32>
      %621 = vector.broadcast %620 : vector<1x4xf32> to vector<16x4xf32>
      %622 = arith.mulf %613, %621 : vector<16x4xf32>
      %623 = arith.addf %604, %622 : vector<16x4xf32>
      %c28_367 = arith.constant 28 : index
      %c0_368 = arith.constant 0 : index
      %c0_369 = arith.constant 0 : index
      %624 = vector.load %arg9[%c28_367, %c0_368, %c0_369] : memref<49x1x4xf32, #tpu.memory_space<vmem>>, vector<1x1x4xf32>
      %625 = vector.shape_cast %624 : vector<1x1x4xf32> to vector<1x4xf32>
      %626 = vector.broadcast %625 : vector<1x4xf32> to vector<16x4xf32>
      %627 = arith.mulf %613, %626 : vector<16x4xf32>
      %628 = arith.addf %609, %627 : vector<16x4xf32>
      %c4_i32_370 = arith.constant 4 : i32
      %629 = arith.addi %arg21, %c4_i32_370 : i32
      %630 = arith.index_cast %629 : i32 to index
      %c1_371 = arith.constant 1 : index
      %c0_372 = arith.constant 0 : index
      %631 = vector.load %arg20[%630, %c1_371, %c0_372] : memref<14x22x4xf32, #tpu.memory_space<vmem>>, vector<1x16x4xf32>
      %632 = vector.shape_cast %631 : vector<1x16x4xf32> to vector<16x4xf32>
      %c29 = arith.constant 29 : index
      %c0_373 = arith.constant 0 : index
      %c0_374 = arith.constant 0 : index
      %633 = vector.load %arg5[%c29, %c0_373, %c0_374] : memref<49x1x4xf32, #tpu.memory_space<vmem>>, vector<1x1x4xf32>
      %634 = vector.shape_cast %633 : vector<1x1x4xf32> to vector<1x4xf32>
      %635 = vector.broadcast %634 : vector<1x4xf32> to vector<16x4xf32>
      %636 = arith.mulf %632, %635 : vector<16x4xf32>
      %637 = arith.addf %618, %636 : vector<16x4xf32>
      %c29_375 = arith.constant 29 : index
      %c0_376 = arith.constant 0 : index
      %c0_377 = arith.constant 0 : index
      %638 = vector.load %arg7[%c29_375, %c0_376, %c0_377] : memref<49x1x4xf32, #tpu.memory_space<vmem>>, vector<1x1x4xf32>
      %639 = vector.shape_cast %638 : vector<1x1x4xf32> to vector<1x4xf32>
      %640 = vector.broadcast %639 : vector<1x4xf32> to vector<16x4xf32>
      %641 = arith.mulf %632, %640 : vector<16x4xf32>
      %642 = arith.addf %623, %641 : vector<16x4xf32>
      %c29_378 = arith.constant 29 : index
      %c0_379 = arith.constant 0 : index
      %c0_380 = arith.constant 0 : index
      %643 = vector.load %arg9[%c29_378, %c0_379, %c0_380] : memref<49x1x4xf32, #tpu.memory_space<vmem>>, vector<1x1x4xf32>
      %644 = vector.shape_cast %643 : vector<1x1x4xf32> to vector<1x4xf32>
      %645 = vector.broadcast %644 : vector<1x4xf32> to vector<16x4xf32>
      %646 = arith.mulf %632, %645 : vector<16x4xf32>
      %647 = arith.addf %628, %646 : vector<16x4xf32>
      %c4_i32_381 = arith.constant 4 : i32
      %648 = arith.addi %arg21, %c4_i32_381 : i32
      %649 = arith.index_cast %648 : i32 to index
      %c2_382 = arith.constant 2 : index
      %c0_383 = arith.constant 0 : index
      %650 = vector.load %arg20[%649, %c2_382, %c0_383] : memref<14x22x4xf32, #tpu.memory_space<vmem>>, vector<1x16x4xf32>
      %651 = vector.shape_cast %650 : vector<1x16x4xf32> to vector<16x4xf32>
      %c30 = arith.constant 30 : index
      %c0_384 = arith.constant 0 : index
      %c0_385 = arith.constant 0 : index
      %652 = vector.load %arg5[%c30, %c0_384, %c0_385] : memref<49x1x4xf32, #tpu.memory_space<vmem>>, vector<1x1x4xf32>
      %653 = vector.shape_cast %652 : vector<1x1x4xf32> to vector<1x4xf32>
      %654 = vector.broadcast %653 : vector<1x4xf32> to vector<16x4xf32>
      %655 = arith.mulf %651, %654 : vector<16x4xf32>
      %656 = arith.addf %637, %655 : vector<16x4xf32>
      %c30_386 = arith.constant 30 : index
      %c0_387 = arith.constant 0 : index
      %c0_388 = arith.constant 0 : index
      %657 = vector.load %arg7[%c30_386, %c0_387, %c0_388] : memref<49x1x4xf32, #tpu.memory_space<vmem>>, vector<1x1x4xf32>
      %658 = vector.shape_cast %657 : vector<1x1x4xf32> to vector<1x4xf32>
      %659 = vector.broadcast %658 : vector<1x4xf32> to vector<16x4xf32>
      %660 = arith.mulf %651, %659 : vector<16x4xf32>
      %661 = arith.addf %642, %660 : vector<16x4xf32>
      %c30_389 = arith.constant 30 : index
      %c0_390 = arith.constant 0 : index
      %c0_391 = arith.constant 0 : index
      %662 = vector.load %arg9[%c30_389, %c0_390, %c0_391] : memref<49x1x4xf32, #tpu.memory_space<vmem>>, vector<1x1x4xf32>
      %663 = vector.shape_cast %662 : vector<1x1x4xf32> to vector<1x4xf32>
      %664 = vector.broadcast %663 : vector<1x4xf32> to vector<16x4xf32>
      %665 = arith.mulf %651, %664 : vector<16x4xf32>
      %666 = arith.addf %647, %665 : vector<16x4xf32>
      %c4_i32_392 = arith.constant 4 : i32
      %667 = arith.addi %arg21, %c4_i32_392 : i32
      %668 = arith.index_cast %667 : i32 to index
      %c3_393 = arith.constant 3 : index
      %c0_394 = arith.constant 0 : index
      %669 = vector.load %arg20[%668, %c3_393, %c0_394] : memref<14x22x4xf32, #tpu.memory_space<vmem>>, vector<1x16x4xf32>
      %670 = vector.shape_cast %669 : vector<1x16x4xf32> to vector<16x4xf32>
      %c31 = arith.constant 31 : index
      %c0_395 = arith.constant 0 : index
      %c0_396 = arith.constant 0 : index
      %671 = vector.load %arg5[%c31, %c0_395, %c0_396] : memref<49x1x4xf32, #tpu.memory_space<vmem>>, vector<1x1x4xf32>
      %672 = vector.shape_cast %671 : vector<1x1x4xf32> to vector<1x4xf32>
      %673 = vector.broadcast %672 : vector<1x4xf32> to vector<16x4xf32>
      %674 = arith.mulf %670, %673 : vector<16x4xf32>
      %675 = arith.addf %656, %674 : vector<16x4xf32>
      %c31_397 = arith.constant 31 : index
      %c0_398 = arith.constant 0 : index
      %c0_399 = arith.constant 0 : index
      %676 = vector.load %arg7[%c31_397, %c0_398, %c0_399] : memref<49x1x4xf32, #tpu.memory_space<vmem>>, vector<1x1x4xf32>
      %677 = vector.shape_cast %676 : vector<1x1x4xf32> to vector<1x4xf32>
      %678 = vector.broadcast %677 : vector<1x4xf32> to vector<16x4xf32>
      %679 = arith.mulf %670, %678 : vector<16x4xf32>
      %680 = arith.addf %661, %679 : vector<16x4xf32>
      %c31_400 = arith.constant 31 : index
      %c0_401 = arith.constant 0 : index
      %c0_402 = arith.constant 0 : index
      %681 = vector.load %arg9[%c31_400, %c0_401, %c0_402] : memref<49x1x4xf32, #tpu.memory_space<vmem>>, vector<1x1x4xf32>
      %682 = vector.shape_cast %681 : vector<1x1x4xf32> to vector<1x4xf32>
      %683 = vector.broadcast %682 : vector<1x4xf32> to vector<16x4xf32>
      %684 = arith.mulf %670, %683 : vector<16x4xf32>
      %685 = arith.addf %666, %684 : vector<16x4xf32>
      %c4_i32_403 = arith.constant 4 : i32
      %686 = arith.addi %arg21, %c4_i32_403 : i32
      %687 = arith.index_cast %686 : i32 to index
      %c4_404 = arith.constant 4 : index
      %c0_405 = arith.constant 0 : index
      %688 = vector.load %arg20[%687, %c4_404, %c0_405] : memref<14x22x4xf32, #tpu.memory_space<vmem>>, vector<1x16x4xf32>
      %689 = vector.shape_cast %688 : vector<1x16x4xf32> to vector<16x4xf32>
      %c32 = arith.constant 32 : index
      %c0_406 = arith.constant 0 : index
      %c0_407 = arith.constant 0 : index
      %690 = vector.load %arg5[%c32, %c0_406, %c0_407] : memref<49x1x4xf32, #tpu.memory_space<vmem>>, vector<1x1x4xf32>
      %691 = vector.shape_cast %690 : vector<1x1x4xf32> to vector<1x4xf32>
      %692 = vector.broadcast %691 : vector<1x4xf32> to vector<16x4xf32>
      %693 = arith.mulf %689, %692 : vector<16x4xf32>
      %694 = arith.addf %675, %693 : vector<16x4xf32>
      %c32_408 = arith.constant 32 : index
      %c0_409 = arith.constant 0 : index
      %c0_410 = arith.constant 0 : index
      %695 = vector.load %arg7[%c32_408, %c0_409, %c0_410] : memref<49x1x4xf32, #tpu.memory_space<vmem>>, vector<1x1x4xf32>
      %696 = vector.shape_cast %695 : vector<1x1x4xf32> to vector<1x4xf32>
      %697 = vector.broadcast %696 : vector<1x4xf32> to vector<16x4xf32>
      %698 = arith.mulf %689, %697 : vector<16x4xf32>
      %699 = arith.addf %680, %698 : vector<16x4xf32>
      %c32_411 = arith.constant 32 : index
      %c0_412 = arith.constant 0 : index
      %c0_413 = arith.constant 0 : index
      %700 = vector.load %arg9[%c32_411, %c0_412, %c0_413] : memref<49x1x4xf32, #tpu.memory_space<vmem>>, vector<1x1x4xf32>
      %701 = vector.shape_cast %700 : vector<1x1x4xf32> to vector<1x4xf32>
      %702 = vector.broadcast %701 : vector<1x4xf32> to vector<16x4xf32>
      %703 = arith.mulf %689, %702 : vector<16x4xf32>
      %704 = arith.addf %685, %703 : vector<16x4xf32>
      %c4_i32_414 = arith.constant 4 : i32
      %705 = arith.addi %arg21, %c4_i32_414 : i32
      %706 = arith.index_cast %705 : i32 to index
      %c5_415 = arith.constant 5 : index
      %c0_416 = arith.constant 0 : index
      %707 = vector.load %arg20[%706, %c5_415, %c0_416] : memref<14x22x4xf32, #tpu.memory_space<vmem>>, vector<1x16x4xf32>
      %708 = vector.shape_cast %707 : vector<1x16x4xf32> to vector<16x4xf32>
      %c33 = arith.constant 33 : index
      %c0_417 = arith.constant 0 : index
      %c0_418 = arith.constant 0 : index
      %709 = vector.load %arg5[%c33, %c0_417, %c0_418] : memref<49x1x4xf32, #tpu.memory_space<vmem>>, vector<1x1x4xf32>
      %710 = vector.shape_cast %709 : vector<1x1x4xf32> to vector<1x4xf32>
      %711 = vector.broadcast %710 : vector<1x4xf32> to vector<16x4xf32>
      %712 = arith.mulf %708, %711 : vector<16x4xf32>
      %713 = arith.addf %694, %712 : vector<16x4xf32>
      %c33_419 = arith.constant 33 : index
      %c0_420 = arith.constant 0 : index
      %c0_421 = arith.constant 0 : index
      %714 = vector.load %arg7[%c33_419, %c0_420, %c0_421] : memref<49x1x4xf32, #tpu.memory_space<vmem>>, vector<1x1x4xf32>
      %715 = vector.shape_cast %714 : vector<1x1x4xf32> to vector<1x4xf32>
      %716 = vector.broadcast %715 : vector<1x4xf32> to vector<16x4xf32>
      %717 = arith.mulf %708, %716 : vector<16x4xf32>
      %718 = arith.addf %699, %717 : vector<16x4xf32>
      %c33_422 = arith.constant 33 : index
      %c0_423 = arith.constant 0 : index
      %c0_424 = arith.constant 0 : index
      %719 = vector.load %arg9[%c33_422, %c0_423, %c0_424] : memref<49x1x4xf32, #tpu.memory_space<vmem>>, vector<1x1x4xf32>
      %720 = vector.shape_cast %719 : vector<1x1x4xf32> to vector<1x4xf32>
      %721 = vector.broadcast %720 : vector<1x4xf32> to vector<16x4xf32>
      %722 = arith.mulf %708, %721 : vector<16x4xf32>
      %723 = arith.addf %704, %722 : vector<16x4xf32>
      %c4_i32_425 = arith.constant 4 : i32
      %724 = arith.addi %arg21, %c4_i32_425 : i32
      %725 = arith.index_cast %724 : i32 to index
      %c6_426 = arith.constant 6 : index
      %c0_427 = arith.constant 0 : index
      %726 = vector.load %arg20[%725, %c6_426, %c0_427] : memref<14x22x4xf32, #tpu.memory_space<vmem>>, vector<1x16x4xf32>
      %727 = vector.shape_cast %726 : vector<1x16x4xf32> to vector<16x4xf32>
      %c34 = arith.constant 34 : index
      %c0_428 = arith.constant 0 : index
      %c0_429 = arith.constant 0 : index
      %728 = vector.load %arg5[%c34, %c0_428, %c0_429] : memref<49x1x4xf32, #tpu.memory_space<vmem>>, vector<1x1x4xf32>
      %729 = vector.shape_cast %728 : vector<1x1x4xf32> to vector<1x4xf32>
      %730 = vector.broadcast %729 : vector<1x4xf32> to vector<16x4xf32>
      %731 = arith.mulf %727, %730 : vector<16x4xf32>
      %732 = arith.addf %713, %731 : vector<16x4xf32>
      %c34_430 = arith.constant 34 : index
      %c0_431 = arith.constant 0 : index
      %c0_432 = arith.constant 0 : index
      %733 = vector.load %arg7[%c34_430, %c0_431, %c0_432] : memref<49x1x4xf32, #tpu.memory_space<vmem>>, vector<1x1x4xf32>
      %734 = vector.shape_cast %733 : vector<1x1x4xf32> to vector<1x4xf32>
      %735 = vector.broadcast %734 : vector<1x4xf32> to vector<16x4xf32>
      %736 = arith.mulf %727, %735 : vector<16x4xf32>
      %737 = arith.addf %718, %736 : vector<16x4xf32>
      %c34_433 = arith.constant 34 : index
      %c0_434 = arith.constant 0 : index
      %c0_435 = arith.constant 0 : index
      %738 = vector.load %arg9[%c34_433, %c0_434, %c0_435] : memref<49x1x4xf32, #tpu.memory_space<vmem>>, vector<1x1x4xf32>
      %739 = vector.shape_cast %738 : vector<1x1x4xf32> to vector<1x4xf32>
      %740 = vector.broadcast %739 : vector<1x4xf32> to vector<16x4xf32>
      %741 = arith.mulf %727, %740 : vector<16x4xf32>
      %742 = arith.addf %723, %741 : vector<16x4xf32>
      %c5_i32 = arith.constant 5 : i32
      %743 = arith.addi %arg21, %c5_i32 : i32
      %744 = arith.index_cast %743 : i32 to index
      %c0_436 = arith.constant 0 : index
      %c0_437 = arith.constant 0 : index
      %745 = vector.load %arg20[%744, %c0_436, %c0_437] : memref<14x22x4xf32, #tpu.memory_space<vmem>>, vector<1x16x4xf32>
      %746 = vector.shape_cast %745 : vector<1x16x4xf32> to vector<16x4xf32>
      %c35 = arith.constant 35 : index
      %c0_438 = arith.constant 0 : index
      %c0_439 = arith.constant 0 : index
      %747 = vector.load %arg5[%c35, %c0_438, %c0_439] : memref<49x1x4xf32, #tpu.memory_space<vmem>>, vector<1x1x4xf32>
      %748 = vector.shape_cast %747 : vector<1x1x4xf32> to vector<1x4xf32>
      %749 = vector.broadcast %748 : vector<1x4xf32> to vector<16x4xf32>
      %750 = arith.mulf %746, %749 : vector<16x4xf32>
      %751 = arith.addf %732, %750 : vector<16x4xf32>
      %c35_440 = arith.constant 35 : index
      %c0_441 = arith.constant 0 : index
      %c0_442 = arith.constant 0 : index
      %752 = vector.load %arg7[%c35_440, %c0_441, %c0_442] : memref<49x1x4xf32, #tpu.memory_space<vmem>>, vector<1x1x4xf32>
      %753 = vector.shape_cast %752 : vector<1x1x4xf32> to vector<1x4xf32>
      %754 = vector.broadcast %753 : vector<1x4xf32> to vector<16x4xf32>
      %755 = arith.mulf %746, %754 : vector<16x4xf32>
      %756 = arith.addf %737, %755 : vector<16x4xf32>
      %c35_443 = arith.constant 35 : index
      %c0_444 = arith.constant 0 : index
      %c0_445 = arith.constant 0 : index
      %757 = vector.load %arg9[%c35_443, %c0_444, %c0_445] : memref<49x1x4xf32, #tpu.memory_space<vmem>>, vector<1x1x4xf32>
      %758 = vector.shape_cast %757 : vector<1x1x4xf32> to vector<1x4xf32>
      %759 = vector.broadcast %758 : vector<1x4xf32> to vector<16x4xf32>
      %760 = arith.mulf %746, %759 : vector<16x4xf32>
      %761 = arith.addf %742, %760 : vector<16x4xf32>
      %c5_i32_446 = arith.constant 5 : i32
      %762 = arith.addi %arg21, %c5_i32_446 : i32
      %763 = arith.index_cast %762 : i32 to index
      %c1_447 = arith.constant 1 : index
      %c0_448 = arith.constant 0 : index
      %764 = vector.load %arg20[%763, %c1_447, %c0_448] : memref<14x22x4xf32, #tpu.memory_space<vmem>>, vector<1x16x4xf32>
      %765 = vector.shape_cast %764 : vector<1x16x4xf32> to vector<16x4xf32>
      %c36 = arith.constant 36 : index
      %c0_449 = arith.constant 0 : index
      %c0_450 = arith.constant 0 : index
      %766 = vector.load %arg5[%c36, %c0_449, %c0_450] : memref<49x1x4xf32, #tpu.memory_space<vmem>>, vector<1x1x4xf32>
      %767 = vector.shape_cast %766 : vector<1x1x4xf32> to vector<1x4xf32>
      %768 = vector.broadcast %767 : vector<1x4xf32> to vector<16x4xf32>
      %769 = arith.mulf %765, %768 : vector<16x4xf32>
      %770 = arith.addf %751, %769 : vector<16x4xf32>
      %c36_451 = arith.constant 36 : index
      %c0_452 = arith.constant 0 : index
      %c0_453 = arith.constant 0 : index
      %771 = vector.load %arg7[%c36_451, %c0_452, %c0_453] : memref<49x1x4xf32, #tpu.memory_space<vmem>>, vector<1x1x4xf32>
      %772 = vector.shape_cast %771 : vector<1x1x4xf32> to vector<1x4xf32>
      %773 = vector.broadcast %772 : vector<1x4xf32> to vector<16x4xf32>
      %774 = arith.mulf %765, %773 : vector<16x4xf32>
      %775 = arith.addf %756, %774 : vector<16x4xf32>
      %c36_454 = arith.constant 36 : index
      %c0_455 = arith.constant 0 : index
      %c0_456 = arith.constant 0 : index
      %776 = vector.load %arg9[%c36_454, %c0_455, %c0_456] : memref<49x1x4xf32, #tpu.memory_space<vmem>>, vector<1x1x4xf32>
      %777 = vector.shape_cast %776 : vector<1x1x4xf32> to vector<1x4xf32>
      %778 = vector.broadcast %777 : vector<1x4xf32> to vector<16x4xf32>
      %779 = arith.mulf %765, %778 : vector<16x4xf32>
      %780 = arith.addf %761, %779 : vector<16x4xf32>
      %c5_i32_457 = arith.constant 5 : i32
      %781 = arith.addi %arg21, %c5_i32_457 : i32
      %782 = arith.index_cast %781 : i32 to index
      %c2_458 = arith.constant 2 : index
      %c0_459 = arith.constant 0 : index
      %783 = vector.load %arg20[%782, %c2_458, %c0_459] : memref<14x22x4xf32, #tpu.memory_space<vmem>>, vector<1x16x4xf32>
      %784 = vector.shape_cast %783 : vector<1x16x4xf32> to vector<16x4xf32>
      %c37 = arith.constant 37 : index
      %c0_460 = arith.constant 0 : index
      %c0_461 = arith.constant 0 : index
      %785 = vector.load %arg5[%c37, %c0_460, %c0_461] : memref<49x1x4xf32, #tpu.memory_space<vmem>>, vector<1x1x4xf32>
      %786 = vector.shape_cast %785 : vector<1x1x4xf32> to vector<1x4xf32>
      %787 = vector.broadcast %786 : vector<1x4xf32> to vector<16x4xf32>
      %788 = arith.mulf %784, %787 : vector<16x4xf32>
      %789 = arith.addf %770, %788 : vector<16x4xf32>
      %c37_462 = arith.constant 37 : index
      %c0_463 = arith.constant 0 : index
      %c0_464 = arith.constant 0 : index
      %790 = vector.load %arg7[%c37_462, %c0_463, %c0_464] : memref<49x1x4xf32, #tpu.memory_space<vmem>>, vector<1x1x4xf32>
      %791 = vector.shape_cast %790 : vector<1x1x4xf32> to vector<1x4xf32>
      %792 = vector.broadcast %791 : vector<1x4xf32> to vector<16x4xf32>
      %793 = arith.mulf %784, %792 : vector<16x4xf32>
      %794 = arith.addf %775, %793 : vector<16x4xf32>
      %c37_465 = arith.constant 37 : index
      %c0_466 = arith.constant 0 : index
      %c0_467 = arith.constant 0 : index
      %795 = vector.load %arg9[%c37_465, %c0_466, %c0_467] : memref<49x1x4xf32, #tpu.memory_space<vmem>>, vector<1x1x4xf32>
      %796 = vector.shape_cast %795 : vector<1x1x4xf32> to vector<1x4xf32>
      %797 = vector.broadcast %796 : vector<1x4xf32> to vector<16x4xf32>
      %798 = arith.mulf %784, %797 : vector<16x4xf32>
      %799 = arith.addf %780, %798 : vector<16x4xf32>
      %c5_i32_468 = arith.constant 5 : i32
      %800 = arith.addi %arg21, %c5_i32_468 : i32
      %801 = arith.index_cast %800 : i32 to index
      %c3_469 = arith.constant 3 : index
      %c0_470 = arith.constant 0 : index
      %802 = vector.load %arg20[%801, %c3_469, %c0_470] : memref<14x22x4xf32, #tpu.memory_space<vmem>>, vector<1x16x4xf32>
      %803 = vector.shape_cast %802 : vector<1x16x4xf32> to vector<16x4xf32>
      %c38 = arith.constant 38 : index
      %c0_471 = arith.constant 0 : index
      %c0_472 = arith.constant 0 : index
      %804 = vector.load %arg5[%c38, %c0_471, %c0_472] : memref<49x1x4xf32, #tpu.memory_space<vmem>>, vector<1x1x4xf32>
      %805 = vector.shape_cast %804 : vector<1x1x4xf32> to vector<1x4xf32>
      %806 = vector.broadcast %805 : vector<1x4xf32> to vector<16x4xf32>
      %807 = arith.mulf %803, %806 : vector<16x4xf32>
      %808 = arith.addf %789, %807 : vector<16x4xf32>
      %c38_473 = arith.constant 38 : index
      %c0_474 = arith.constant 0 : index
      %c0_475 = arith.constant 0 : index
      %809 = vector.load %arg7[%c38_473, %c0_474, %c0_475] : memref<49x1x4xf32, #tpu.memory_space<vmem>>, vector<1x1x4xf32>
      %810 = vector.shape_cast %809 : vector<1x1x4xf32> to vector<1x4xf32>
      %811 = vector.broadcast %810 : vector<1x4xf32> to vector<16x4xf32>
      %812 = arith.mulf %803, %811 : vector<16x4xf32>
      %813 = arith.addf %794, %812 : vector<16x4xf32>
      %c38_476 = arith.constant 38 : index
      %c0_477 = arith.constant 0 : index
      %c0_478 = arith.constant 0 : index
      %814 = vector.load %arg9[%c38_476, %c0_477, %c0_478] : memref<49x1x4xf32, #tpu.memory_space<vmem>>, vector<1x1x4xf32>
      %815 = vector.shape_cast %814 : vector<1x1x4xf32> to vector<1x4xf32>
      %816 = vector.broadcast %815 : vector<1x4xf32> to vector<16x4xf32>
      %817 = arith.mulf %803, %816 : vector<16x4xf32>
      %818 = arith.addf %799, %817 : vector<16x4xf32>
      %c5_i32_479 = arith.constant 5 : i32
      %819 = arith.addi %arg21, %c5_i32_479 : i32
      %820 = arith.index_cast %819 : i32 to index
      %c4_480 = arith.constant 4 : index
      %c0_481 = arith.constant 0 : index
      %821 = vector.load %arg20[%820, %c4_480, %c0_481] : memref<14x22x4xf32, #tpu.memory_space<vmem>>, vector<1x16x4xf32>
      %822 = vector.shape_cast %821 : vector<1x16x4xf32> to vector<16x4xf32>
      %c39 = arith.constant 39 : index
      %c0_482 = arith.constant 0 : index
      %c0_483 = arith.constant 0 : index
      %823 = vector.load %arg5[%c39, %c0_482, %c0_483] : memref<49x1x4xf32, #tpu.memory_space<vmem>>, vector<1x1x4xf32>
      %824 = vector.shape_cast %823 : vector<1x1x4xf32> to vector<1x4xf32>
      %825 = vector.broadcast %824 : vector<1x4xf32> to vector<16x4xf32>
      %826 = arith.mulf %822, %825 : vector<16x4xf32>
      %827 = arith.addf %808, %826 : vector<16x4xf32>
      %c39_484 = arith.constant 39 : index
      %c0_485 = arith.constant 0 : index
      %c0_486 = arith.constant 0 : index
      %828 = vector.load %arg7[%c39_484, %c0_485, %c0_486] : memref<49x1x4xf32, #tpu.memory_space<vmem>>, vector<1x1x4xf32>
      %829 = vector.shape_cast %828 : vector<1x1x4xf32> to vector<1x4xf32>
      %830 = vector.broadcast %829 : vector<1x4xf32> to vector<16x4xf32>
      %831 = arith.mulf %822, %830 : vector<16x4xf32>
      %832 = arith.addf %813, %831 : vector<16x4xf32>
      %c39_487 = arith.constant 39 : index
      %c0_488 = arith.constant 0 : index
      %c0_489 = arith.constant 0 : index
      %833 = vector.load %arg9[%c39_487, %c0_488, %c0_489] : memref<49x1x4xf32, #tpu.memory_space<vmem>>, vector<1x1x4xf32>
      %834 = vector.shape_cast %833 : vector<1x1x4xf32> to vector<1x4xf32>
      %835 = vector.broadcast %834 : vector<1x4xf32> to vector<16x4xf32>
      %836 = arith.mulf %822, %835 : vector<16x4xf32>
      %837 = arith.addf %818, %836 : vector<16x4xf32>
      %c5_i32_490 = arith.constant 5 : i32
      %838 = arith.addi %arg21, %c5_i32_490 : i32
      %839 = arith.index_cast %838 : i32 to index
      %c5_491 = arith.constant 5 : index
      %c0_492 = arith.constant 0 : index
      %840 = vector.load %arg20[%839, %c5_491, %c0_492] : memref<14x22x4xf32, #tpu.memory_space<vmem>>, vector<1x16x4xf32>
      %841 = vector.shape_cast %840 : vector<1x16x4xf32> to vector<16x4xf32>
      %c40 = arith.constant 40 : index
      %c0_493 = arith.constant 0 : index
      %c0_494 = arith.constant 0 : index
      %842 = vector.load %arg5[%c40, %c0_493, %c0_494] : memref<49x1x4xf32, #tpu.memory_space<vmem>>, vector<1x1x4xf32>
      %843 = vector.shape_cast %842 : vector<1x1x4xf32> to vector<1x4xf32>
      %844 = vector.broadcast %843 : vector<1x4xf32> to vector<16x4xf32>
      %845 = arith.mulf %841, %844 : vector<16x4xf32>
      %846 = arith.addf %827, %845 : vector<16x4xf32>
      %c40_495 = arith.constant 40 : index
      %c0_496 = arith.constant 0 : index
      %c0_497 = arith.constant 0 : index
      %847 = vector.load %arg7[%c40_495, %c0_496, %c0_497] : memref<49x1x4xf32, #tpu.memory_space<vmem>>, vector<1x1x4xf32>
      %848 = vector.shape_cast %847 : vector<1x1x4xf32> to vector<1x4xf32>
      %849 = vector.broadcast %848 : vector<1x4xf32> to vector<16x4xf32>
      %850 = arith.mulf %841, %849 : vector<16x4xf32>
      %851 = arith.addf %832, %850 : vector<16x4xf32>
      %c40_498 = arith.constant 40 : index
      %c0_499 = arith.constant 0 : index
      %c0_500 = arith.constant 0 : index
      %852 = vector.load %arg9[%c40_498, %c0_499, %c0_500] : memref<49x1x4xf32, #tpu.memory_space<vmem>>, vector<1x1x4xf32>
      %853 = vector.shape_cast %852 : vector<1x1x4xf32> to vector<1x4xf32>
      %854 = vector.broadcast %853 : vector<1x4xf32> to vector<16x4xf32>
      %855 = arith.mulf %841, %854 : vector<16x4xf32>
      %856 = arith.addf %837, %855 : vector<16x4xf32>
      %c5_i32_501 = arith.constant 5 : i32
      %857 = arith.addi %arg21, %c5_i32_501 : i32
      %858 = arith.index_cast %857 : i32 to index
      %c6_502 = arith.constant 6 : index
      %c0_503 = arith.constant 0 : index
      %859 = vector.load %arg20[%858, %c6_502, %c0_503] : memref<14x22x4xf32, #tpu.memory_space<vmem>>, vector<1x16x4xf32>
      %860 = vector.shape_cast %859 : vector<1x16x4xf32> to vector<16x4xf32>
      %c41 = arith.constant 41 : index
      %c0_504 = arith.constant 0 : index
      %c0_505 = arith.constant 0 : index
      %861 = vector.load %arg5[%c41, %c0_504, %c0_505] : memref<49x1x4xf32, #tpu.memory_space<vmem>>, vector<1x1x4xf32>
      %862 = vector.shape_cast %861 : vector<1x1x4xf32> to vector<1x4xf32>
      %863 = vector.broadcast %862 : vector<1x4xf32> to vector<16x4xf32>
      %864 = arith.mulf %860, %863 : vector<16x4xf32>
      %865 = arith.addf %846, %864 : vector<16x4xf32>
      %c41_506 = arith.constant 41 : index
      %c0_507 = arith.constant 0 : index
      %c0_508 = arith.constant 0 : index
      %866 = vector.load %arg7[%c41_506, %c0_507, %c0_508] : memref<49x1x4xf32, #tpu.memory_space<vmem>>, vector<1x1x4xf32>
      %867 = vector.shape_cast %866 : vector<1x1x4xf32> to vector<1x4xf32>
      %868 = vector.broadcast %867 : vector<1x4xf32> to vector<16x4xf32>
      %869 = arith.mulf %860, %868 : vector<16x4xf32>
      %870 = arith.addf %851, %869 : vector<16x4xf32>
      %c41_509 = arith.constant 41 : index
      %c0_510 = arith.constant 0 : index
      %c0_511 = arith.constant 0 : index
      %871 = vector.load %arg9[%c41_509, %c0_510, %c0_511] : memref<49x1x4xf32, #tpu.memory_space<vmem>>, vector<1x1x4xf32>
      %872 = vector.shape_cast %871 : vector<1x1x4xf32> to vector<1x4xf32>
      %873 = vector.broadcast %872 : vector<1x4xf32> to vector<16x4xf32>
      %874 = arith.mulf %860, %873 : vector<16x4xf32>
      %875 = arith.addf %856, %874 : vector<16x4xf32>
      %c6_i32 = arith.constant 6 : i32
      %876 = arith.addi %arg21, %c6_i32 : i32
      %877 = arith.index_cast %876 : i32 to index
      %c0_512 = arith.constant 0 : index
      %c0_513 = arith.constant 0 : index
      %878 = vector.load %arg20[%877, %c0_512, %c0_513] : memref<14x22x4xf32, #tpu.memory_space<vmem>>, vector<1x16x4xf32>
      %879 = vector.shape_cast %878 : vector<1x16x4xf32> to vector<16x4xf32>
      %c42 = arith.constant 42 : index
      %c0_514 = arith.constant 0 : index
      %c0_515 = arith.constant 0 : index
      %880 = vector.load %arg5[%c42, %c0_514, %c0_515] : memref<49x1x4xf32, #tpu.memory_space<vmem>>, vector<1x1x4xf32>
      %881 = vector.shape_cast %880 : vector<1x1x4xf32> to vector<1x4xf32>
      %882 = vector.broadcast %881 : vector<1x4xf32> to vector<16x4xf32>
      %883 = arith.mulf %879, %882 : vector<16x4xf32>
      %884 = arith.addf %865, %883 : vector<16x4xf32>
      %c42_516 = arith.constant 42 : index
      %c0_517 = arith.constant 0 : index
      %c0_518 = arith.constant 0 : index
      %885 = vector.load %arg7[%c42_516, %c0_517, %c0_518] : memref<49x1x4xf32, #tpu.memory_space<vmem>>, vector<1x1x4xf32>
      %886 = vector.shape_cast %885 : vector<1x1x4xf32> to vector<1x4xf32>
      %887 = vector.broadcast %886 : vector<1x4xf32> to vector<16x4xf32>
      %888 = arith.mulf %879, %887 : vector<16x4xf32>
      %889 = arith.addf %870, %888 : vector<16x4xf32>
      %c42_519 = arith.constant 42 : index
      %c0_520 = arith.constant 0 : index
      %c0_521 = arith.constant 0 : index
      %890 = vector.load %arg9[%c42_519, %c0_520, %c0_521] : memref<49x1x4xf32, #tpu.memory_space<vmem>>, vector<1x1x4xf32>
      %891 = vector.shape_cast %890 : vector<1x1x4xf32> to vector<1x4xf32>
      %892 = vector.broadcast %891 : vector<1x4xf32> to vector<16x4xf32>
      %893 = arith.mulf %879, %892 : vector<16x4xf32>
      %894 = arith.addf %875, %893 : vector<16x4xf32>
      %c6_i32_522 = arith.constant 6 : i32
      %895 = arith.addi %arg21, %c6_i32_522 : i32
      %896 = arith.index_cast %895 : i32 to index
      %c1_523 = arith.constant 1 : index
      %c0_524 = arith.constant 0 : index
      %897 = vector.load %arg20[%896, %c1_523, %c0_524] : memref<14x22x4xf32, #tpu.memory_space<vmem>>, vector<1x16x4xf32>
      %898 = vector.shape_cast %897 : vector<1x16x4xf32> to vector<16x4xf32>
      %c43 = arith.constant 43 : index
      %c0_525 = arith.constant 0 : index
      %c0_526 = arith.constant 0 : index
      %899 = vector.load %arg5[%c43, %c0_525, %c0_526] : memref<49x1x4xf32, #tpu.memory_space<vmem>>, vector<1x1x4xf32>
      %900 = vector.shape_cast %899 : vector<1x1x4xf32> to vector<1x4xf32>
      %901 = vector.broadcast %900 : vector<1x4xf32> to vector<16x4xf32>
      %902 = arith.mulf %898, %901 : vector<16x4xf32>
      %903 = arith.addf %884, %902 : vector<16x4xf32>
      %c43_527 = arith.constant 43 : index
      %c0_528 = arith.constant 0 : index
      %c0_529 = arith.constant 0 : index
      %904 = vector.load %arg7[%c43_527, %c0_528, %c0_529] : memref<49x1x4xf32, #tpu.memory_space<vmem>>, vector<1x1x4xf32>
      %905 = vector.shape_cast %904 : vector<1x1x4xf32> to vector<1x4xf32>
      %906 = vector.broadcast %905 : vector<1x4xf32> to vector<16x4xf32>
      %907 = arith.mulf %898, %906 : vector<16x4xf32>
      %908 = arith.addf %889, %907 : vector<16x4xf32>
      %c43_530 = arith.constant 43 : index
      %c0_531 = arith.constant 0 : index
      %c0_532 = arith.constant 0 : index
      %909 = vector.load %arg9[%c43_530, %c0_531, %c0_532] : memref<49x1x4xf32, #tpu.memory_space<vmem>>, vector<1x1x4xf32>
      %910 = vector.shape_cast %909 : vector<1x1x4xf32> to vector<1x4xf32>
      %911 = vector.broadcast %910 : vector<1x4xf32> to vector<16x4xf32>
      %912 = arith.mulf %898, %911 : vector<16x4xf32>
      %913 = arith.addf %894, %912 : vector<16x4xf32>
      %c6_i32_533 = arith.constant 6 : i32
      %914 = arith.addi %arg21, %c6_i32_533 : i32
      %915 = arith.index_cast %914 : i32 to index
      %c2_534 = arith.constant 2 : index
      %c0_535 = arith.constant 0 : index
      %916 = vector.load %arg20[%915, %c2_534, %c0_535] : memref<14x22x4xf32, #tpu.memory_space<vmem>>, vector<1x16x4xf32>
      %917 = vector.shape_cast %916 : vector<1x16x4xf32> to vector<16x4xf32>
      %c44 = arith.constant 44 : index
      %c0_536 = arith.constant 0 : index
      %c0_537 = arith.constant 0 : index
      %918 = vector.load %arg5[%c44, %c0_536, %c0_537] : memref<49x1x4xf32, #tpu.memory_space<vmem>>, vector<1x1x4xf32>
      %919 = vector.shape_cast %918 : vector<1x1x4xf32> to vector<1x4xf32>
      %920 = vector.broadcast %919 : vector<1x4xf32> to vector<16x4xf32>
      %921 = arith.mulf %917, %920 : vector<16x4xf32>
      %922 = arith.addf %903, %921 : vector<16x4xf32>
      %c44_538 = arith.constant 44 : index
      %c0_539 = arith.constant 0 : index
      %c0_540 = arith.constant 0 : index
      %923 = vector.load %arg7[%c44_538, %c0_539, %c0_540] : memref<49x1x4xf32, #tpu.memory_space<vmem>>, vector<1x1x4xf32>
      %924 = vector.shape_cast %923 : vector<1x1x4xf32> to vector<1x4xf32>
      %925 = vector.broadcast %924 : vector<1x4xf32> to vector<16x4xf32>
      %926 = arith.mulf %917, %925 : vector<16x4xf32>
      %927 = arith.addf %908, %926 : vector<16x4xf32>
      %c44_541 = arith.constant 44 : index
      %c0_542 = arith.constant 0 : index
      %c0_543 = arith.constant 0 : index
      %928 = vector.load %arg9[%c44_541, %c0_542, %c0_543] : memref<49x1x4xf32, #tpu.memory_space<vmem>>, vector<1x1x4xf32>
      %929 = vector.shape_cast %928 : vector<1x1x4xf32> to vector<1x4xf32>
      %930 = vector.broadcast %929 : vector<1x4xf32> to vector<16x4xf32>
      %931 = arith.mulf %917, %930 : vector<16x4xf32>
      %932 = arith.addf %913, %931 : vector<16x4xf32>
      %c6_i32_544 = arith.constant 6 : i32
      %933 = arith.addi %arg21, %c6_i32_544 : i32
      %934 = arith.index_cast %933 : i32 to index
      %c3_545 = arith.constant 3 : index
      %c0_546 = arith.constant 0 : index
      %935 = vector.load %arg20[%934, %c3_545, %c0_546] : memref<14x22x4xf32, #tpu.memory_space<vmem>>, vector<1x16x4xf32>
      %936 = vector.shape_cast %935 : vector<1x16x4xf32> to vector<16x4xf32>
      %c45 = arith.constant 45 : index
      %c0_547 = arith.constant 0 : index
      %c0_548 = arith.constant 0 : index
      %937 = vector.load %arg5[%c45, %c0_547, %c0_548] : memref<49x1x4xf32, #tpu.memory_space<vmem>>, vector<1x1x4xf32>
      %938 = vector.shape_cast %937 : vector<1x1x4xf32> to vector<1x4xf32>
      %939 = vector.broadcast %938 : vector<1x4xf32> to vector<16x4xf32>
      %940 = arith.mulf %936, %939 : vector<16x4xf32>
      %941 = arith.addf %922, %940 : vector<16x4xf32>
      %c45_549 = arith.constant 45 : index
      %c0_550 = arith.constant 0 : index
      %c0_551 = arith.constant 0 : index
      %942 = vector.load %arg7[%c45_549, %c0_550, %c0_551] : memref<49x1x4xf32, #tpu.memory_space<vmem>>, vector<1x1x4xf32>
      %943 = vector.shape_cast %942 : vector<1x1x4xf32> to vector<1x4xf32>
      %944 = vector.broadcast %943 : vector<1x4xf32> to vector<16x4xf32>
      %945 = arith.mulf %936, %944 : vector<16x4xf32>
      %946 = arith.addf %927, %945 : vector<16x4xf32>
      %c45_552 = arith.constant 45 : index
      %c0_553 = arith.constant 0 : index
      %c0_554 = arith.constant 0 : index
      %947 = vector.load %arg9[%c45_552, %c0_553, %c0_554] : memref<49x1x4xf32, #tpu.memory_space<vmem>>, vector<1x1x4xf32>
      %948 = vector.shape_cast %947 : vector<1x1x4xf32> to vector<1x4xf32>
      %949 = vector.broadcast %948 : vector<1x4xf32> to vector<16x4xf32>
      %950 = arith.mulf %936, %949 : vector<16x4xf32>
      %951 = arith.addf %932, %950 : vector<16x4xf32>
      %c6_i32_555 = arith.constant 6 : i32
      %952 = arith.addi %arg21, %c6_i32_555 : i32
      %953 = arith.index_cast %952 : i32 to index
      %c4_556 = arith.constant 4 : index
      %c0_557 = arith.constant 0 : index
      %954 = vector.load %arg20[%953, %c4_556, %c0_557] : memref<14x22x4xf32, #tpu.memory_space<vmem>>, vector<1x16x4xf32>
      %955 = vector.shape_cast %954 : vector<1x16x4xf32> to vector<16x4xf32>
      %c46 = arith.constant 46 : index
      %c0_558 = arith.constant 0 : index
      %c0_559 = arith.constant 0 : index
      %956 = vector.load %arg5[%c46, %c0_558, %c0_559] : memref<49x1x4xf32, #tpu.memory_space<vmem>>, vector<1x1x4xf32>
      %957 = vector.shape_cast %956 : vector<1x1x4xf32> to vector<1x4xf32>
      %958 = vector.broadcast %957 : vector<1x4xf32> to vector<16x4xf32>
      %959 = arith.mulf %955, %958 : vector<16x4xf32>
      %960 = arith.addf %941, %959 : vector<16x4xf32>
      %c46_560 = arith.constant 46 : index
      %c0_561 = arith.constant 0 : index
      %c0_562 = arith.constant 0 : index
      %961 = vector.load %arg7[%c46_560, %c0_561, %c0_562] : memref<49x1x4xf32, #tpu.memory_space<vmem>>, vector<1x1x4xf32>
      %962 = vector.shape_cast %961 : vector<1x1x4xf32> to vector<1x4xf32>
      %963 = vector.broadcast %962 : vector<1x4xf32> to vector<16x4xf32>
      %964 = arith.mulf %955, %963 : vector<16x4xf32>
      %965 = arith.addf %946, %964 : vector<16x4xf32>
      %c46_563 = arith.constant 46 : index
      %c0_564 = arith.constant 0 : index
      %c0_565 = arith.constant 0 : index
      %966 = vector.load %arg9[%c46_563, %c0_564, %c0_565] : memref<49x1x4xf32, #tpu.memory_space<vmem>>, vector<1x1x4xf32>
      %967 = vector.shape_cast %966 : vector<1x1x4xf32> to vector<1x4xf32>
      %968 = vector.broadcast %967 : vector<1x4xf32> to vector<16x4xf32>
      %969 = arith.mulf %955, %968 : vector<16x4xf32>
      %970 = arith.addf %951, %969 : vector<16x4xf32>
      %c6_i32_566 = arith.constant 6 : i32
      %971 = arith.addi %arg21, %c6_i32_566 : i32
      %972 = arith.index_cast %971 : i32 to index
      %c5_567 = arith.constant 5 : index
      %c0_568 = arith.constant 0 : index
      %973 = vector.load %arg20[%972, %c5_567, %c0_568] : memref<14x22x4xf32, #tpu.memory_space<vmem>>, vector<1x16x4xf32>
      %974 = vector.shape_cast %973 : vector<1x16x4xf32> to vector<16x4xf32>
      %c47 = arith.constant 47 : index
      %c0_569 = arith.constant 0 : index
      %c0_570 = arith.constant 0 : index
      %975 = vector.load %arg5[%c47, %c0_569, %c0_570] : memref<49x1x4xf32, #tpu.memory_space<vmem>>, vector<1x1x4xf32>
      %976 = vector.shape_cast %975 : vector<1x1x4xf32> to vector<1x4xf32>
      %977 = vector.broadcast %976 : vector<1x4xf32> to vector<16x4xf32>
      %978 = arith.mulf %974, %977 : vector<16x4xf32>
      %979 = arith.addf %960, %978 : vector<16x4xf32>
      %c47_571 = arith.constant 47 : index
      %c0_572 = arith.constant 0 : index
      %c0_573 = arith.constant 0 : index
      %980 = vector.load %arg7[%c47_571, %c0_572, %c0_573] : memref<49x1x4xf32, #tpu.memory_space<vmem>>, vector<1x1x4xf32>
      %981 = vector.shape_cast %980 : vector<1x1x4xf32> to vector<1x4xf32>
      %982 = vector.broadcast %981 : vector<1x4xf32> to vector<16x4xf32>
      %983 = arith.mulf %974, %982 : vector<16x4xf32>
      %984 = arith.addf %965, %983 : vector<16x4xf32>
      %c47_574 = arith.constant 47 : index
      %c0_575 = arith.constant 0 : index
      %c0_576 = arith.constant 0 : index
      %985 = vector.load %arg9[%c47_574, %c0_575, %c0_576] : memref<49x1x4xf32, #tpu.memory_space<vmem>>, vector<1x1x4xf32>
      %986 = vector.shape_cast %985 : vector<1x1x4xf32> to vector<1x4xf32>
      %987 = vector.broadcast %986 : vector<1x4xf32> to vector<16x4xf32>
      %988 = arith.mulf %974, %987 : vector<16x4xf32>
      %989 = arith.addf %970, %988 : vector<16x4xf32>
      %c6_i32_577 = arith.constant 6 : i32
      %990 = arith.addi %arg21, %c6_i32_577 : i32
      %991 = arith.index_cast %990 : i32 to index
      %c6_578 = arith.constant 6 : index
      %c0_579 = arith.constant 0 : index
      %992 = vector.load %arg20[%991, %c6_578, %c0_579] : memref<14x22x4xf32, #tpu.memory_space<vmem>>, vector<1x16x4xf32>
      %993 = vector.shape_cast %992 : vector<1x16x4xf32> to vector<16x4xf32>
      %c48 = arith.constant 48 : index
      %c0_580 = arith.constant 0 : index
      %c0_581 = arith.constant 0 : index
      %994 = vector.load %arg5[%c48, %c0_580, %c0_581] : memref<49x1x4xf32, #tpu.memory_space<vmem>>, vector<1x1x4xf32>
      %995 = vector.shape_cast %994 : vector<1x1x4xf32> to vector<1x4xf32>
      %996 = vector.broadcast %995 : vector<1x4xf32> to vector<16x4xf32>
      %997 = arith.mulf %993, %996 : vector<16x4xf32>
      %998 = arith.addf %979, %997 : vector<16x4xf32>
      %c48_582 = arith.constant 48 : index
      %c0_583 = arith.constant 0 : index
      %c0_584 = arith.constant 0 : index
      %999 = vector.load %arg7[%c48_582, %c0_583, %c0_584] : memref<49x1x4xf32, #tpu.memory_space<vmem>>, vector<1x1x4xf32>
      %1000 = vector.shape_cast %999 : vector<1x1x4xf32> to vector<1x4xf32>
      %1001 = vector.broadcast %1000 : vector<1x4xf32> to vector<16x4xf32>
      %1002 = arith.mulf %993, %1001 : vector<16x4xf32>
      %1003 = arith.addf %984, %1002 : vector<16x4xf32>
      %c48_585 = arith.constant 48 : index
      %c0_586 = arith.constant 0 : index
      %c0_587 = arith.constant 0 : index
      %1004 = vector.load %arg9[%c48_585, %c0_586, %c0_587] : memref<49x1x4xf32, #tpu.memory_space<vmem>>, vector<1x1x4xf32>
      %1005 = vector.shape_cast %1004 : vector<1x1x4xf32> to vector<1x4xf32>
      %1006 = vector.broadcast %1005 : vector<1x4xf32> to vector<16x4xf32>
      %1007 = arith.mulf %993, %1006 : vector<16x4xf32>
      %1008 = arith.addf %989, %1007 : vector<16x4xf32>
      %1009 = arith.mulf %998, %1003 : vector<16x4xf32>
      %1010 = arith.addf %1009, %1008 : vector<16x4xf32>
      %1011 = arith.addi %0, %arg21 : i32
      %c0_588 = arith.constant 0 : index
      %1012 = arith.index_cast %1011 : i32 to index
      %c0_589 = arith.constant 0 : index
      %c0_590 = arith.constant 0 : index
      %1013 = vector.load %arg2[%c0_588, %1012, %c0_589, %c0_590] : memref<1x16x16x4xf32, #tpu.memory_space<vmem>>, vector<1x1x16x4xf32>
      %1014 = vector.shape_cast %1013 : vector<1x1x16x4xf32> to vector<16x4xf32>
      %1015 = vector.broadcast %3 : vector<1x4xf32> to vector<16x4xf32>
      %1016 = arith.mulf %1015, %1010 : vector<16x4xf32>
      %1017 = arith.addf %1014, %1016 : vector<16x4xf32>
      %c0_591 = arith.constant 0 : index
      %1018 = arith.index_cast %arg21 : i32 to index
      %c0_592 = arith.constant 0 : index
      %c0_593 = arith.constant 0 : index
      %1019 = vector.load %arg19[%c0_591, %1018, %c0_592, %c0_593] : memref<1x8x16x4xf32, #tpu.memory_space<vmem>>, vector<1x1x16x4xf32>
      %1020 = vector.shape_cast %1019 : vector<1x1x16x4xf32> to vector<16x4xf32>
      %1021 = vector.shape_cast %1017 : vector<16x4xf32> to vector<1x1x16x4xf32>
      tpu.vector_store %arg19[%c0_591, %1018, %c0_592, %c0_593], %1021 {strides = array<i32>} : memref<1x8x16x4xf32, #tpu.memory_space<vmem>>, vector<1x1x16x4xf32>,
    }
    %c8_i32_14 = arith.constant 8 : i32
    %c0_15 = arith.constant 0 : index
    %c0_16 = arith.constant 0 : index
    %c0_17 = arith.constant 0 : index
    %c0_18 = arith.constant 0 : index
    %9 = vector.load %arg19[%c0_15, %c0_16, %c0_17, %c0_18] : memref<1x8x16x4xf32, #tpu.memory_space<vmem>>, vector<1x8x16x4xf32>
    %10 = vector.shape_cast %9 : vector<1x8x16x4xf32> to vector<8x16x4xf32>
    %cst_19 = arith.constant dense<0.000000e+00> : vector<8x16xf32>
    %11 = vector.multi_reduction <add>, %10, %cst_19 [2] : vector<8x16x4xf32> to vector<8x16xf32>
    %12 = vector.shape_cast %11 : vector<8x16xf32> to vector<8x16x1xf32>
    %cst_20 = arith.constant 4.000000e+00 : f32
    %13 = vector.broadcast %cst_20 : f32 to vector<8x16x1xf32>
    %14 = arith.divf %12, %13 : vector<8x16x1xf32>
    %15 = vector.broadcast %14 : vector<8x16x1xf32> to vector<8x16x4xf32>
    %16 = arith.subf %10, %15 : vector<8x16x4xf32>
    %17 = arith.mulf %16, %16 : vector<8x16x4xf32>
    %cst_21 = arith.constant dense<0.000000e+00> : vector<8x16xf32>
    %18 = vector.multi_reduction <add>, %17, %cst_21 [2] : vector<8x16x4xf32> to vector<8x16xf32>
    %19 = vector.shape_cast %18 : vector<8x16xf32> to vector<8x16x1xf32>
    %cst_22 = arith.constant 4.000000e+00 : f32
    %20 = vector.broadcast %cst_22 : f32 to vector<8x16x1xf32>
    %21 = arith.divf %19, %20 : vector<8x16x1xf32>
    %22 = vector.broadcast %14 : vector<8x16x1xf32> to vector<8x16x4xf32>
    %23 = arith.subf %10, %22 : vector<8x16x4xf32>
    %cst_23 = arith.constant 9.99999997E-7 : f32
    %24 = vector.broadcast %cst_23 : f32 to vector<8x16x1xf32>
    %25 = arith.addf %21, %24 : vector<8x16x1xf32>
    %26 = math.rsqrt %25 : vector<8x16x1xf32>
    %27 = vector.broadcast %26 : vector<8x16x1xf32> to vector<8x16x4xf32>
    %28 = arith.mulf %23, %27 : vector<8x16x4xf32>
    %c0_24 = arith.constant 0 : index
    %c0_25 = arith.constant 0 : index
    %29 = vector.load %arg12[%c0_24, %c0_25] : memref<1x4xf32, #tpu.memory_space<vmem>>, vector<1x4xf32>
    %30 = vector.shape_cast %29 : vector<1x4xf32> to vector<1x1x4xf32>
    %31 = vector.broadcast %30 : vector<1x1x4xf32> to vector<8x16x4xf32>
    %32 = arith.mulf %28, %31 : vector<8x16x4xf32>
    %c0_26 = arith.constant 0 : index
    %c0_27 = arith.constant 0 : index
    %33 = vector.load %arg13[%c0_26, %c0_27] : memref<1x4xf32, #tpu.memory_space<vmem>>, vector<1x4xf32>
    %34 = vector.shape_cast %33 : vector<1x4xf32> to vector<1x1x4xf32>
    %35 = vector.broadcast %34 : vector<1x1x4xf32> to vector<8x16x4xf32>
    %36 = arith.addf %32, %35 : vector<8x16x4xf32>
    %37 = vector.shape_cast %36 : vector<8x16x4xf32> to vector<128x4xf32>
    %38 = arith.truncf %37 : vector<128x4xf32> to vector<128x4xbf16>
    %c0_28 = arith.constant 0 : index
    %c0_29 = arith.constant 0 : index
    %39 = vector.load %arg14[%c0_28, %c0_29] : memref<4x16xbf16, #tpu.memory_space<vmem>>, vector<4x16xbf16>
    %cst_30 = arith.constant dense<0.000000e+00> : vector<128x16xf32>
    %40 = tpu.matmul %38, %39, %cst_30 {dimension_numbers = #tpu.dot_dimension_numbers<[1], [0], [0], [1], [0, 0, 1, 1], [], []>} : vector<128x4xbf16>, vector<4x16xbf16>, vector<128x16xf32> -> vector<128x16xf32>
    %c0_31 = arith.constant 0 : index
    %c0_32 = arith.constant 0 : index
    %41 = vector.load %arg15[%c0_31, %c0_32] : memref<1x16xf32, #tpu.memory_space<vmem>>, vector<1x16xf32>
    %42 = vector.broadcast %41 : vector<1x16xf32> to vector<128x16xf32>
    %43 = arith.addf %40, %42 : vector<128x16xf32>
    %cst_33 = arith.constant 5.000000e-01 : f32
    %44 = vector.broadcast %cst_33 : f32 to vector<128x16xf32>
    %45 = arith.mulf %44, %43 : vector<128x16xf32>
    %cst_34 = arith.constant 0.707106769 : f32
    %46 = vector.broadcast %cst_34 : f32 to vector<128x16xf32>
    %47 = arith.mulf %43, %46 : vector<128x16xf32>
    %48 = math.erf %47 : vector<128x16xf32>
    %cst_35 = arith.constant 1.000000e+00 : f32
    %49 = vector.broadcast %cst_35 : f32 to vector<128x16xf32>
    %50 = arith.addf %49, %48 : vector<128x16xf32>
    %51 = arith.mulf %45, %50 : vector<128x16xf32>
    %52 = arith.truncf %51 : vector<128x16xf32> to vector<128x16xbf16>
    %c0_36 = arith.constant 0 : index
    %c0_37 = arith.constant 0 : index
    %53 = vector.load %arg16[%c0_36, %c0_37] : memref<16x4xbf16, #tpu.memory_space<vmem>>, vector<16x4xbf16>
    %cst_38 = arith.constant dense<0.000000e+00> : vector<128x4xf32>
    %54 = tpu.matmul %52, %53, %cst_38 {dimension_numbers = #tpu.dot_dimension_numbers<[1], [0], [0], [1], [0, 0, 1, 1], [], []>} : vector<128x16xbf16>, vector<16x4xbf16>, vector<128x4xf32> -> vector<128x4xf32>
    %c0_39 = arith.constant 0 : index
    %c0_40 = arith.constant 0 : index
    %55 = vector.load %arg17[%c0_39, %c0_40] : memref<1x4xf32, #tpu.memory_space<vmem>>, vector<1x4xf32>
    %56 = vector.broadcast %55 : vector<1x4xf32> to vector<128x4xf32>
    %57 = arith.addf %54, %56 : vector<128x4xf32>
    %58 = vector.shape_cast %57 : vector<128x4xf32> to vector<8x16x4xf32>
    %c0_41 = arith.constant 0 : index
    %c0_42 = arith.constant 0 : index
    %59 = vector.load %arg18[%c0_41, %c0_42] : memref<1x4xf32, #tpu.memory_space<vmem>>, vector<1x4xf32>
    %60 = vector.shape_cast %59 : vector<1x4xf32> to vector<1x1x4xf32>
    %61 = vector.broadcast %60 : vector<1x1x4xf32> to vector<8x16x4xf32>
    %62 = arith.mulf %58, %61 : vector<8x16x4xf32>
    %63 = arith.addf %10, %62 : vector<8x16x4xf32>
    %c0_43 = arith.constant 0 : index
    %c0_44 = arith.constant 0 : index
    %c0_45 = arith.constant 0 : index
    %c0_46 = arith.constant 0 : index
    %64 = vector.load %arg19[%c0_43, %c0_44, %c0_45, %c0_46] : memref<1x8x16x4xf32, #tpu.memory_space<vmem>>, vector<1x8x16x4xf32>
    %65 = vector.shape_cast %64 : vector<1x8x16x4xf32> to vector<8x16x4xf32>
    %66 = vector.shape_cast %63 : vector<8x16x4xf32> to vector<1x8x16x4xf32>
    tpu.vector_store %arg19[%c0_43, %c0_44, %c0_45, %c0_46], %66 {strides = array<i32>} : memref<1x8x16x4xf32, #tpu.memory_space<vmem>>, vector<1x8x16x4xf32>,
    return
  }
  func.func @transform_0(%arg0: i32, %arg1: i32) -> (i32, i32, i32, i32) {
    %c0_i32 = arith.constant 0 : i32
    %c0_i32_0 = arith.constant 0 : i32
    %c0_i32_1 = arith.constant 0 : i32
    %c0_i32_2 = arith.constant 0 : i32
    return %arg0, %c0_i32, %c0_i32_0, %c0_i32_1 : i32, i32, i32, i32
  }
  func.func @transform_1(%arg0: i32, %arg1: i32) -> (i32, i32) {
    %c0_i32 = arith.constant 0 : i32
    %c0_i32_0 = arith.constant 0 : i32
    %c0_i32_1 = arith.constant 0 : i32
    return %c0_i32, %c0_i32_0 : i32, i32
  }
  func.func @transform_2(%arg0: i32, %arg1: i32) -> (i32, i32) {
    %c0_i32 = arith.constant 0 : i32
    %c0_i32_0 = arith.constant 0 : i32
    %c0_i32_1 = arith.constant 0 : i32
    return %c0_i32, %c0_i32_0 : i32, i32
  }
  func.func @transform_3(%arg0: i32, %arg1: i32) -> (i32, i32, i32) {
    %c0_i32 = arith.constant 0 : i32
    %c0_i32_0 = arith.constant 0 : i32
    %c0_i32_1 = arith.constant 0 : i32
    %c0_i32_2 = arith.constant 0 : i32
    return %c0_i32, %c0_i32_0, %c0_i32_1 : i32, i32, i32
  }
  func.func @transform_4(%arg0: i32, %arg1: i32) -> (i32, i32) {
    %c0_i32 = arith.constant 0 : i32
    %c0_i32_0 = arith.constant 0 : i32
    %c0_i32_1 = arith.constant 0 : i32
    return %c0_i32, %c0_i32_0 : i32, i32
  }
  func.func @transform_5(%arg0: i32, %arg1: i32) -> (i32, i32, i32) {
    %c0_i32 = arith.constant 0 : i32
    %c0_i32_0 = arith.constant 0 : i32
    %c0_i32_1 = arith.constant 0 : i32
    %c0_i32_2 = arith.constant 0 : i32
    return %c0_i32, %c0_i32_0, %c0_i32_1 : i32, i32, i32
  }
  func.func @transform_6(%arg0: i32, %arg1: i32) -> (i32, i32) {
    %c0_i32 = arith.constant 0 : i32
    %c0_i32_0 = arith.constant 0 : i32
    %c0_i32_1 = arith.constant 0 : i32
    return %c0_i32, %c0_i32_0 : i32, i32
  }
  func.func @transform_7(%arg0: i32, %arg1: i32) -> (i32, i32, i32) {
    %c0_i32 = arith.constant 0 : i32
    %c0_i32_0 = arith.constant 0 : i32
    %c0_i32_1 = arith.constant 0 : i32
    %c0_i32_2 = arith.constant 0 : i32
    return %c0_i32, %c0_i32_0, %c0_i32_1 : i32, i32, i32
  }
  func.func @transform_8(%arg0: i32, %arg1: i32) -> (i32, i32) {
    %c0_i32 = arith.constant 0 : i32
    %c0_i32_0 = arith.constant 0 : i32
    %c0_i32_1 = arith.constant 0 : i32
    return %c0_i32, %c0_i32_0 : i32, i32
  }
  func.func @transform_9(%arg0: i32, %arg1: i32) -> (i32, i32) {
    %c0_i32 = arith.constant 0 : i32
    %c0_i32_0 = arith.constant 0 : i32
    %c0_i32_1 = arith.constant 0 : i32
    return %c0_i32, %c0_i32_0 : i32, i32
  }
  func.func @transform_10(%arg0: i32, %arg1: i32) -> (i32, i32) {
    %c0_i32 = arith.constant 0 : i32
    %c0_i32_0 = arith.constant 0 : i32
    %c0_i32_1 = arith.constant 0 : i32
    return %c0_i32, %c0_i32_0 : i32, i32
  }
  func.func @transform_11(%arg0: i32, %arg1: i32) -> (i32, i32) {
    %c0_i32 = arith.constant 0 : i32
    %c0_i32_0 = arith.constant 0 : i32
    %c0_i32_1 = arith.constant 0 : i32
    return %c0_i32, %c0_i32_0 : i32, i32
  }
  func.func @transform_12(%arg0: i32, %arg1: i32) -> (i32, i32) {
    %c0_i32 = arith.constant 0 : i32
    %c0_i32_0 = arith.constant 0 : i32
    %c0_i32_1 = arith.constant 0 : i32
    return %c0_i32, %c0_i32_0 : i32, i32
  }
  func.func @transform_13(%arg0: i32, %arg1: i32) -> (i32, i32) {
    %c0_i32 = arith.constant 0 : i32
    %c0_i32_0 = arith.constant 0 : i32
    %c0_i32_1 = arith.constant 0 : i32
    return %c0_i32, %c0_i32_0 : i32, i32
  }
  func.func @transform_14(%arg0: i32, %arg1: i32) -> (i32, i32) {
    %c0_i32 = arith.constant 0 : i32
    %c0_i32_0 = arith.constant 0 : i32
    %c0_i32_1 = arith.constant 0 : i32
    return %c0_i32, %c0_i32_0 : i32, i32
  }
  func.func @transform_15(%arg0: i32, %arg1: i32) -> (i32, i32) {
    %c0_i32 = arith.constant 0 : i32
    %c0_i32_0 = arith.constant 0 : i32
    %c0_i32_1 = arith.constant 0 : i32
    return %c0_i32, %c0_i32_0 : i32, i32
  }
  func.func @transform_16(%arg0: i32, %arg1: i32) -> (i32, i32) {
    %c0_i32 = arith.constant 0 : i32
    %c0_i32_0 = arith.constant 0 : i32
    %c0_i32_1 = arith.constant 0 : i32
    return %c0_i32, %c0_i32_0 : i32, i32
  }
  func.func @transform_17(%arg0: i32, %arg1: i32) -> (i32, i32, i32, i32) {
    %c0_i32 = arith.constant 0 : i32
    %c0_i32_0 = arith.constant 0 : i32
    %c0_i32_1 = arith.constant 0 : i32
    return %arg0, %arg1, %c0_i32, %c0_i32_0 : i32, i32, i32, i32
  }
}

</mosaic_0001>

<bundles_post_ra>
// kernel: tpu_custom_call.1
= control target key start
LH: loop header
LB: loop body
LE: loop exit
PB: predicated region body
PF: predicated region fallthrough
CT: control target
= control target key end

     0   :  { %s4404_s24 = smov 0   ;;  %s4406_s25 = smov 0   ;;  %s6397_s0 = inlined_call_operand.vmem [shape: f32[2,16,16,4], index: 0, kind: input, shape index: {}]   ;;  %s6398_s1 = inlined_call_operand.vmem [shape: f32[1,4], index: 1, kind: input, shape index: {}]   ;;  %s6399_s2 = inlined_call_operand.vmem [shape: f32[1,4], index: 2, kind: input, shape index: {}]   ;;  %s6400_s3 = inlined_call_operand.vmem [shape: f32[49,1,4], index: 3, kind: input, shape index: {}]   ;;  %s6401_s4 = inlined_call_operand.vmem [shape: f32[1,4], index: 4, kind: input, shape index: {}]   ;;  %s6402_s5 = inlined_call_operand.vmem [shape: f32[49,1,4], index: 5, kind: input, shape index: {}]   ;;  %s6403_s6 = inlined_call_operand.vmem [shape: f32[1,4], index: 6, kind: input, shape index: {}]   ;;  %s6404_s7 = inlined_call_operand.vmem [shape: f32[49,1,4], index: 7, kind: input, shape index: {}]   ;;  %s6405_s8 = inlined_call_operand.vmem [shape: f32[1,4], index: 8, kind: input, shape index: {}]   ;;  %s6406_s9 = inlined_call_operand.vmem [shape: f32[1,4], index: 9, kind: input, shape index: {}]   ;;  %s6407_s10 = inlined_call_operand.vmem [shape: f32[1,4], index: 10, kind: input, shape index: {}]   ;;  %s6408_s11 = inlined_call_operand.vmem [shape: f32[1,4], index: 11, kind: input, shape index: {}]   ;;  %s6409_s12 = inlined_call_operand.vmem [shape: bf16[4,16], index: 12, kind: input, shape index: {}]   ;;  %s6410_s13 = inlined_call_operand.vmem [shape: f32[1,16], index: 13, kind: input, shape index: {}]   ;;  %s6411_s14 = inlined_call_operand.vmem [shape: bf16[16,4], index: 14, kind: input, shape index: {}]   ;;  %s6412_s15 = inlined_call_operand.vmem [shape: f32[1,4], index: 15, kind: input, shape index: {}]   ;;  %s6413_s16 = inlined_call_operand.vmem [shape: f32[1,4], index: 16, kind: input, shape index: {}]   ;;  %s6414_s17 = inlined_call_operand.vmem [shape: f32[2,16,16,4], index: 17, kind: output, shape index: {}]  }
   0x1   :  { %6416 = sst [smem:[#allocation6_spill]] %s6397_s0  ;;  %s4408_s26 = smov 0  }
   0x2   :  { %6417 = sst [smem:[#allocation7_spill]] %s6398_s1  ;;  %s4410_s27 = smov 0  }
   0x3   :  { %6418 = sst [smem:[#allocation8_spill]] %s6399_s2  ;;  %s4412_s28 = smov 0  }
   0x4   :  { %6419 = sst [smem:[#allocation9_spill]] %s6406_s9 }
   0x5   :  { %6420 = sst [smem:[#allocation10_spill]] %s6414_s17 }
   0x6 LB: > { %6421 = sst [smem:[#allocation3_spill]] %s4298_s27  ;;  %s36_s29 = sadd.s32 1, %s4294_s26  ;;  %s4302_s28 = sphi %s4412_s28, %s27_s28   ;;  %s4298_s27 = sphi %s4410_s27, %s6484_s27   ;;  %s4294_s26 = sphi %s4408_s26, %s6486_s26   ;;  %s4290_s25 = sphi %s4406_s25, %s6482_s25   ;;  %s4286_s24 = sphi %s4404_s24, %s6485_s24  }
   0x7   : > { %s39_s0 = sadd.s32 1, %s4298_s27  ;;  %p37_p0 = scmp.ge.s32.totalorder %s36_s29, 2 }
   0x8   : > { %p3666_p1 = scmp.ge.s32.totalorder %s4302_s28, 1  ;;  %p501_p2 = scmp.lt.s32.totalorder %s4302_s28, 5 }
   0x9   : > { %s6488_s29 = smov (%p37_p0, %s36_s29), 0  ;;  %s6490_s0 = smov (!%p37_p0, %s39_s0), %s4298_s27 }
   0xa   : > { %6422 = sst [smem:[#allocation4_spill]] %s6488_s29  ;;  %p502_p3 = pnand %p3666_p1, %p501_p2 }
   0xb   : > { %p41_p4 = scmp.ge.s32.totalorder %s6490_s0, 2  ;;  %p558_p5 = scmp.lt.s32.totalorder (!%p502_p3), %s4290_s25, 1 }
   0xc   : > { %505 = sbr.rel (%p502_p3) target bundleno = 1272 (0x4f8), region = 88  ;;  %s4434_s30 = sshll.u32 (!%p502_p3), %s4286_s24, 3 }
   0xd   : > { %s6492_s0 = smov (%p41_p4, %s6490_s0), 0  ;;  %s6424_s1 = sld [smem:[#allocation7_spill]] (!%p502_p3) }
   0xe   : > { %6423 = sst [smem:[#allocation5_spill]] %s6492_s0  ;;  %p566_p6 = scmp.lt.s32.totalorder (!%p502_p3), %s4434_s30, 15 }
   0xf   : > { %s6425_s2 = sld [smem:[#allocation8_spill]] (!%p502_p3) }
  0x10   : > { %s6426_s9 = sld [smem:[#allocation9_spill]] (!%p502_p3) }
  0x11   : > { %vm579_vm0 = vcmask 26624   ;;  %s6494_s25 = smov (!%p558_p5, %s4290_s25), 1  ;;  %v4312_v3 = vmov 0.0   ;;  %s6427_s21 = sld [smem:[#allocation6_spill]] }
  0x12   : > { %580 = vst.msk [vmem:[#allocation2] sm:$0x7] %vm579_vm0, %v4312_v3  ;;  %s567_s24 = scalar_select %p566_p6, %s4434_s30, 15 }
  0x13   : > { %v4439_v0 = vld [vmem:[%s6424_s1] sm:$0x1]  ;;  %581 = vst.msk [vmem:[#allocation2 + $0x18] sm:$0x7] %vm579_vm0, %v4312_v3  ;;  %s3950_s18 = sshll.u32 %s6494_s25, 8  ;;  %s3671_s19 = sshll.u32 %s6494_s25, 5 }
  0x14   : > { %582 = vst.msk [vmem:[#allocation2 + $0x30] sm:$0x7] %vm579_vm0, %v4312_v3  ;;  %s3670_s22 = sshll.u32 %s567_s24, 1  ;;  %s6428_s17 = sld [smem:[#allocation10_spill]] }
  0x15   : > { %v4444_v1 = vld [vmem:[%s6425_s2] sm:$0x1]  ;;  %583 = vst.msk [vmem:[#allocation2 + $0x48] sm:$0x7] %vm579_vm0, %v4312_v3  ;;  %s570_s23 = sadd.s32 %s3671_s19, %s3670_s22 }
  0x16   : > { %v4450_v2 = vld [vmem:[%s6426_s9] sm:$0x1]  ;;  %584 = vst.msk [vmem:[#allocation2 + $0x60] sm:$0x7] %vm579_vm0, %v4312_v3  ;;  %s3672_s9 = sshll.u32 %s570_s23, 3 }
  0x17   : > { %s4459_s2 = scalar_lea.vmem %s6427_s21, %s3950_s18  ;;  %585 = vst.msk [vmem:[#allocation2 + $0x78] sm:$0x7] %vm579_vm0, %v4312_v3 }
  0x18   : > { %586 = vst.msk [vmem:[#allocation2 + $0x90] sm:$0x7] %vm579_vm0, %v4312_v3 }
  0x19   : > { %587 = vst.msk [vmem:[#allocation2 + $0xa8] sm:$0x7] %vm579_vm0, %v4312_v3 }
  0x1a   : > { %s4467_s25 = scalar_lea.vmem %s6428_s17, %s3672_s9  ;;  %588 = vst.msk [vmem:[#allocation2 + $0xc0] sm:$0x7] %vm579_vm0, %v4312_v3  ;;  %s4491_s9 = smov 0  }
  0x1b   : > { %589 = vst.msk [vmem:[#allocation2 + $0xd8] sm:$0x7] %vm579_vm0, %v4312_v3 }
  0x1c   : > { %590 = vst.msk [vmem:[#allocation2 + $0xf0] sm:$0x7] %vm579_vm0, %v4312_v3 }
  0x1d   : > { %591 = vst.msk [vmem:[#allocation2 + $0x108] sm:$0x7] %vm579_vm0, %v4312_v3 }
  0x1e   : > { %592 = vst.msk [vmem:[#allocation2 + $0x120] sm:$0x7] %vm579_vm0, %v4312_v3 }
  0x1f   : > { %593 = vst.msk [vmem:[#allocation2 + $0x138] sm:$0x7] %vm579_vm0, %v4312_v3 }
  0x20   : > { %594 = vst.msk [vmem:[#allocation2 + $0x13] sm:$0x7] %vm579_vm0, %v4312_v3 }
  0x21   : > { %595 = vst.msk [vmem:[#allocation2 + $0x2b] sm:$0x7] %vm579_vm0, %v4312_v3 }
  0x22   : > { %596 = vst.msk [vmem:[#allocation2 + $0x43] sm:$0x7] %vm579_vm0, %v4312_v3 }
  0x23   : > { %597 = vst.msk [vmem:[#allocation2 + $0x5b] sm:$0x7] %vm579_vm0, %v4312_v3 }
  0x24   : > { %598 = vst.msk [vmem:[#allocation2 + $0x73] sm:$0x7] %vm579_vm0, %v4312_v3 }
  0x25   : > { %599 = vst.msk [vmem:[#allocation2 + $0x8b] sm:$0x7] %vm579_vm0, %v4312_v3 }
  0x26   : > { %600 = vst.msk [vmem:[#allocation2 + $0xa3] sm:$0x7] %vm579_vm0, %v4312_v3 }
  0x27   : > { %601 = vst.msk [vmem:[#allocation2 + $0xbb] sm:$0x7] %vm579_vm0, %v4312_v3 }
  0x28   : > { %602 = vst.msk [vmem:[#allocation2 + $0xd3] sm:$0x7] %vm579_vm0, %v4312_v3 }
  0x29   : > { %603 = vst.msk [vmem:[#allocation2 + $0xeb] sm:$0x7] %vm579_vm0, %v4312_v3 }
  0x2a   : > { %604 = vst.msk [vmem:[#allocation2 + $0x103] sm:$0x7] %vm579_vm0, %v4312_v3 }
  0x2b   : > { %605 = vst.msk [vmem:[#allocation2 + $0x11b] sm:$0x7] %vm579_vm0, %v4312_v3 }
  0x2c   : > { %606 = vst.msk [vmem:[#allocation2 + $0x133] sm:$0x7] %vm579_vm0, %v4312_v3 }
  0x2d   : > { %607 = vst.msk [vmem:[#allocation2 + $0x14b] sm:$0x7] %vm579_vm0, %v4312_v3 }
  0x2e LB: >> { %s3674_s29 = sadd.s32 4294967293, %s4434_s30  ;;  %vm628_vm1 = vcmask 31744   ;;  %v4313_v8 = vmov 4.0   ;;  %v681_v39 = vperm.slane %v4439_v0, 0  ;;  %s695_s21 = smul.u32 24, %s4306_s9  ;;  %v686_v42 = vperm.slane %v4444_v1, 0  ;;  %s4306_s9 = sphi %s4491_s9, %s613_s9  }
  0x2f   : >> { %s4498_s0 = sadd.s32 %s4306_s9, %s3674_s29  ;;  %4014 = vrcp.f32 %v4313_v8  ;;  %s613_s9 = sadd.s32 1, %s4306_s9  }
  0x30   : >> { %p620_p7 = scmp.gt.s32.totalorder %s4498_s0, 0  ;;  %p3675_p8 = scmp.lt.s32.totalorder %s4498_s0, 15 }
  0x31   : >> { %p616_p9 = scmp.ge.s32.totalorder %s4498_s0, 0  ;;  %p617_p10 = scmp.lt.s32.totalorder %s4498_s0, 16 }
  0x32   : >> { %s621_s24 = scalar_select %p620_p7, %s4498_s0, 0 }
  0x33   : >> { %p4516_p11 = pnand %p617_p10, %p616_p9  ;;  %s696_s22 = scalar_lea.vmem [#allocation2], %s695_s21 }
  0x34   : >> { %s6496_s24 = smov (!%p3675_p8, %s621_s24), 15  ;;  %p610_p12 = scmp.ge.s32.totalorder %s613_s9, 14  }
  0x35   : >> { %s3680_s18 = sshll.u32 %s6496_s24, 4  ;;  %v4015_v9 = vpop.eup %4014  ;;  %s4530_s23 = smov (%p610_p12), 0  }
  0x36   : >> { %s625_s19 = scalar_lea.vmem %s4459_s2, %s3680_s18  ;;  %v636_v10 = vmul.f32 4.0, %v4015_v9  ;;  %vm640_vm2 = vweird.f32 %v4015_v9 }
  0x37   : >> { %v626_v4 = vld [vmem:[%s625_s19] sm:$0xff]  ;;  %v627_v6 = vld [vmem:[%s625_s19 + $0x8] sm:$0xff]  ;;  %s3681_s20 = scalar_select %p4516_p11, 0, 1 }
  0x38   : >> { %v629_v5 = vsel %vm628_vm1, %v626_v4, 0.0  ;;  %v632_v7 = vsel %vm628_vm1, %v627_v6, 0.0  ;;  %v637_v11 = vsub.f32 1.0, %v636_v10 }
  0x39   : >> { %630 = vadd.xlane.f32.xlu0 %v629_v5  ;;  %v691_v44 = vstv %s3681_s20 }
  0x3a   : >> { %v638_v12 = vmul.f32 %v4015_v9, %v637_v11  ;;  %vm692_vm6 = vcmp.eq.s32.totalorder %v691_v44, 1 }
  0x3c   : >> { %v639_v13 = vadd.f32 %v4015_v9, %v638_v12 }
  0x3e   : >> { %v4506_v14 = vsel %vm640_vm2, %v4015_v9, %v639_v13 }
  0x41   : >> { %633 = vadd.xlane.f32.xlu0 %v632_v7 }
  0xac   : >> { %v631_v15 = vpop.xlane.xlu0 %630 }
  0xad   : >> { %v642_v16 = vmul.f32 %v4506_v14, %v631_v15 }
  0xaf   : >> { %v644_v17 = vsub.f32 %v626_v4, %v642_v16 }
  0xb1   : >> { %v646_v18 = vmul.f32 %v644_v17, %v644_v17 }
  0xb3   : >> { %v648_v19 = vsel %vm628_vm1, %v646_v18, 0.0 }
  0xb4   : >> { %649 = vadd.xlane.f32.xlu1 %v648_v19  ;;  %v634_v20 = vpop.xlane.xlu0 %633 }
  0xb5   : >> { %v643_v21 = vmul.f32 %v4506_v14, %v634_v20 }
  0xb7   : >> { %v645_v22 = vsub.f32 %v627_v6, %v643_v21 }
  0xb9   : >> { %v647_v23 = vmul.f32 %v645_v22, %v645_v22 }
  0xbb   : >> { %v651_v24 = vsel %vm628_vm1, %v647_v23, 0.0 }
  0xbc   : >> { %652 = vadd.xlane.f32.xlu1 %v651_v24 }
 0x127   : >> { %v650_v25 = vpop.xlane.xlu1 %649 }
 0x128   : >> { %v654_v26 = vmul.f32 %v650_v25, %v4506_v14 }
 0x12a   : >> { %v656_v27 = vadd.f32 1e-06, %v654_v26 }
 0x12c   : >> { %4016 = vrsqrt.f32 %v656_v27  ;;  %vm664_vm4 = vweird.f32 %v656_v27 }
 0x12f   : >> { %v653_v28 = vpop.xlane.xlu1 %652 }
 0x130   : >> { %v655_v29 = vmul.f32 %v653_v28, %v4506_v14 }
 0x132   : >> { %v4017_v30 = vpop.eup %4016  ;;  %v657_v31 = vadd.f32 1e-06, %v655_v29 }
 0x133   : >> { %v659_v32 = vmul.f32 %v4017_v30, %v656_v27  ;;  %vm665_vm3 = vweird.f32 %v4017_v30 }
 0x134   : >> { %4018 = vrsqrt.f32 %v657_v31  ;;  %vm666_vm5 = vmor %vm664_vm4, %vm665_vm3  ;;  %vm674_vm8 = vweird.f32 %v657_v31 }
 0x135   : >> { %v660_v33 = vmul.f32 %v4017_v30, %v659_v32 }
 0x137   : >> { %v661_v34 = vmul.f32 0.5, %v660_v33 }
 0x139   : >> { %v662_v35 = vsub.f32 1.5, %v661_v34 }
 0x13a   : >> { %v4019_v36 = vpop.eup %4018 }
 0x13b   : >> { %v663_v37 = vmul.f32 %v4017_v30, %v662_v35  ;;  %v669_v38 = vmul.f32 %v4019_v36, %v657_v31  ;;  %vm675_vm7 = vweird.f32 %v4019_v36 }
 0x13c   : >> { %vm676_vm9 = vmor %vm674_vm8, %vm675_vm7 }
 0x13d   : >> { %v667_v40 = vsel %vm666_vm5, %v4017_v30, %v663_v37  ;;  %v670_v41 = vmul.f32 %v4019_v36, %v669_v38 }
 0x13e   : >> { %v678_v43 = vmul.f32 %v667_v40, %v644_v17 }
 0x13f   : >> { %v671_v45 = vmul.f32 0.5, %v670_v41 }
 0x140   : >> { %v683_v46 = vmul.f32 %v681_v39, %v678_v43 }
 0x141   : >> { %v672_v47 = vsub.f32 1.5, %v671_v45 }
 0x142   : >> { %v688_v48 = vadd.f32 %v686_v42, %v683_v46 }
 0x143   : >> { %v673_v49 = vmul.f32 %v4019_v36, %v672_v47 }
 0x144   : >> { %v693_v50 = vsel %vm692_vm6, %v688_v48, 0.0 }
 0x145   : >> { %697 = vst.msk [vmem:[%s696_s22 + $0x3] sm:$0xff] %vm628_vm1, %v693_v50  ;;  %v677_v51 = vsel %vm676_vm9, %v4019_v36, %v673_v49 }
 0x146   : >> { %v679_v52 = vmul.f32 %v677_v51, %v645_v22 }
 0x148   : >> { %v684_v53 = vmul.f32 %v681_v39, %v679_v52 }
 0x149   : > { %612 = sbr.rel (!%p610_p12) target bundleno = 46 (0x2e), region = 287 }
 0x14a   : >> { %v689_v54 = vadd.f32 %v686_v42, %v684_v53 }
 0x14c   : >> { %v694_v55 = vsel %vm692_vm6, %v689_v54, 0.0 }
 0x14d   : >> { %698 = vst.msk [vmem:[%s696_s22 + $0xb] sm:$0xff] %vm628_vm1, %v694_v55 }
 0x14e LB: >> { %v4020_v56 = vld [vmem:[%s6400_s3] ss:$0 sm:$0xff]  ;;  %s705_s19 = smul.u32 24, %s4310_s23  ;;  %v4026_v7 = vld [vmem:[%s6400_s3 + $0x1] ss:$0 sm:$0xff]  ;;  %s2159_s18 = sadd.s32 %s4310_s23, %s4434_s30  ;;  %s4310_s23 = sphi %s4530_s23, %s704_s23  }
 0x14f   : >> { %v4022_v57 = vld [vmem:[%s6402_s5] ss:$0 sm:$0xff]  ;;  %v4027_v10 = vld [vmem:[%s6402_s5 + $0x1] ss:$0 sm:$0xff]  ;;  %v4029_v23 = vld [vmem:[%s6400_s3 + $0x2] ss:$0 sm:$0xff] }
 0x150   : >> { %v4021_v58 = vld [vmem:[%s6401_s4] ss:$0 sm:$0xff]  ;;  %s4554_s27 = scalar_lea.vmem [#allocation2], %s705_s19  ;;  %v4028_v11 = vld [vmem:[%s6404_s7 + $0x1] ss:$0 sm:$0xff]  ;;  %s3911_s1 = sshll.u32 %s4310_s23, 4 }
 0x151   : >> { %v4023_v59 = vld [vmem:[%s6403_s6] ss:$0 sm:$0xff]  ;;  %v4030_v24 = vld [vmem:[%s6402_s5 + $0x2] ss:$0 sm:$0xff]  ;;  %v4032_v36 = vld [vmem:[%s6400_s3 + $0x3] ss:$0 sm:$0xff]  ;;  %s2172_s9 = scalar_lea.vmem %s4467_s25, %s3911_s1 }
 0x152   : >> { %v4024_v60 = vld [vmem:[%s6404_s7] ss:$0 sm:$0xff]  ;;  %v4031_v29 = vld [vmem:[%s6404_s7 + $0x2] ss:$0 sm:$0xff]  ;;  %v4033_v41 = vld [vmem:[%s6402_s5 + $0x3] ss:$0 sm:$0xff] }
 0x153   : >> { %v4025_v61 = vld [vmem:[%s6405_s8] ss:$0 sm:$0xff]  ;;  %v4034_v46 = vld [vmem:[%s6404_s7 + $0x3] ss:$0 sm:$0xff]  ;;  %v4035_v53 = vld [vmem:[%s6400_s3 + $0x4] ss:$0 sm:$0xff] }
 0x154   : >> { %v707_v62 = vld [vmem:[%s4554_s27] sm:$0xff]  ;;  %v708_v63 = vld [vmem:[%s4554_s27 + $0x8] sm:$0xff]  ;;  %s704_s23 = sadd.s32 1, %s4310_s23  }
 0x155   : >> { %v745_v0 = vld [vmem:[%s4554_s27 + $0x1] sm:$0xff]  ;;  %v713_v1 = vmul.f32 %v4020_v56, %v707_v62  ;;  %v714_v3 = vmul.f32 %v4020_v56, %v708_v63  ;;  %v725_v4 = vmul.f32 %v4022_v57, %v707_v62  ;;  %v726_v5 = vmul.f32 %v4022_v57, %v708_v63  ;;  %v746_v6 = vld [vmem:[%s4554_s27 + $0x9] sm:$0xff]  ;;  %p701_p13 = scmp.ge.s32.totalorder %s704_s23, 8  }
 0x156   : >> { %v737_v8 = vmul.f32 %v4024_v60, %v707_v62  ;;  %v738_v9 = vmul.f32 %v4024_v60, %v708_v63  ;;  %v774_v17 = vld [vmem:[%s4554_s27 + $0x2] sm:$0xff]  ;;  %v775_v18 = vld [vmem:[%s4554_s27 + $0xa] sm:$0xff]  ;;  %v752_v21 = vmul.f32 %v4026_v7, %v745_v0  ;;  %v753_v22 = vmul.f32 %v4026_v7, %v746_v6 }
 0x157   : >> { %v719_v12 = vadd.f32 %v4021_v58, %v713_v1  ;;  %v720_v13 = vadd.f32 %v4021_v58, %v714_v3  ;;  %v731_v15 = vadd.f32 %v4023_v59, %v725_v4  ;;  %v732_v16 = vadd.f32 %v4023_v59, %v726_v5  ;;  %v803_v30 = vld [vmem:[%s4554_s27 + $0x3] sm:$0xff]  ;;  %v804_v35 = vld [vmem:[%s4554_s27 + $0xb] sm:$0xff] }
 0x158   : >> { %v743_v19 = vadd.f32 %v4025_v61, %v737_v8  ;;  %v744_v20 = vadd.f32 %v4025_v61, %v738_v9  ;;  %v761_v25 = vmul.f32 %v4027_v10, %v745_v0  ;;  %v762_v26 = vmul.f32 %v4027_v10, %v746_v6  ;;  %v832_v47 = vld [vmem:[%s4554_s27 + $0x4] sm:$0xff]  ;;  %v833_v48 = vld [vmem:[%s4554_s27 + $0xc] sm:$0xff] }
 0x159   : >> { %v770_v27 = vmul.f32 %v4028_v11, %v745_v0  ;;  %v771_v28 = vmul.f32 %v4028_v11, %v746_v6  ;;  %v754_v31 = vadd.f32 %v752_v21, %v719_v12  ;;  %v755_v32 = vadd.f32 %v753_v22, %v720_v13  ;;  %v4036_v58 = vld [vmem:[%s6402_s5 + $0x4] ss:$0 sm:$0xff]  ;;  %v861_v0 = vld [vmem:[%s4554_s27 + $0x5] sm:$0xff]  ;;  %v862_v6 = vld [vmem:[%s4554_s27 + $0xd] sm:$0xff] }
 0x15a   : >> { %v781_v33 = vmul.f32 %v4029_v23, %v774_v17  ;;  %v782_v34 = vmul.f32 %v4029_v23, %v775_v18  ;;  %v763_v37 = vadd.f32 %v761_v25, %v731_v15  ;;  %v764_v38 = vadd.f32 %v762_v26, %v732_v16  ;;  %v4037_v59 = vld [vmem:[%s6404_s7 + $0x4] ss:$0 sm:$0xff]  ;;  %v4038_v7 = vld [vmem:[%s6400_s3 + $0x5] ss:$0 sm:$0xff]  ;;  %v891_v25 = vld [vmem:[%s4554_s27 + $0xe] sm:$0xff] }
 0x15b   : >> { %v772_v39 = vadd.f32 %v770_v27, %v743_v19  ;;  %v773_v40 = vadd.f32 %v771_v28, %v744_v20  ;;  %v790_v44 = vmul.f32 %v4030_v24, %v774_v17  ;;  %v791_v45 = vmul.f32 %v4030_v24, %v775_v18  ;;  %v4039_v12 = vld [vmem:[%s6402_s5 + $0x5] ss:$0 sm:$0xff]  ;;  %v890_v19 = vld [vmem:[%s4554_s27 + $0x6] sm:$0xff] }
 0x15c   : >> { %v783_v42 = vadd.f32 %v781_v33, %v754_v31  ;;  %v784_v43 = vadd.f32 %v782_v34, %v755_v32  ;;  %v799_v49 = vmul.f32 %v4031_v29, %v774_v17  ;;  %v800_v50 = vmul.f32 %v4031_v29, %v775_v18  ;;  %v4040_v13 = vld [vmem:[%s6404_s7 + $0x5] ss:$0 sm:$0xff]  ;;  %v4041_v20 = vld [vmem:[%s6400_s3 + $0x6] ss:$0 sm:$0xff]  ;;  %v3700_v32 = vld [vmem:[%s4554_s27 + $0x18] sm:$0xff] }
 0x15d   : >> { %v810_v51 = vmul.f32 %v4032_v36, %v803_v30  ;;  %v811_v52 = vmul.f32 %v4032_v36, %v804_v35  ;;  %v792_v54 = vadd.f32 %v790_v44, %v763_v37  ;;  %v793_v55 = vadd.f32 %v791_v45, %v764_v38  ;;  %v4043_v31 = vld [vmem:[%s6404_s7 + $0x6] ss:$0 sm:$0xff]  ;;  %v4044_v37 = vld [vmem:[%s6400_s3 + $0x7] ss:$0 sm:$0xff] }
 0x15e   : >> { %v819_v56 = vmul.f32 %v4033_v41, %v803_v30  ;;  %v820_v57 = vmul.f32 %v4033_v41, %v804_v35  ;;  %v801_v60 = vadd.f32 %v799_v49, %v772_v39  ;;  %v802_v61 = vadd.f32 %v800_v50, %v773_v40 }
 0x15f   : >> { %v812_v62 = vadd.f32 %v810_v51, %v783_v42  ;;  %v813_v63 = vadd.f32 %v811_v52, %v784_v43  ;;  %v828_v4 = vmul.f32 %v4034_v46, %v803_v30  ;;  %v829_v5 = vmul.f32 %v4034_v46, %v804_v35  ;;  %v4042_v30 = vld [vmem:[%s6402_s5 + $0x6] ss:$0 sm:$0xff]  ;;  %v4045_v43 = vld [vmem:[%s6402_s5 + $0x7] ss:$0 sm:$0xff] }
 0x160   : >> { %v821_v1 = vadd.f32 %v819_v56, %v792_v54  ;;  %v822_v3 = vadd.f32 %v820_v57, %v793_v55  ;;  %v839_v8 = vmul.f32 %v4035_v53, %v832_v47  ;;  %v840_v9 = vmul.f32 %v4035_v53, %v833_v48  ;;  %v3701_v42 = vld [vmem:[%s4554_s27 + $0x20] sm:$0xff] }
 0x161   : >> { %v848_v10 = vmul.f32 %v4036_v58, %v832_v47  ;;  %v849_v11 = vmul.f32 %v4036_v58, %v833_v48  ;;  %v830_v15 = vadd.f32 %v828_v4, %v801_v60  ;;  %v831_v16 = vadd.f32 %v829_v5, %v802_v61  ;;  %v4046_v52 = vld [vmem:[%s6404_s7 + $0x7] ss:$0 sm:$0xff]  ;;  %v3705_v53 = vld [vmem:[%s4554_s27 + $0x19] sm:$0xff]  ;;  %v4047_v58 = vld [vmem:[%s6400_s3 + $0x8] ss:$0 sm:$0xff] }
 0x162   : >> { %v857_v17 = vmul.f32 %v4037_v59, %v832_v47  ;;  %v858_v18 = vmul.f32 %v4037_v59, %v833_v48  ;;  %v841_v21 = vadd.f32 %v839_v8, %v812_v62  ;;  %v842_v22 = vadd.f32 %v840_v9, %v813_v63  ;;  %v4048_v59 = vld [vmem:[%s6402_s5 + $0x8] ss:$0 sm:$0xff] }
 0x163   : >> { %v850_v23 = vadd.f32 %v848_v10, %v821_v1  ;;  %v851_v24 = vadd.f32 %v849_v11, %v822_v3  ;;  %v868_v28 = vmul.f32 %v4038_v7, %v861_v0  ;;  %v869_v29 = vmul.f32 %v4038_v7, %v862_v6  ;;  %v4049_v1 = vld [vmem:[%s6404_s7 + $0x8] ss:$0 sm:$0xff]  ;;  %v3710_v7 = vld [vmem:[%s4554_s27 + $0x1a] sm:$0xff] }
 0x164   : >> { %v859_v26 = vadd.f32 %v857_v17, %v830_v15  ;;  %v860_v27 = vadd.f32 %v858_v18, %v831_v16  ;;  %v877_v33 = vmul.f32 %v4039_v12, %v861_v0  ;;  %v878_v34 = vmul.f32 %v4039_v12, %v862_v6  ;;  %v3711_v12 = vld [vmem:[%s4554_s27 + $0x22] sm:$0xff] }
 0x165   : >> { %v886_v35 = vmul.f32 %v4040_v13, %v861_v0  ;;  %v887_v36 = vmul.f32 %v4040_v13, %v862_v6  ;;  %v870_v38 = vadd.f32 %v868_v28, %v841_v21  ;;  %v871_v39 = vadd.f32 %v869_v29, %v842_v22  ;;  %v3706_v0 = vld [vmem:[%s4554_s27 + $0x21] sm:$0xff]  ;;  %v4050_v13 = vld [vmem:[%s6400_s3 + $0x9] ss:$0 sm:$0xff] }
 0x166   : >> { %v897_v40 = vmul.f32 %v4041_v20, %v890_v19  ;;  %v898_v41 = vmul.f32 %v4041_v20, %v891_v25  ;;  %v879_v44 = vadd.f32 %v877_v33, %v850_v23  ;;  %v880_v45 = vadd.f32 %v878_v34, %v851_v24  ;;  %v4051_v15 = vld [vmem:[%s6402_s5 + $0x9] ss:$0 sm:$0xff] }
 0x167   : >> { %v888_v46 = vadd.f32 %v886_v35, %v859_v26  ;;  %v889_v47 = vadd.f32 %v887_v36, %v860_v27  ;;  %v906_v50 = vmul.f32 %v4042_v30, %v890_v19  ;;  %v907_v51 = vmul.f32 %v4042_v30, %v891_v25  ;;  %v4052_v20 = vld [vmem:[%s6404_s7 + $0x9] ss:$0 sm:$0xff]  ;;  %v3715_v30 = vld [vmem:[%s4554_s27 + $0x1b] sm:$0xff]  ;;  %v4054_v36 = vld [vmem:[%s6402_s5 + $0xa] ss:$0 sm:$0xff] }
 0x168   : >> { %v899_v48 = vadd.f32 %v897_v40, %v870_v38  ;;  %v900_v49 = vadd.f32 %v898_v41, %v871_v39  ;;  %v915_v54 = vmul.f32 %v4043_v31, %v890_v19  ;;  %v916_v55 = vmul.f32 %v4043_v31, %v891_v25  ;;  %v4053_v25 = vld [vmem:[%s6400_s3 + $0xa] ss:$0 sm:$0xff] }
 0x169   : >> { %v929_v56 = vmul.f32 %v4044_v37, %v3700_v32  ;;  %v930_v57 = vmul.f32 %v4044_v37, %v3701_v42  ;;  %v908_v60 = vadd.f32 %v906_v50, %v879_v44  ;;  %v909_v61 = vadd.f32 %v907_v51, %v880_v45  ;;  %v3716_v31 = vld [vmem:[%s4554_s27 + $0x23] sm:$0xff] }
 0x16a   : >> { %v938_v62 = vmul.f32 %v4045_v43, %v3700_v32  ;;  %v939_v63 = vmul.f32 %v4045_v43, %v3701_v42  ;;  %v917_v3 = vadd.f32 %v915_v54, %v888_v46  ;;  %v918_v4 = vadd.f32 %v916_v55, %v889_v47  ;;  %v4055_v37 = vld [vmem:[%s6404_s7 + $0xa] ss:$0 sm:$0xff]  ;;  %v4056_v43 = vld [vmem:[%s6400_s3 + $0xb] ss:$0 sm:$0xff] }
 0x16b   : >> { %v931_v5 = vadd.f32 %v929_v56, %v899_v48  ;;  %v932_v6 = vadd.f32 %v930_v57, %v900_v49  ;;  %v947_v10 = vmul.f32 %v4046_v52, %v3700_v32  ;;  %v948_v11 = vmul.f32 %v4046_v52, %v3701_v42  ;;  %v3720_v42 = vld [vmem:[%s4554_s27 + $0x1c] sm:$0xff]  ;;  %v3721_v48 = vld [vmem:[%s4554_s27 + $0x24] sm:$0xff] }
 0x16c   : >> { %v940_v8 = vadd.f32 %v938_v62, %v908_v60  ;;  %v941_v9 = vadd.f32 %v939_v63, %v909_v61  ;;  %v958_v16 = vmul.f32 %v4047_v58, %v3705_v53  ;;  %v959_v17 = vmul.f32 %v4047_v58, %v3706_v0  ;;  %v4057_v49 = vld [vmem:[%s6402_s5 + $0xb] ss:$0 sm:$0xff]  ;;  %v4059_v60 = vld [vmem:[%s6400_s3 + $0xc] ss:$0 sm:$0xff] }
 0x16d   : >> { %v967_v18 = vmul.f32 %v4048_v59, %v3705_v53  ;;  %v968_v19 = vmul.f32 %v4048_v59, %v3706_v0  ;;  %v949_v21 = vadd.f32 %v947_v10, %v917_v3  ;;  %v950_v22 = vadd.f32 %v948_v11, %v918_v4  ;;  %v4058_v58 = vld [vmem:[%s6404_s7 + $0xb] ss:$0 sm:$0xff]  ;;  %v3725_v59 = vld [vmem:[%s4554_s27 + $0x1d] sm:$0xff] }
 0x16e   : >> { %v976_v23 = vmul.f32 %v4049_v1, %v3705_v53  ;;  %v977_v24 = vmul.f32 %v4049_v1, %v3706_v0  ;;  %v960_v26 = vadd.f32 %v958_v16, %v931_v5  ;;  %v961_v27 = vadd.f32 %v959_v17, %v932_v6  ;;  %v4060_v1 = vld [vmem:[%s6402_s5 + $0xc] ss:$0 sm:$0xff] }
 0x16f   : >> { %v969_v28 = vadd.f32 %v967_v18, %v940_v8  ;;  %v970_v29 = vadd.f32 %v968_v19, %v941_v9  ;;  %v987_v34 = vmul.f32 %v4050_v13, %v3710_v7  ;;  %v988_v35 = vmul.f32 %v4050_v13, %v3711_v12  ;;  %v4061_v8 = vld [vmem:[%s6404_s7 + $0xc] ss:$0 sm:$0xff]  ;;  %v3730_v13 = vld [vmem:[%s4554_s27 + $0x1e] sm:$0xff] }
 0x170   : >> { %v978_v32 = vadd.f32 %v976_v23, %v949_v21  ;;  %v979_v33 = vadd.f32 %v977_v24, %v950_v22  ;;  %v996_v38 = vmul.f32 %v4051_v15, %v3710_v7  ;;  %v997_v39 = vmul.f32 %v4051_v15, %v3711_v12  ;;  %v3731_v19 = vld [vmem:[%s4554_s27 + $0x26] sm:$0xff] }
 0x171   : >> { %v1005_v40 = vmul.f32 %v4052_v20, %v3710_v7  ;;  %v1006_v41 = vmul.f32 %v4052_v20, %v3711_v12  ;;  %v989_v44 = vadd.f32 %v987_v34, %v960_v26  ;;  %v990_v45 = vadd.f32 %v988_v35, %v961_v27  ;;  %v3726_v7 = vld [vmem:[%s4554_s27 + $0x25] sm:$0xff]  ;;  %v4062_v20 = vld [vmem:[%s6400_s3 + $0xd] ss:$0 sm:$0xff] }
 0x172   : >> { %v1016_v46 = vmul.f32 %v4053_v25, %v3715_v30  ;;  %v1017_v47 = vmul.f32 %v4053_v25, %v3716_v31  ;;  %v998_v50 = vadd.f32 %v996_v38, %v969_v28  ;;  %v999_v51 = vadd.f32 %v997_v39, %v970_v29  ;;  %v4063_v25 = vld [vmem:[%s6402_s5 + $0xd] ss:$0 sm:$0xff] }
 0x173   : >> { %v1007_v52 = vadd.f32 %v1005_v40, %v978_v32  ;;  %v1008_v53 = vadd.f32 %v1006_v41, %v979_v33  ;;  %v1025_v56 = vmul.f32 %v4054_v36, %v3715_v30  ;;  %v1026_v57 = vmul.f32 %v4054_v36, %v3716_v31  ;;  %v4064_v26 = vld [vmem:[%s6404_s7 + $0xd] ss:$0 sm:$0xff]  ;;  %v4065_v32 = vld [vmem:[%s6400_s3 + $0xe] ss:$0 sm:$0xff] }
 0x174   : >> { %v1018_v54 = vadd.f32 %v1016_v46, %v989_v44  ;;  %v1019_v55 = vadd.f32 %v1017_v47, %v990_v45  ;;  %v1034_v61 = vmul.f32 %v4055_v37, %v3715_v30  ;;  %v1035_v62 = vmul.f32 %v4055_v37, %v3716_v31  ;;  %v3735_v31 = vld [vmem:[%s4554_s27 + $0x30] sm:$0xff]  ;;  %v3736_v37 = vld [vmem:[%s4554_s27 + $0x38] sm:$0xff] }
 0x175   : >> { %v1045_v63 = vmul.f32 %v4056_v43, %v3720_v42  ;;  %v1046_v0 = vmul.f32 %v4056_v43, %v3721_v48  ;;  %v1027_v3 = vadd.f32 %v1025_v56, %v998_v50  ;;  %v1028_v4 = vadd.f32 %v1026_v57, %v999_v51  ;;  %v4067_v43 = vld [vmem:[%s6404_s7 + $0xe] ss:$0 sm:$0xff]  ;;  %v3740_v44 = vld [vmem:[%s4554_s27 + $0x31] sm:$0xff] }
 0x176   : >> { %v1054_v5 = vmul.f32 %v4057_v49, %v3720_v42  ;;  %v1055_v6 = vmul.f32 %v4057_v49, %v3721_v48  ;;  %v1036_v9 = vadd.f32 %v1034_v61, %v1007_v52  ;;  %v1037_v10 = vadd.f32 %v1035_v62, %v1008_v53  ;;  %v4068_v49 = vld [vmem:[%s6400_s3 + $0xf] ss:$0 sm:$0xff] }
 0x177   : >> { %v1047_v11 = vadd.f32 %v1045_v63, %v1018_v54  ;;  %v1048_v12 = vadd.f32 %v1046_v0, %v1019_v55  ;;  %v1063_v17 = vmul.f32 %v4058_v58, %v3720_v42  ;;  %v1064_v18 = vmul.f32 %v4058_v58, %v3721_v48  ;;  %v4066_v42 = vld [vmem:[%s6402_s5 + $0xe] ss:$0 sm:$0xff]  ;;  %v3741_v54 = vld [vmem:[%s4554_s27 + $0x39] sm:$0xff]  ;;  %v4069_v55 = vld [vmem:[%s6402_s5 + $0xf] ss:$0 sm:$0xff] }
 0x178   : >> { %v1056_v15 = vadd.f32 %v1054_v5, %v1027_v3  ;;  %v1057_v16 = vadd.f32 %v1055_v6, %v1028_v4  ;;  %v1074_v21 = vmul.f32 %v4059_v60, %v3725_v59  ;;  %v1075_v22 = vmul.f32 %v4059_v60, %v3726_v7  ;;  %v4070_v0 = vld [vmem:[%s6404_s7 + $0xf] ss:$0 sm:$0xff] }
 0x179   : >> { %v1083_v23 = vmul.f32 %v4060_v1, %v3725_v59  ;;  %v1084_v24 = vmul.f32 %v4060_v1, %v3726_v7  ;;  %v1065_v27 = vadd.f32 %v1063_v17, %v1036_v9  ;;  %v1066_v28 = vadd.f32 %v1064_v18, %v1037_v10  ;;  %v3745_v1 = vld [vmem:[%s4554_s27 + $0x32] sm:$0xff] }
 0x17a   : >> { %v1092_v29 = vmul.f32 %v4061_v8, %v3725_v59  ;;  %v1093_v30 = vmul.f32 %v4061_v8, %v3726_v7  ;;  %v1076_v33 = vadd.f32 %v1074_v21, %v1047_v11  ;;  %v1077_v34 = vadd.f32 %v1075_v22, %v1048_v12  ;;  %v4071_v7 = vld [vmem:[%s6400_s3 + $0x10] ss:$0 sm:$0xff] }
 0x17b   : >> { %v1085_v35 = vadd.f32 %v1083_v23, %v1056_v15  ;;  %v1086_v36 = vadd.f32 %v1084_v24, %v1057_v16  ;;  %v1103_v40 = vmul.f32 %v4062_v20, %v3730_v13  ;;  %v1104_v41 = vmul.f32 %v4062_v20, %v3731_v19  ;;  %v4072_v8 = vld [vmem:[%s6402_s5 + $0x10] ss:$0 sm:$0xff]  ;;  %v3750_v20 = vld [vmem:[%s4554_s27 + $0x33] sm:$0xff] }
 0x17c   : >> { %v1094_v38 = vadd.f32 %v1092_v29, %v1065_v27  ;;  %v1095_v39 = vadd.f32 %v1093_v30, %v1066_v28  ;;  %v1112_v45 = vmul.f32 %v4063_v25, %v3730_v13  ;;  %v1113_v46 = vmul.f32 %v4063_v25, %v3731_v19  ;;  %v4073_v15 = vld [vmem:[%s6404_s7 + $0x10] ss:$0 sm:$0xff]  ;;  %v3751_v25 = vld [vmem:[%s4554_s27 + $0x3b] sm:$0xff]  ;;  %v4075_v27 = vld [vmem:[%s6402_s5 + $0x11] ss:$0 sm:$0xff] }
 0x17d   : >> { %v1121_v47 = vmul.f32 %v4064_v26, %v3730_v13  ;;  %v1122_v48 = vmul.f32 %v4064_v26, %v3731_v19  ;;  %v1105_v50 = vadd.f32 %v1103_v40, %v1076_v33  ;;  %v1106_v51 = vadd.f32 %v1104_v41, %v1077_v34  ;;  %v3746_v13 = vld [vmem:[%s4554_s27 + $0x3a] sm:$0xff]  ;;  %v4074_v26 = vld [vmem:[%s6400_s3 + $0x11] ss:$0 sm:$0xff] }
 0x17e   : >> { %v1135_v52 = vmul.f32 %v4065_v32, %v3735_v31  ;;  %v1136_v53 = vmul.f32 %v4065_v32, %v3736_v37  ;;  %v1114_v56 = vadd.f32 %v1112_v45, %v1085_v35  ;;  %v1115_v57 = vadd.f32 %v1113_v46, %v1086_v36  ;;  %v4076_v32 = vld [vmem:[%s6404_s7 + $0x11] ss:$0 sm:$0xff] }
 0x17f   : >> { %v1123_v58 = vadd.f32 %v1121_v47, %v1094_v38  ;;  %v1124_v59 = vadd.f32 %v1122_v48, %v1095_v39  ;;  %v1144_v62 = vmul.f32 %v4066_v42, %v3735_v31  ;;  %v1145_v63 = vmul.f32 %v4066_v42, %v3736_v37  ;;  %v3755_v42 = vld [vmem:[%s4554_s27 + $0x34] sm:$0xff]  ;;  %v4078_v48 = vld [vmem:[%s6402_s5 + $0x12] ss:$0 sm:$0xff] }
 0x180   : >> { %v1137_v60 = vadd.f32 %v1135_v52, %v1105_v50  ;;  %v1138_v61 = vadd.f32 %v1136_v53, %v1106_v51  ;;  %v1153_v3 = vmul.f32 %v4067_v43, %v3735_v31  ;;  %v1154_v4 = vmul.f32 %v4067_v43, %v3736_v37  ;;  %v4077_v37 = vld [vmem:[%s6400_s3 + $0x12] ss:$0 sm:$0xff]  ;;  %v3756_v43 = vld [vmem:[%s4554_s27 + $0x3c] sm:$0xff] }
 0x181   : >> { %v1164_v5 = vmul.f32 %v4068_v49, %v3740_v44  ;;  %v1165_v6 = vmul.f32 %v4068_v49, %v3741_v54  ;;  %v1146_v9 = vadd.f32 %v1144_v62, %v1114_v56  ;;  %v1147_v10 = vadd.f32 %v1145_v63, %v1115_v57  ;;  %v4079_v49 = vld [vmem:[%s6404_s7 + $0x12] ss:$0 sm:$0xff] }
 0x182   : >> { %v1173_v11 = vmul.f32 %v4069_v55, %v3740_v44  ;;  %v1174_v12 = vmul.f32 %v4069_v55, %v3741_v54  ;;  %v1155_v16 = vadd.f32 %v1153_v3, %v1123_v58  ;;  %v1156_v17 = vadd.f32 %v1154_v4, %v1124_v59  ;;  %v4080_v55 = vld [vmem:[%s6400_s3 + $0x13] ss:$0 sm:$0xff] }
 0x183   : >> { %v1166_v18 = vadd.f32 %v1164_v5, %v1137_v60  ;;  %v1167_v19 = vadd.f32 %v1165_v6, %v1138_v61  ;;  %v1182_v23 = vmul.f32 %v4070_v0, %v3740_v44  ;;  %v1183_v24 = vmul.f32 %v4070_v0, %v3741_v54  ;;  %v3760_v54 = vld [vmem:[%s4554_s27 + $0x35] sm:$0xff]  ;;  %v3761_v60 = vld [vmem:[%s4554_s27 + $0x3d] sm:$0xff]  ;;  %v4081_v61 = vld [vmem:[%s6402_s5 + $0x13] ss:$0 sm:$0xff] }
 0x184   : >> { %v1175_v21 = vadd.f32 %v1173_v11, %v1146_v9  ;;  %v1176_v22 = vadd.f32 %v1174_v12, %v1147_v10  ;;  %v1193_v28 = vmul.f32 %v4071_v7, %v3745_v1  ;;  %v1194_v29 = vmul.f32 %v4071_v7, %v3746_v13  ;;  %v4082_v7 = vld [vmem:[%s6404_s7 + $0x13] ss:$0 sm:$0xff]  ;;  %v4083_v9 = vld [vmem:[%s6400_s3 + $0x14] ss:$0 sm:$0xff] }
 0x185   : >> { %v1202_v30 = vmul.f32 %v4072_v8, %v3745_v1  ;;  %v1203_v31 = vmul.f32 %v4072_v8, %v3746_v13  ;;  %v1184_v33 = vadd.f32 %v1182_v23, %v1155_v16  ;;  %v1185_v34 = vadd.f32 %v1183_v24, %v1156_v17  ;;  %v3765_v8 = vld [vmem:[%s4554_s27 + $0x36] sm:$0xff] }
 0x186   : >> { %v1211_v35 = vmul.f32 %v4073_v15, %v3745_v1  ;;  %v1212_v36 = vmul.f32 %v4073_v15, %v3746_v13  ;;  %v1195_v38 = vadd.f32 %v1193_v28, %v1166_v18  ;;  %v1196_v39 = vadd.f32 %v1194_v29, %v1167_v19  ;;  %v4084_v15 = vld [vmem:[%s6402_s5 + $0x14] ss:$0 sm:$0xff] }
 0x187   : >> { %v1204_v40 = vadd.f32 %v1202_v30, %v1175_v21  ;;  %v1205_v41 = vadd.f32 %v1203_v31, %v1176_v22  ;;  %v1222_v46 = vmul.f32 %v4074_v26, %v3750_v20  ;;  %v1223_v47 = vmul.f32 %v4074_v26, %v3751_v25  ;;  %v4085_v21 = vld [vmem:[%s6404_s7 + $0x14] ss:$0 sm:$0xff]  ;;  %v3770_v26 = vld [vmem:[%s4554_s27 + $0x48] sm:$0xff] }
 0x188   : >> { %v1213_v44 = vadd.f32 %v1211_v35, %v1184_v33  ;;  %v1214_v45 = vadd.f32 %v1212_v36, %v1185_v34  ;;  %v1231_v50 = vmul.f32 %v4075_v27, %v3750_v20  ;;  %v1232_v51 = vmul.f32 %v4075_v27, %v3751_v25  ;;  %v3771_v31 = vld [vmem:[%s4554_s27 + $0x50] sm:$0xff] }
 0x189   : >> { %v1240_v52 = vmul.f32 %v4076_v32, %v3750_v20  ;;  %v1241_v53 = vmul.f32 %v4076_v32, %v3751_v25  ;;  %v1224_v56 = vadd.f32 %v1222_v46, %v1195_v38  ;;  %v1225_v57 = vadd.f32 %v1223_v47, %v1196_v39  ;;  %v3766_v20 = vld [vmem:[%s4554_s27 + $0x3e] sm:$0xff]  ;;  %v4086_v32 = vld [vmem:[%s6400_s3 + $0x15] ss:$0 sm:$0xff] }
 0x18a   : >> { %v1251_v58 = vmul.f32 %v4077_v37, %v3755_v42  ;;  %v1252_v59 = vmul.f32 %v4077_v37, %v3756_v43  ;;  %v1233_v62 = vadd.f32 %v1231_v50, %v1204_v40  ;;  %v1234_v63 = vadd.f32 %v1232_v51, %v1205_v41  ;;  %v4087_v37 = vld [vmem:[%s6402_s5 + $0x15] ss:$0 sm:$0xff] }
 0x18b   : >> { %v1242_v0 = vadd.f32 %v1240_v52, %v1213_v44  ;;  %v1243_v1 = vadd.f32 %v1241_v53, %v1214_v45  ;;  %v1260_v5 = vmul.f32 %v4078_v48, %v3755_v42  ;;  %v1261_v6 = vmul.f32 %v4078_v48, %v3756_v43  ;;  %v4088_v38 = vld [vmem:[%s6404_s7 + $0x15] ss:$0 sm:$0xff]  ;;  %v4089_v44 = vld [vmem:[%s6400_s3 + $0x16] ss:$0 sm:$0xff] }
 0x18c   : >> { %v1253_v3 = vadd.f32 %v1251_v58, %v1224_v56  ;;  %v1254_v4 = vadd.f32 %v1252_v59, %v1225_v57  ;;  %v1269_v10 = vmul.f32 %v4079_v49, %v3755_v42  ;;  %v1270_v11 = vmul.f32 %v4079_v49, %v3756_v43  ;;  %v3775_v43 = vld [vmem:[%s4554_s27 + $0x49] sm:$0xff]  ;;  %v3776_v49 = vld [vmem:[%s4554_s27 + $0x51] sm:$0xff] }
 0x18d   : >> { %v1280_v12 = vmul.f32 %v4080_v55, %v3760_v54  ;;  %v1281_v13 = vmul.f32 %v4080_v55, %v3761_v60  ;;  %v1262_v16 = vadd.f32 %v1260_v5, %v1233_v62  ;;  %v1263_v17 = vadd.f32 %v1261_v6, %v1234_v63  ;;  %v4091_v55 = vld [vmem:[%s6404_s7 + $0x16] ss:$0 sm:$0xff]  ;;  %v3780_v56 = vld [vmem:[%s4554_s27 + $0x4a] sm:$0xff] }
 0x18e   : >> { %v1289_v18 = vmul.f32 %v4081_v61, %v3760_v54  ;;  %v1290_v19 = vmul.f32 %v4081_v61, %v3761_v60  ;;  %v1271_v22 = vadd.f32 %v1269_v10, %v1242_v0  ;;  %v1272_v23 = vadd.f32 %v1270_v11, %v1243_v1  ;;  %v4092_v61 = vld [vmem:[%s6400_s3 + $0x17] ss:$0 sm:$0xff] }
 0x18f   : >> { %v1282_v24 = vadd.f32 %v1280_v12, %v1253_v3  ;;  %v1283_v25 = vadd.f32 %v1281_v13, %v1254_v4  ;;  %v1298_v29 = vmul.f32 %v4082_v7, %v3760_v54  ;;  %v1299_v30 = vmul.f32 %v4082_v7, %v3761_v60  ;;  %v4090_v54 = vld [vmem:[%s6402_s5 + $0x16] ss:$0 sm:$0xff]  ;;  %v4093_v4 = vld [vmem:[%s6402_s5 + $0x17] ss:$0 sm:$0xff] }
 0x190   : >> { %v1291_v27 = vadd.f32 %v1289_v18, %v1262_v16  ;;  %v1292_v28 = vadd.f32 %v1290_v19, %v1263_v17  ;;  %v1309_v33 = vmul.f32 %v4083_v9, %v3765_v8  ;;  %v1310_v34 = vmul.f32 %v4083_v9, %v3766_v20  ;;  %v3781_v3 = vld [vmem:[%s4554_s27 + $0x52] sm:$0xff] }
 0x191   : >> { %v1318_v35 = vmul.f32 %v4084_v15, %v3765_v8  ;;  %v1319_v36 = vmul.f32 %v4084_v15, %v3766_v20  ;;  %v1300_v39 = vadd.f32 %v1298_v29, %v1271_v22  ;;  %v1301_v40 = vadd.f32 %v1299_v30, %v1272_v23  ;;  %v4094_v13 = vld [vmem:[%s6404_s7 + $0x17] ss:$0 sm:$0xff]  ;;  %v3785_v15 = vld [vmem:[%s4554_s27 + $0x4b] sm:$0xff] }
 0x192   : >> { %v1327_v41 = vmul.f32 %v4085_v21, %v3765_v8  ;;  %v1328_v42 = vmul.f32 %v4085_v21, %v3766_v20  ;;  %v1311_v45 = vadd.f32 %v1309_v33, %v1282_v24  ;;  %v1312_v46 = vadd.f32 %v1310_v34, %v1283_v25  ;;  %v4095_v20 = vld [vmem:[%s6400_s3 + $0x18] ss:$0 sm:$0xff] }
 0x193   : >> { %v1320_v47 = vadd.f32 %v1318_v35, %v1291_v27  ;;  %v1321_v48 = vadd.f32 %v1319_v36, %v1292_v28  ;;  %v1341_v52 = vmul.f32 %v4086_v32, %v3770_v26  ;;  %v1342_v53 = vmul.f32 %v4086_v32, %v3771_v31  ;;  %v4096_v21 = vld [vmem:[%s6402_s5 + $0x18] ss:$0 sm:$0xff]  ;;  %v3790_v32 = vld [vmem:[%s4554_s27 + $0x4c] sm:$0xff] }
 0x194   : >> { %v1329_v50 = vadd.f32 %v1327_v41, %v1300_v39  ;;  %v1330_v51 = vadd.f32 %v1328_v42, %v1301_v40  ;;  %v1350_v57 = vmul.f32 %v4087_v37, %v3770_v26  ;;  %v1351_v58 = vmul.f32 %v4087_v37, %v3771_v31  ;;  %v4097_v27 = vld [vmem:[%s6404_s7 + $0x18] ss:$0 sm:$0xff]  ;;  %v4099_v39 = vld [vmem:[%s6402_s5 + $0x19] ss:$0 sm:$0xff] }
 0x195   : >> { %v1359_v59 = vmul.f32 %v4088_v38, %v3770_v26  ;;  %v1360_v60 = vmul.f32 %v4088_v38, %v3771_v31  ;;  %v1343_v62 = vadd.f32 %v1341_v52, %v1311_v45  ;;  %v1344_v63 = vadd.f32 %v1342_v53, %v1312_v46  ;;  %v3786_v26 = vld [vmem:[%s4554_s27 + $0x53] sm:$0xff] }
 0x196   : >> { %v1370_v0 = vmul.f32 %v4089_v44, %v3775_v43  ;;  %v1371_v1 = vmul.f32 %v4089_v44, %v3776_v49  ;;  %v1352_v5 = vadd.f32 %v1350_v57, %v1320_v47  ;;  %v1353_v6 = vadd.f32 %v1351_v58, %v1321_v48  ;;  %v3791_v37 = vld [vmem:[%s4554_s27 + $0x54] sm:$0xff] }
 0x197   : >> { %v1361_v7 = vadd.f32 %v1359_v59, %v1329_v50  ;;  %v1362_v8 = vadd.f32 %v1360_v60, %v1330_v51  ;;  %v1379_v11 = vmul.f32 %v4090_v54, %v3775_v43  ;;  %v1380_v12 = vmul.f32 %v4090_v54, %v3776_v49  ;;  %v4098_v38 = vld [vmem:[%s6400_s3 + $0x19] ss:$0 sm:$0xff]  ;;  %v3795_v54 = vld [vmem:[%s4554_s27 + $0x4d] sm:$0xff]  ;;  %v4102_v60 = vld [vmem:[%s6402_s5 + $0x1a] ss:$0 sm:$0xff] }
 0x198   : >> { %v1372_v9 = vadd.f32 %v1370_v0, %v1343_v62  ;;  %v1373_v10 = vadd.f32 %v1371_v1, %v1344_v63  ;;  %v1388_v16 = vmul.f32 %v4091_v55, %v3775_v43  ;;  %v1389_v17 = vmul.f32 %v4091_v55, %v3776_v49  ;;  %v4100_v44 = vld [vmem:[%s6404_s7 + $0x19] ss:$0 sm:$0xff]  ;;  %v4101_v49 = vld [vmem:[%s6400_s3 + $0x1a] ss:$0 sm:$0xff] }
 0x199   : >> { %v1399_v18 = vmul.f32 %v4092_v61, %v3780_v56  ;;  %v1400_v19 = vmul.f32 %v4092_v61, %v3781_v3  ;;  %v1381_v22 = vadd.f32 %v1379_v11, %v1352_v5  ;;  %v1382_v23 = vadd.f32 %v1380_v12, %v1353_v6  ;;  %v3796_v55 = vld [vmem:[%s4554_s27 + $0x55] sm:$0xff] }
 0x19a   : >> { %v1408_v24 = vmul.f32 %v4093_v4, %v3780_v56  ;;  %v1409_v25 = vmul.f32 %v4093_v4, %v3781_v3  ;;  %v1390_v28 = vadd.f32 %v1388_v16, %v1361_v7  ;;  %v1391_v29 = vadd.f32 %v1389_v17, %v1362_v8  ;;  %v4103_v61 = vld [vmem:[%s6404_s7 + $0x1a] ss:$0 sm:$0xff]  ;;  %v4104_v4 = vld [vmem:[%s6400_s3 + $0x1b] ss:$0 sm:$0xff] }
 0x19b   : >> { %v1401_v30 = vadd.f32 %v1399_v18, %v1372_v9  ;;  %v1402_v31 = vadd.f32 %v1400_v19, %v1373_v10  ;;  %v1417_v35 = vmul.f32 %v4094_v13, %v3780_v56  ;;  %v1418_v36 = vmul.f32 %v4094_v13, %v3781_v3  ;;  %v3800_v3 = vld [vmem:[%s4554_s27 + $0x4e] sm:$0xff]  ;;  %v3801_v9 = vld [vmem:[%s4554_s27 + $0x56] sm:$0xff] }
 0x19c   : >> { %v1410_v33 = vadd.f32 %v1408_v24, %v1381_v22  ;;  %v1411_v34 = vadd.f32 %v1409_v25, %v1382_v23  ;;  %v1428_v40 = vmul.f32 %v4095_v20, %v3785_v15  ;;  %v1429_v41 = vmul.f32 %v4095_v20, %v3786_v26  ;;  %v4105_v10 = vld [vmem:[%s6402_s5 + $0x1b] ss:$0 sm:$0xff]  ;;  %v4107_v22 = vld [vmem:[%s6400_s3 + $0x1c] ss:$0 sm:$0xff] }
 0x19d   : >> { %v1437_v42 = vmul.f32 %v4096_v21, %v3785_v15  ;;  %v1438_v43 = vmul.f32 %v4096_v21, %v3786_v26  ;;  %v1419_v45 = vadd.f32 %v1417_v35, %v1390_v28  ;;  %v1420_v46 = vadd.f32 %v1418_v36, %v1391_v29  ;;  %v4106_v20 = vld [vmem:[%s6404_s7 + $0x1b] ss:$0 sm:$0xff]  ;;  %v3805_v21 = vld [vmem:[%s4554_s27 + $0x60] sm:$0xff] }
 0x19e   : >> { %v1446_v47 = vmul.f32 %v4097_v27, %v3785_v15  ;;  %v1447_v48 = vmul.f32 %v4097_v27, %v3786_v26  ;;  %v1430_v50 = vadd.f32 %v1428_v40, %v1401_v30  ;;  %v1431_v51 = vadd.f32 %v1429_v41, %v1402_v31  ;;  %v4108_v27 = vld [vmem:[%s6402_s5 + $0x1c] ss:$0 sm:$0xff] }
 0x19f   : >> { %v1439_v52 = vadd.f32 %v1437_v42, %v1410_v33  ;;  %v1440_v53 = vadd.f32 %v1438_v43, %v1411_v34  ;;  %v1457_v58 = vmul.f32 %v4098_v38, %v3790_v32  ;;  %v1458_v59 = vmul.f32 %v4098_v38, %v3791_v37  ;;  %v4109_v33 = vld [vmem:[%s6404_s7 + $0x1c] ss:$0 sm:$0xff]  ;;  %v3810_v38 = vld [vmem:[%s4554_s27 + $0x61] sm:$0xff]  ;;  %v3811_v43 = vld [vmem:[%s4554_s27 + $0x69] sm:$0xff] }
 0x1a0   : >> { %v1448_v56 = vadd.f32 %v1446_v47, %v1419_v45  ;;  %v1449_v57 = vadd.f32 %v1447_v48, %v1420_v46  ;;  %v1466_v62 = vmul.f32 %v4099_v39, %v3790_v32  ;;  %v1467_v63 = vmul.f32 %v4099_v39, %v3791_v37 }
 0x1a1   : >> { %v1475_v0 = vmul.f32 %v4100_v44, %v3790_v32  ;;  %v1476_v1 = vmul.f32 %v4100_v44, %v3791_v37  ;;  %v1459_v5 = vadd.f32 %v1457_v58, %v1430_v50  ;;  %v1460_v6 = vadd.f32 %v1458_v59, %v1431_v51  ;;  %v3806_v32 = vld [vmem:[%s4554_s27 + $0x68] sm:$0xff]  ;;  %v4110_v44 = vld [vmem:[%s6400_s3 + $0x1d] ss:$0 sm:$0xff] }
 0x1a2   : >> { %v1486_v7 = vmul.f32 %v4101_v49, %v3795_v54  ;;  %v1487_v8 = vmul.f32 %v4101_v49, %v3796_v55  ;;  %v1468_v11 = vadd.f32 %v1466_v62, %v1439_v52  ;;  %v1469_v12 = vadd.f32 %v1467_v63, %v1440_v53  ;;  %v4111_v49 = vld [vmem:[%s6402_s5 + $0x1d] ss:$0 sm:$0xff] }
 0x1a3   : >> { %v1477_v13 = vadd.f32 %v1475_v0, %v1448_v56  ;;  %v1478_v15 = vadd.f32 %v1476_v1, %v1449_v57  ;;  %v1495_v18 = vmul.f32 %v4102_v60, %v3795_v54  ;;  %v1496_v19 = vmul.f32 %v4102_v60, %v3796_v55  ;;  %v4112_v50 = vld [vmem:[%s6404_s7 + $0x1d] ss:$0 sm:$0xff]  ;;  %v4113_v56 = vld [vmem:[%s6400_s3 + $0x1e] ss:$0 sm:$0xff] }
 0x1a4   : >> { %v1488_v16 = vadd.f32 %v1486_v7, %v1459_v5  ;;  %v1489_v17 = vadd.f32 %v1487_v8, %v1460_v6  ;;  %v1504_v23 = vmul.f32 %v4103_v61, %v3795_v54  ;;  %v1505_v24 = vmul.f32 %v4103_v61, %v3796_v55  ;;  %v3815_v55 = vld [vmem:[%s4554_s27 + $0x62] sm:$0xff]  ;;  %v3816_v61 = vld [vmem:[%s4554_s27 + $0x6a] sm:$0xff] }
 0x1a5   : >> { %v1515_v25 = vmul.f32 %v4104_v4, %v3800_v3  ;;  %v1516_v26 = vmul.f32 %v4104_v4, %v3801_v9  ;;  %v1497_v28 = vadd.f32 %v1495_v18, %v1468_v11  ;;  %v1498_v29 = vadd.f32 %v1496_v19, %v1469_v12  ;;  %v4115_v4 = vld [vmem:[%s6404_s7 + $0x1e] ss:$0 sm:$0xff]  ;;  %v3820_v5 = vld [vmem:[%s4554_s27 + $0x63] sm:$0xff] }
 0x1a6   : >> { %v1524_v30 = vmul.f32 %v4105_v10, %v3800_v3  ;;  %v1525_v31 = vmul.f32 %v4105_v10, %v3801_v9  ;;  %v1506_v34 = vadd.f32 %v1504_v23, %v1477_v13  ;;  %v1507_v35 = vadd.f32 %v1505_v24, %v1478_v15  ;;  %v4116_v10 = vld [vmem:[%s6400_s3 + $0x1f] ss:$0 sm:$0xff] }
 0x1a7   : >> { %v1517_v36 = vadd.f32 %v1515_v25, %v1488_v16  ;;  %v1518_v37 = vadd.f32 %v1516_v26, %v1489_v17  ;;  %v1533_v41 = vmul.f32 %v4106_v20, %v3800_v3  ;;  %v1534_v42 = vmul.f32 %v4106_v20, %v3801_v9  ;;  %v4114_v3 = vld [vmem:[%s6402_s5 + $0x1e] ss:$0 sm:$0xff]  ;;  %v3821_v16 = vld [vmem:[%s4554_s27 + $0x6b] sm:$0xff]  ;;  %v4117_v17 = vld [vmem:[%s6402_s5 + $0x1f] ss:$0 sm:$0xff] }
 0x1a8   : >> { %v1526_v39 = vadd.f32 %v1524_v30, %v1497_v28  ;;  %v1527_v40 = vadd.f32 %v1525_v31, %v1498_v29  ;;  %v1547_v45 = vmul.f32 %v4107_v22, %v3805_v21  ;;  %v1548_v46 = vmul.f32 %v4107_v22, %v3806_v32  ;;  %v4118_v26 = vld [vmem:[%s6404_s7 + $0x1f] ss:$0 sm:$0xff] }
 0x1a9   : >> { %v1556_v47 = vmul.f32 %v4108_v27, %v3805_v21  ;;  %v1557_v48 = vmul.f32 %v4108_v27, %v3806_v32  ;;  %v1535_v51 = vadd.f32 %v1533_v41, %v1506_v34  ;;  %v1536_v52 = vadd.f32 %v1534_v42, %v1507_v35  ;;  %v3825_v27 = vld [vmem:[%s4554_s27 + $0x64] sm:$0xff] }
 0x1aa   : >> { %v1565_v53 = vmul.f32 %v4109_v33, %v3805_v21  ;;  %v1566_v54 = vmul.f32 %v4109_v33, %v3806_v32  ;;  %v1549_v57 = vadd.f32 %v1547_v45, %v1517_v36  ;;  %v1550_v58 = vadd.f32 %v1548_v46, %v1518_v37  ;;  %v4119_v32 = vld [vmem:[%s6400_s3 + $0x20] ss:$0 sm:$0xff] }
 0x1ab   : >> { %v1558_v59 = vadd.f32 %v1556_v47, %v1526_v39  ;;  %v1559_v60 = vadd.f32 %v1557_v48, %v1527_v40  ;;  %v1576_v0 = vmul.f32 %v4110_v44, %v3810_v38  ;;  %v1577_v1 = vmul.f32 %v4110_v44, %v3811_v43  ;;  %v4120_v33 = vld [vmem:[%s6402_s5 + $0x20] ss:$0 sm:$0xff]  ;;  %v3830_v44 = vld [vmem:[%s4554_s27 + $0x65] sm:$0xff] }
 0x1ac   : >> { %v1567_v62 = vadd.f32 %v1565_v53, %v1535_v51  ;;  %v1568_v63 = vadd.f32 %v1566_v54, %v1536_v52  ;;  %v1585_v6 = vmul.f32 %v4111_v49, %v3810_v38  ;;  %v1586_v7 = vmul.f32 %v4111_v49, %v3811_v43  ;;  %v4121_v39 = vld [vmem:[%s6404_s7 + $0x20] ss:$0 sm:$0xff]  ;;  %v3831_v49 = vld [vmem:[%s4554_s27 + $0x6d] sm:$0xff]  ;;  %v4123_v51 = vld [vmem:[%s6402_s5 + $0x21] ss:$0 sm:$0xff] }
 0x1ad   : >> { %v1594_v8 = vmul.f32 %v4112_v50, %v3810_v38  ;;  %v1595_v9 = vmul.f32 %v4112_v50, %v3811_v43  ;;  %v1578_v11 = vadd.f32 %v1576_v0, %v1549_v57  ;;  %v1579_v12 = vadd.f32 %v1577_v1, %v1550_v58  ;;  %v3826_v38 = vld [vmem:[%s4554_s27 + $0x6c] sm:$0xff]  ;;  %v4122_v50 = vld [vmem:[%s6400_s3 + $0x21] ss:$0 sm:$0xff] }
 0x1ae   : >> { %v1605_v13 = vmul.f32 %v4113_v56, %v3815_v55  ;;  %v1606_v15 = vmul.f32 %v4113_v56, %v3816_v61  ;;  %v1587_v18 = vadd.f32 %v1585_v6, %v1558_v59  ;;  %v1588_v19 = vadd.f32 %v1586_v7, %v1559_v60  ;;  %v4124_v56 = vld [vmem:[%s6404_s7 + $0x21] ss:$0 sm:$0xff] }
 0x1af   : >> { %v1596_v20 = vadd.f32 %v1594_v8, %v1567_v62  ;;  %v1597_v21 = vadd.f32 %v1595_v9, %v1568_v63  ;;  %v1614_v24 = vmul.f32 %v4114_v3, %v3815_v55  ;;  %v1615_v25 = vmul.f32 %v4114_v3, %v3816_v61  ;;  %v3835_v3 = vld [vmem:[%s4554_s27 + $0x66] sm:$0xff]  ;;  %v4126_v9 = vld [vmem:[%s6402_s5 + $0x22] ss:$0 sm:$0xff] }
 0x1b0   : >> { %v1607_v22 = vadd.f32 %v1605_v13, %v1578_v11  ;;  %v1608_v23 = vadd.f32 %v1606_v15, %v1579_v12  ;;  %v1623_v28 = vmul.f32 %v4115_v4, %v3815_v55  ;;  %v1624_v29 = vmul.f32 %v4115_v4, %v3816_v61  ;;  %v4125_v61 = vld [vmem:[%s6400_s3 + $0x22] ss:$0 sm:$0xff]  ;;  %v3836_v4 = vld [vmem:[%s4554_s27 + $0x6e] sm:$0xff] }
 0x1b1   : >> { %v1634_v30 = vmul.f32 %v4116_v10, %v3820_v5  ;;  %v1635_v31 = vmul.f32 %v4116_v10, %v3821_v16  ;;  %v1616_v34 = vadd.f32 %v1614_v24, %v1587_v18  ;;  %v1617_v35 = vadd.f32 %v1615_v25, %v1588_v19  ;;  %v4127_v10 = vld [vmem:[%s6404_s7 + $0x22] ss:$0 sm:$0xff] }
 0x1b2   : >> { %v1643_v36 = vmul.f32 %v4117_v17, %v3820_v5  ;;  %v1644_v37 = vmul.f32 %v4117_v17, %v3821_v16  ;;  %v1625_v40 = vadd.f32 %v1623_v28, %v1596_v20  ;;  %v1626_v41 = vadd.f32 %v1624_v29, %v1597_v21  ;;  %v4128_v17 = vld [vmem:[%s6400_s3 + $0x23] ss:$0 sm:$0xff] }
 0x1b3   : >> { %v1636_v42 = vadd.f32 %v1634_v30, %v1607_v22  ;;  %v1637_v43 = vadd.f32 %v1635_v31, %v1608_v23  ;;  %v1652_v47 = vmul.f32 %v4118_v26, %v3820_v5  ;;  %v1653_v48 = vmul.f32 %v4118_v26, %v3821_v16  ;;  %v3840_v16 = vld [vmem:[%s4554_s27 + $0x78] sm:$0xff]  ;;  %v3841_v22 = vld [vmem:[%s4554_s27 + $0x80] sm:$0xff] }
 0x1b4   : >> { %v1645_v45 = vadd.f32 %v1643_v36, %v1616_v34  ;;  %v1646_v46 = vadd.f32 %v1644_v37, %v1617_v35  ;;  %v1663_v52 = vmul.f32 %v4119_v32, %v3825_v27  ;;  %v1664_v53 = vmul.f32 %v4119_v32, %v3826_v38  ;;  %v4129_v23 = vld [vmem:[%s6402_s5 + $0x23] ss:$0 sm:$0xff]  ;;  %v4131_v34 = vld [vmem:[%s6400_s3 + $0x24] ss:$0 sm:$0xff] }
 0x1b5   : >> { %v1672_v54 = vmul.f32 %v4120_v33, %v3825_v27  ;;  %v1673_v55 = vmul.f32 %v4120_v33, %v3826_v38  ;;  %v1654_v57 = vadd.f32 %v1652_v47, %v1625_v40  ;;  %v1655_v58 = vadd.f32 %v1653_v48, %v1626_v41  ;;  %v4130_v32 = vld [vmem:[%s6404_s7 + $0x23] ss:$0 sm:$0xff]  ;;  %v3845_v33 = vld [vmem:[%s4554_s27 + $0x79] sm:$0xff] }
 0x1b6   : >> { %v1681_v59 = vmul.f32 %v4121_v39, %v3825_v27  ;;  %v1682_v60 = vmul.f32 %v4121_v39, %v3826_v38  ;;  %v1665_v62 = vadd.f32 %v1663_v52, %v1636_v42  ;;  %v1666_v63 = vadd.f32 %v1664_v53, %v1637_v43  ;;  %v4132_v39 = vld [vmem:[%s6402_s5 + $0x24] ss:$0 sm:$0xff] }
 0x1b7   : >> { %v1674_v0 = vadd.f32 %v1672_v54, %v1645_v45  ;;  %v1675_v1 = vadd.f32 %v1673_v55, %v1646_v46  ;;  %v1692_v7 = vmul.f32 %v4122_v50, %v3830_v44  ;;  %v1693_v8 = vmul.f32 %v4122_v50, %v3831_v49  ;;  %v4133_v45 = vld [vmem:[%s6404_s7 + $0x24] ss:$0 sm:$0xff]  ;;  %v3850_v50 = vld [vmem:[%s4554_s27 + $0x7a] sm:$0xff] }
 0x1b8   : >> { %v1683_v5 = vadd.f32 %v1681_v59, %v1654_v57  ;;  %v1684_v6 = vadd.f32 %v1682_v60, %v1655_v58  ;;  %v1701_v11 = vmul.f32 %v4123_v51, %v3830_v44  ;;  %v1702_v12 = vmul.f32 %v4123_v51, %v3831_v49  ;;  %v3851_v55 = vld [vmem:[%s4554_s27 + $0x82] sm:$0xff] }
 0x1b9   : >> { %v1710_v13 = vmul.f32 %v4124_v56, %v3830_v44  ;;  %v1711_v15 = vmul.f32 %v4124_v56, %v3831_v49  ;;  %v1694_v18 = vadd.f32 %v1692_v7, %v1665_v62  ;;  %v1695_v19 = vadd.f32 %v1693_v8, %v1666_v63  ;;  %v3846_v44 = vld [vmem:[%s4554_s27 + $0x81] sm:$0xff] }
 0x1ba   : >> { %v1721_v20 = vmul.f32 %v4125_v61, %v3835_v3  ;;  %v1722_v21 = vmul.f32 %v4125_v61, %v3836_v4  ;;  %v1703_v24 = vadd.f32 %v1701_v11, %v1674_v0  ;;  %v1704_v25 = vadd.f32 %v1702_v12, %v1675_v1  ;;  %v4134_v56 = vld [vmem:[%s6400_s3 + $0x25] ss:$0 sm:$0xff] }
 0x1bb   : >> { %v1712_v26 = vadd.f32 %v1710_v13, %v1683_v5  ;;  %v1713_v27 = vadd.f32 %v1711_v15, %v1684_v6  ;;  %v1730_v30 = vmul.f32 %v4126_v9, %v3835_v3  ;;  %v1731_v31 = vmul.f32 %v4126_v9, %v3836_v4  ;;  %v4135_v61 = vld [vmem:[%s6402_s5 + $0x25] ss:$0 sm:$0xff]  ;;  %v4137_v5 = vld [vmem:[%s6400_s3 + $0x26] ss:$0 sm:$0xff] }
 0x1bc   : >> { %v1723_v28 = vadd.f32 %v1721_v20, %v1694_v18  ;;  %v1724_v29 = vadd.f32 %v1722_v21, %v1695_v19  ;;  %v1739_v35 = vmul.f32 %v4127_v10, %v3835_v3  ;;  %v1740_v36 = vmul.f32 %v4127_v10, %v3836_v4  ;;  %v4136_v62 = vld [vmem:[%s6404_s7 + $0x25] ss:$0 sm:$0xff]  ;;  %v3855_v4 = vld [vmem:[%s4554_s27 + $0x7b] sm:$0xff] }
 0x1bd   : >> { %v1753_v37 = vmul.f32 %v4128_v17, %v3840_v16  ;;  %v1754_v38 = vmul.f32 %v4128_v17, %v3841_v22  ;;  %v1732_v40 = vadd.f32 %v1730_v30, %v1703_v24  ;;  %v1733_v41 = vadd.f32 %v1731_v31, %v1704_v25  ;;  %v3856_v10 = vld [vmem:[%s4554_s27 + $0x83] sm:$0xff] }
 0x1be   : >> { %v1762_v42 = vmul.f32 %v4129_v23, %v3840_v16  ;;  %v1763_v43 = vmul.f32 %v4129_v23, %v3841_v22  ;;  %v1741_v46 = vadd.f32 %v1739_v35, %v1712_v26  ;;  %v1742_v47 = vadd.f32 %v1740_v36, %v1713_v27  ;;  %v4139_v17 = vld [vmem:[%s6404_s7 + $0x26] ss:$0 sm:$0xff]  ;;  %v3860_v18 = vld [vmem:[%s4554_s27 + $0x7c] sm:$0xff]  ;;  %v4140_v23 = vld [vmem:[%s6400_s3 + $0x27] ss:$0 sm:$0xff] }
 0x1bf   : >> { %v1755_v48 = vadd.f32 %v1753_v37, %v1723_v28  ;;  %v1756_v49 = vadd.f32 %v1754_v38, %v1724_v29  ;;  %v1771_v53 = vmul.f32 %v4130_v32, %v3840_v16  ;;  %v1772_v54 = vmul.f32 %v4130_v32, %v3841_v22  ;;  %v4138_v16 = vld [vmem:[%s6402_s5 + $0x26] ss:$0 sm:$0xff]  ;;  %v4141_v29 = vld [vmem:[%s6402_s5 + $0x27] ss:$0 sm:$0xff] }
 0x1c0   : >> { %v1764_v51 = vadd.f32 %v1762_v42, %v1732_v40  ;;  %v1765_v52 = vadd.f32 %v1763_v43, %v1733_v41  ;;  %v1782_v57 = vmul.f32 %v4131_v34, %v3845_v33  ;;  %v1783_v58 = vmul.f32 %v4131_v34, %v3846_v44  ;;  %v3861_v28 = vld [vmem:[%s4554_s27 + $0x84] sm:$0xff] }
 0x1c1   : >> { %v1791_v59 = vmul.f32 %v4132_v39, %v3845_v33  ;;  %v1792_v60 = vmul.f32 %v4132_v39, %v3846_v44  ;;  %v1773_v63 = vadd.f32 %v1771_v53, %v1741_v46  ;;  %v1774_v0 = vadd.f32 %v1772_v54, %v1742_v47  ;;  %v4142_v38 = vld [vmem:[%s6404_s7 + $0x27] ss:$0 sm:$0xff]  ;;  %v3865_v39 = vld [vmem:[%s4554_s27 + $0x7d] sm:$0xff] }
 0x1c2   : >> { %v1800_v1 = vmul.f32 %v4133_v45, %v3845_v33  ;;  %v1801_v3 = vmul.f32 %v4133_v45, %v3846_v44  ;;  %v1784_v6 = vadd.f32 %v1782_v57, %v1755_v48  ;;  %v1785_v7 = vadd.f32 %v1783_v58, %v1756_v49  ;;  %v4143_v44 = vld [vmem:[%s6400_s3 + $0x28] ss:$0 sm:$0xff] }
 0x1c3   : >> { %v1793_v8 = vadd.f32 %v1791_v59, %v1764_v51  ;;  %v1794_v9 = vadd.f32 %v1792_v60, %v1765_v52  ;;  %v1811_v13 = vmul.f32 %v4134_v56, %v3850_v50  ;;  %v1812_v15 = vmul.f32 %v4134_v56, %v3851_v55  ;;  %v4144_v45 = vld [vmem:[%s6402_s5 + $0x28] ss:$0 sm:$0xff]  ;;  %v3870_v56 = vld [vmem:[%s4554_s27 + $0x7e] sm:$0xff] }
 0x1c4   : >> { %v1802_v11 = vadd.f32 %v1800_v1, %v1773_v63  ;;  %v1803_v12 = vadd.f32 %v1801_v3, %v1774_v0  ;;  %v1820_v19 = vmul.f32 %v4135_v61, %v3850_v50  ;;  %v1821_v20 = vmul.f32 %v4135_v61, %v3851_v55  ;;  %v4145_v51 = vld [vmem:[%s6404_s7 + $0x28] ss:$0 sm:$0xff]  ;;  %v4147_v63 = vld [vmem:[%s6402_s5 + $0x29] ss:$0 sm:$0xff] }
 0x1c5   : >> { %v1829_v21 = vmul.f32 %v4136_v62, %v3850_v50  ;;  %v1830_v22 = vmul.f32 %v4136_v62, %v3851_v55  ;;  %v1813_v24 = vadd.f32 %v1811_v13, %v1784_v6  ;;  %v1814_v25 = vadd.f32 %v1812_v15, %v1785_v7  ;;  %v3866_v50 = vld [vmem:[%s4554_s27 + $0x85] sm:$0xff] }
 0x1c6   : >> { %v1840_v26 = vmul.f32 %v4137_v5, %v3855_v4  ;;  %v1841_v27 = vmul.f32 %v4137_v5, %v3856_v10  ;;  %v1822_v30 = vadd.f32 %v1820_v19, %v1793_v8  ;;  %v1823_v31 = vadd.f32 %v1821_v20, %v1794_v9  ;;  %v3871_v61 = vld [vmem:[%s4554_s27 + $0x86] sm:$0xff] }
 0x1c7   : >> { %v1831_v32 = vadd.f32 %v1829_v21, %v1802_v11  ;;  %v1832_v33 = vadd.f32 %v1830_v22, %v1803_v12  ;;  %v1849_v36 = vmul.f32 %v4138_v16, %v3855_v4  ;;  %v1850_v37 = vmul.f32 %v4138_v16, %v3856_v10  ;;  %v4146_v62 = vld [vmem:[%s6400_s3 + $0x29] ss:$0 sm:$0xff]  ;;  %v3875_v16 = vld [vmem:[%s4554_s27 + $0x90] sm:$0xff]  ;;  %v4150_v22 = vld [vmem:[%s6402_s5 + $0x2a] ss:$0 sm:$0xff] }
 0x1c8   : >> { %v1842_v34 = vadd.f32 %v1840_v26, %v1813_v24  ;;  %v1843_v35 = vadd.f32 %v1841_v27, %v1814_v25  ;;  %v1858_v40 = vmul.f32 %v4139_v17, %v3855_v4  ;;  %v1859_v41 = vmul.f32 %v4139_v17, %v3856_v10  ;;  %v4148_v5 = vld [vmem:[%s6404_s7 + $0x29] ss:$0 sm:$0xff]  ;;  %v4149_v10 = vld [vmem:[%s6400_s3 + $0x2a] ss:$0 sm:$0xff]  ;;  %v3876_v17 = vld [vmem:[%s4554_s27 + $0x98] sm:$0xff] }
 0x1c9   : >> { %v1869_v42 = vmul.f32 %v4140_v23, %v3860_v18  ;;  %v1870_v43 = vmul.f32 %v4140_v23, %v3861_v28  ;;  %v1851_v46 = vadd.f32 %v1849_v36, %v1822_v30  ;;  %v1852_v47 = vadd.f32 %v1850_v37, %v1823_v31  ;;  %v4151_v23 = vld [vmem:[%s6404_s7 + $0x2a] ss:$0 sm:$0xff] }
 0x1ca   : >> { %v1878_v48 = vmul.f32 %v4141_v29, %v3860_v18  ;;  %v1879_v49 = vmul.f32 %v4141_v29, %v3861_v28  ;;  %v1860_v52 = vadd.f32 %v1858_v40, %v1831_v32  ;;  %v1861_v53 = vadd.f32 %v1859_v41, %v1832_v33  ;;  %v4152_v29 = vld [vmem:[%s6400_s3 + $0x2b] ss:$0 sm:$0xff] }
 0x1cb   : >> { %v1871_v54 = vadd.f32 %v1869_v42, %v1842_v34  ;;  %v1872_v55 = vadd.f32 %v1870_v43, %v1843_v35  ;;  %v1887_v59 = vmul.f32 %v4142_v38, %v3860_v18  ;;  %v1888_v60 = vmul.f32 %v4142_v38, %v3861_v28  ;;  %v3880_v28 = vld [vmem:[%s4554_s27 + $0x91] sm:$0xff]  ;;  %v3881_v34 = vld [vmem:[%s4554_s27 + $0x99] sm:$0xff]  ;;  %v4153_v35 = vld [vmem:[%s6402_s5 + $0x2b] ss:$0 sm:$0xff] }
 0x1cc   : >> { %v1880_v57 = vadd.f32 %v1878_v48, %v1851_v46  ;;  %v1881_v58 = vadd.f32 %v1879_v49, %v1852_v47  ;;  %v1898_v0 = vmul.f32 %v4143_v44, %v3865_v39  ;;  %v1899_v1 = vmul.f32 %v4143_v44, %v3866_v50  ;;  %v4154_v44 = vld [vmem:[%s6404_s7 + $0x2b] ss:$0 sm:$0xff]  ;;  %v4155_v49 = vld [vmem:[%s6400_s3 + $0x2c] ss:$0 sm:$0xff] }
 0x1cd   : >> { %v1907_v3 = vmul.f32 %v4144_v45, %v3865_v39  ;;  %v1908_v4 = vmul.f32 %v4144_v45, %v3866_v50  ;;  %v1889_v6 = vadd.f32 %v1887_v59, %v1860_v52  ;;  %v1890_v7 = vadd.f32 %v1888_v60, %v1861_v53 }
 0x1ce   : >> { %v1916_v8 = vmul.f32 %v4145_v51, %v3865_v39  ;;  %v1917_v9 = vmul.f32 %v4145_v51, %v3866_v50  ;;  %v1900_v11 = vadd.f32 %v1898_v0, %v1871_v54  ;;  %v1901_v12 = vadd.f32 %v1899_v1, %v1872_v55  ;;  %v4156_v50 = vld [vmem:[%s6402_s5 + $0x2c] ss:$0 sm:$0xff]  ;;  %v3885_v55 = vld [vmem:[%s4554_s27 + $0x92] sm:$0xff] }
 0x1cf   : >> { %v1909_v13 = vadd.f32 %v1907_v3, %v1880_v57  ;;  %v1910_v15 = vadd.f32 %v1908_v4, %v1881_v58  ;;  %v1927_v20 = vmul.f32 %v4146_v62, %v3870_v56  ;;  %v1928_v21 = vmul.f32 %v4146_v62, %v3871_v61  ;;  %v4157_v57 = vld [vmem:[%s6404_s7 + $0x2c] ss:$0 sm:$0xff]  ;;  %v3890_v3 = vld [vmem:[%s4554_s27 + $0x93] sm:$0xff]  ;;  %v4158_v4 = vld [vmem:[%s6400_s3 + $0x2d] ss:$0 sm:$0xff] }
 0x1d0   : >> { %v1918_v18 = vadd.f32 %v1916_v8, %v1889_v6  ;;  %v1919_v19 = vadd.f32 %v1917_v9, %v1890_v7  ;;  %v1936_v24 = vmul.f32 %v4147_v63, %v3870_v56  ;;  %v1937_v25 = vmul.f32 %v4147_v63, %v3871_v61  ;;  %v3891_v9 = vld [vmem:[%s4554_s27 + $0x9b] sm:$0xff] }
 0x1d1   : >> { %v1945_v26 = vmul.f32 %v4148_v5, %v3870_v56  ;;  %v1946_v27 = vmul.f32 %v4148_v5, %v3871_v61  ;;  %v1929_v30 = vadd.f32 %v1927_v20, %v1900_v11  ;;  %v1930_v31 = vadd.f32 %v1928_v21, %v1901_v12  ;;  %v3886_v56 = vld [vmem:[%s4554_s27 + $0x9a] sm:$0xff]  ;;  %v4160_v11 = vld [vmem:[%s6404_s7 + $0x2d] ss:$0 sm:$0xff] }
 0x1d2   : >> { %v1959_v32 = vmul.f32 %v4149_v10, %v3875_v16  ;;  %v1960_v33 = vmul.f32 %v4149_v10, %v3876_v17  ;;  %v1938_v36 = vadd.f32 %v1936_v24, %v1909_v13  ;;  %v1939_v37 = vadd.f32 %v1937_v25, %v1910_v15  ;;  %v4159_v10 = vld [vmem:[%s6402_s5 + $0x2d] ss:$0 sm:$0xff] }
 0x1d3   : >> { %v1947_v38 = vadd.f32 %v1945_v26, %v1918_v18  ;;  %v1948_v39 = vadd.f32 %v1946_v27, %v1919_v19  ;;  %v1968_v42 = vmul.f32 %v4150_v22, %v3875_v16  ;;  %v1969_v43 = vmul.f32 %v4150_v22, %v3876_v17  ;;  %v3895_v22 = vld [vmem:[%s4554_s27 + $0x94] sm:$0xff] }
 0x1d4   : >> { %v1961_v40 = vadd.f32 %v1959_v32, %v1929_v30  ;;  %v1962_v41 = vadd.f32 %v1960_v33, %v1930_v31  ;;  %v1977_v45 = vmul.f32 %v4151_v23, %v3875_v16  ;;  %v1978_v46 = vmul.f32 %v4151_v23, %v3876_v17  ;;  %v4161_v17 = vld [vmem:[%s6400_s3 + $0x2e] ss:$0 sm:$0xff]  ;;  %v3896_v23 = vld [vmem:[%s4554_s27 + $0x9c] sm:$0xff] }
 0x1d5   : >> { %v1988_v47 = vmul.f32 %v4152_v29, %v3880_v28  ;;  %v1989_v48 = vmul.f32 %v4152_v29, %v3881_v34  ;;  %v1970_v51 = vadd.f32 %v1968_v42, %v1938_v36  ;;  %v1971_v52 = vadd.f32 %v1969_v43, %v1939_v37  ;;  %v4163_v33 = vld [vmem:[%s6404_s7 + $0x2e] ss:$0 sm:$0xff] }
 0x1d6   : >> { %v1997_v53 = vmul.f32 %v4153_v35, %v3880_v28  ;;  %v1998_v54 = vmul.f32 %v4153_v35, %v3881_v34  ;;  %v1979_v58 = vadd.f32 %v1977_v45, %v1947_v38  ;;  %v1980_v59 = vadd.f32 %v1978_v46, %v1948_v39  ;;  %v3900_v39 = vld [vmem:[%s4554_s27 + $0x95] sm:$0xff] }
 0x1d7   : >> { %v1990_v60 = vadd.f32 %v1988_v47, %v1961_v40  ;;  %v1991_v61 = vadd.f32 %v1989_v48, %v1962_v41  ;;  %v2006_v0 = vmul.f32 %v4154_v44, %v3880_v28  ;;  %v2007_v1 = vmul.f32 %v4154_v44, %v3881_v34  ;;  %v4162_v28 = vld [vmem:[%s6402_s5 + $0x2e] ss:$0 sm:$0xff]  ;;  %v4164_v34 = vld [vmem:[%s6400_s3 + $0x2f] ss:$0 sm:$0xff]  ;;  %v3901_v40 = vld [vmem:[%s4554_s27 + $0x9d] sm:$0xff] }
 0x1d8   : >> { %v1999_v62 = vadd.f32 %v1997_v53, %v1970_v51  ;;  %v2000_v63 = vadd.f32 %v1998_v54, %v1971_v52  ;;  %v2017_v5 = vmul.f32 %v4155_v49, %v3885_v55  ;;  %v2018_v6 = vmul.f32 %v4155_v49, %v3886_v56  ;;  %v4165_v41 = vld [vmem:[%s6402_s5 + $0x2f] ss:$0 sm:$0xff] }
 0x1d9   : >> { %v2026_v7 = vmul.f32 %v4156_v50, %v3885_v55  ;;  %v2027_v8 = vmul.f32 %v4156_v50, %v3886_v56  ;;  %v2008_v12 = vadd.f32 %v2006_v0, %v1979_v58  ;;  %v2009_v13 = vadd.f32 %v2007_v1, %v1980_v59  ;;  %v4166_v50 = vld [vmem:[%s6404_s7 + $0x2f] ss:$0 sm:$0xff] }
 0x1da   : >> { %v2035_v15 = vmul.f32 %v4157_v57, %v3885_v55  ;;  %v2036_v16 = vmul.f32 %v4157_v57, %v3886_v56  ;;  %v2019_v18 = vadd.f32 %v2017_v5, %v1990_v60  ;;  %v2020_v19 = vadd.f32 %v2018_v6, %v1991_v61  ;;  %v4167_v55 = vld [vmem:[%s6400_s3 + $0x30] ss:$0 sm:$0xff]  ;;  %v3905_v61 = vld [vmem:[%s4554_s27 + $0x96] sm:$0xff] }
 0x1db   : >> { %v2028_v20 = vadd.f32 %v2026_v7, %v1999_v62  ;;  %v2029_v21 = vadd.f32 %v2027_v8, %v2000_v63  ;;  %v2046_v26 = vmul.f32 %v4158_v4, %v3890_v3  ;;  %v2047_v27 = vmul.f32 %v4158_v4, %v3891_v9  ;;  %v4168_v56 = vld [vmem:[%s6402_s5 + $0x30] ss:$0 sm:$0xff]  ;;  %v3906_v62 = vld [vmem:[%s4554_s27 + $0x9e] sm:$0xff]  ;;  %s3910_s27 = sshll.u32 %s2159_s18, 4 }
 0x1dc   : >> { %v2037_v24 = vadd.f32 %v2035_v15, %v2008_v12  ;;  %v2038_v25 = vadd.f32 %v2036_v16, %v2009_v13  ;;  %v2055_v29 = vmul.f32 %v4159_v10, %v3890_v3  ;;  %v2056_v30 = vmul.f32 %v4159_v10, %v3891_v9  ;;  %v4169_v63 = vld [vmem:[%s6404_s7 + $0x30] ss:$0 sm:$0xff]  ;;  %s2161_s19 = scalar_lea.vmem %s4459_s2, %s3910_s27 }
 0x1dd   : >> { %v2064_v31 = vmul.f32 %v4160_v11, %v3890_v3  ;;  %v2065_v32 = vmul.f32 %v4160_v11, %v3891_v9  ;;  %v2048_v35 = vadd.f32 %v2046_v26, %v2019_v18  ;;  %v2049_v36 = vadd.f32 %v2047_v27, %v2020_v19 }
 0x1de   : >> { %v2075_v37 = vmul.f32 %v4161_v17, %v3895_v22  ;;  %v2076_v38 = vmul.f32 %v4161_v17, %v3896_v23  ;;  %v2057_v42 = vadd.f32 %v2055_v29, %v2028_v20  ;;  %v2058_v43 = vadd.f32 %v2056_v30, %v2029_v21  ;;  %v2162_v29 = vld [vmem:[%s2161_s19] sm:$0xff]  ;;  %v2163_v30 = vld [vmem:[%s2161_s19 + $0x8] sm:$0xff] }
 0x1df   : >> { %v2066_v44 = vadd.f32 %v2064_v31, %v2037_v24  ;;  %v2067_v45 = vadd.f32 %v2065_v32, %v2038_v25  ;;  %v2084_v48 = vmul.f32 %v4162_v28, %v3895_v22  ;;  %v2085_v49 = vmul.f32 %v4162_v28, %v3896_v23 }
 0x1e0   : >> { %v2077_v46 = vadd.f32 %v2075_v37, %v2048_v35  ;;  %v2078_v47 = vadd.f32 %v2076_v38, %v2049_v36  ;;  %v2093_v51 = vmul.f32 %v4163_v33, %v3895_v22  ;;  %v2094_v52 = vmul.f32 %v4163_v33, %v3896_v23 }
 0x1e1   : >> { %v2104_v53 = vmul.f32 %v4164_v34, %v3900_v39  ;;  %v2105_v54 = vmul.f32 %v4164_v34, %v3901_v40  ;;  %v2086_v57 = vadd.f32 %v2084_v48, %v2057_v42  ;;  %v2087_v58 = vadd.f32 %v2085_v49, %v2058_v43 }
 0x1e2   : >> { %v2113_v59 = vmul.f32 %v4165_v41, %v3900_v39  ;;  %v2114_v60 = vmul.f32 %v4165_v41, %v3901_v40  ;;  %v2095_v0 = vadd.f32 %v2093_v51, %v2066_v44  ;;  %v2096_v1 = vadd.f32 %v2094_v52, %v2067_v45 }
 0x1e3   : >> { %v2106_v3 = vadd.f32 %v2104_v53, %v2077_v46  ;;  %v2107_v4 = vadd.f32 %v2105_v54, %v2078_v47  ;;  %v2122_v7 = vmul.f32 %v4166_v50, %v3900_v39  ;;  %v2123_v8 = vmul.f32 %v4166_v50, %v3901_v40 }
 0x1e4   : >> { %v2115_v5 = vadd.f32 %v2113_v59, %v2086_v57  ;;  %v2116_v6 = vadd.f32 %v2114_v60, %v2087_v58  ;;  %v2133_v9 = vmul.f32 %v4167_v55, %v3905_v61  ;;  %v2134_v10 = vmul.f32 %v4167_v55, %v3906_v62 }
 0x1e5   : >> { %v2142_v11 = vmul.f32 %v4168_v56, %v3905_v61  ;;  %v2143_v12 = vmul.f32 %v4168_v56, %v3906_v62  ;;  %v2124_v13 = vadd.f32 %v2122_v7, %v2095_v0  ;;  %v2125_v15 = vadd.f32 %v2123_v8, %v2096_v1 }
 0x1e6   : >> { %v2151_v16 = vmul.f32 %v4169_v63, %v3905_v61  ;;  %v2152_v17 = vmul.f32 %v4169_v63, %v3906_v62  ;;  %v2135_v18 = vadd.f32 %v2133_v9, %v2106_v3  ;;  %v2136_v19 = vadd.f32 %v2134_v10, %v2107_v4 }
 0x1e7   : >> { %v2144_v20 = vadd.f32 %v2142_v11, %v2115_v5  ;;  %v2145_v21 = vadd.f32 %v2143_v12, %v2116_v6  ;;  %v2165_v26 = vperm.slane %v4450_v2, 0  ;;  %vm2629_vm10 = vcmask (%p701_p13), 1041408  }
 0x1e8   : >> { %v2153_v22 = vadd.f32 %v2151_v16, %v2124_v13  ;;  %v2154_v23 = vadd.f32 %v2152_v17, %v2125_v15 }
 0x1e9   : >> { %v2155_v24 = vmul.f32 %v2144_v20, %v2135_v18  ;;  %v2156_v25 = vmul.f32 %v2145_v21, %v2136_v19 }
 0x1eb   : >> { %v2157_v27 = vadd.f32 %v2155_v24, %v2153_v22  ;;  %v2158_v28 = vadd.f32 %v2156_v25, %v2154_v23 }
 0x1ed   : >> { %v2167_v31 = vmul.f32 %v2165_v26, %v2157_v27  ;;  %v2168_v32 = vmul.f32 %v2165_v26, %v2158_v28 }
 0x1ee   : > { %703 = sbr.rel (!%p701_p13) target bundleno = 334 (0x14e), region = 298 }
 0x1ef   : >> { %v2169_v33 = vadd.f32 %v2167_v31, %v2162_v29  ;;  %v2170_v34 = vadd.f32 %v2168_v32, %v2163_v30 }
 0x1f1   : >> { %2174 = vst.msk [vmem:[%s2172_s9] sm:$0xff] %vm628_vm1, %v2169_v33 }
 0x1f2   : >> { %2175 = vst.msk [vmem:[%s2172_s9 + $0x8] sm:$0xff] %vm628_vm1, %v2170_v34 }
 0x1f9   : > { %v2184_v35 = vld [vmem:[%s4467_s25 + $0x40] sm:$0xff]  ;;  %v5100_v37 = vld [vmem:[%s4467_s25 + $0x50] sm:$0xff]  ;;  %v2185_v2 = vld [vmem:[%s4467_s25 + $0x48] sm:$0xff] }
 0x1fa   : > { %v2176_v36 = vld [vmem:[%s4467_s25] sm:$0xff]  ;;  %v2217_v38 = vsel %vm628_vm1, %v2184_v35, 0.0  ;;  %v2223_v40 = vsel %vm628_vm1, %v5100_v37, 0.0  ;;  %v2177_v41 = vld [vmem:[%s4467_s25 + $0x8] sm:$0xff]  ;;  %v2187_v42 = vld [vmem:[%s4467_s25 + $0x58] sm:$0xff]  ;;  %v2220_v43 = vsel %vm628_vm1, %v2185_v2, 0.0 }
 0x1fb   : > { %v2193_v39 = vsel %vm628_vm1, %v2176_v36, 0.0  ;;  %2218 = vadd.xlane.f32.xlu0 %v2217_v38  ;;  %2224 = vadd.xlane.f32.xlu2 %v2223_v40  ;;  %v2196_v44 = vsel %vm628_vm1, %v2177_v41, 0.0  ;;  %v2226_v45 = vsel %vm628_vm1, %v2187_v42, 0.0  ;;  %v5113_v46 = vld [vmem:[%s4467_s25 + $0x10] sm:$0xff]  ;;  %v5116_v47 = vld [vmem:[%s4467_s25 + $0x18] sm:$0xff]  ;;  %v2188_v48 = vld [vmem:[%s4467_s25 + $0x60] sm:$0xff] }
 0x1fc   : > { %2194 = vadd.xlane.f32.xlu1 %v2193_v39  ;;  %v2199_v49 = vsel %vm628_vm1, %v5113_v46, 0.0  ;;  %v2202_v50 = vsel %vm628_vm1, %v5116_v47, 0.0  ;;  %v2229_v51 = vsel %vm628_vm1, %v2188_v48, 0.0  ;;  %v5125_v52 = vld [vmem:[%s4467_s25 + $0x68] sm:$0xff]  ;;  %v5128_v53 = vld [vmem:[%s4467_s25 + $0x20] sm:$0xff]  ;;  %v5140_v58 = vld [vmem:[%s4467_s25 + $0x78] sm:$0xff] }
 0x1fd   : > { %v5131_v54 = vld [vmem:[%s4467_s25 + $0x28] sm:$0xff]  ;;  %v2232_v55 = vsel %vm628_vm1, %v5125_v52, 0.0  ;;  %v2205_v56 = vsel %vm628_vm1, %v5128_v53, 0.0  ;;  %v5143_v59 = vld [vmem:[%s4467_s25 + $0x70] sm:$0xff]  ;;  %v2238_v60 = vsel %vm628_vm1, %v5140_v58, 0.0 }
 0x1fe   : > { %v2208_v57 = vsel %vm628_vm1, %v5131_v54, 0.0  ;;  %v2235_v61 = vsel %vm628_vm1, %v5143_v59, 0.0  ;;  %v5159_v12 = vld [vmem:[%s4467_s25 + $0x30] sm:$0xff] }
 0x1ff   : > { %v2211_v18 = vsel %vm628_vm1, %v5159_v12, 0.0 }
 0x203   : > { %2221 = vadd.xlane.f32.xlu0 %v2220_v43  ;;  %2227 = vadd.xlane.f32.xlu2 %v2226_v45 }
 0x204   : > { %2197 = vadd.xlane.f32.xlu1 %v2196_v44  ;;  %v5203_v44 = vld [vmem:[%s4467_s25 + $0x38] sm:$0xff] }
 0x20b   : > { %2200 = vadd.xlane.f32.xlu0 %v2199_v49  ;;  %2230 = vadd.xlane.f32.xlu2 %v2229_v51  ;;  %v2214_v51 = vsel %vm628_vm1, %v5203_v44, 0.0 }
 0x20c   : > { %2203 = vadd.xlane.f32.xlu1 %v2202_v50 }
 0x213   : > { %2233 = vadd.xlane.f32.xlu0 %v2232_v55  ;;  %2209 = vadd.xlane.f32.xlu2 %v2208_v57 }
 0x214   : > { %2206 = vadd.xlane.f32.xlu1 %v2205_v56 }
 0x21b   : > { %2239 = vadd.xlane.f32.xlu0 %v2238_v60  ;;  %2236 = vadd.xlane.f32.xlu2 %v2235_v61 }
 0x26e   : > { %v2219_v62 = vpop.xlane.xlu0 %2218  ;;  %v2225_v1 = vpop.xlane.xlu2 %2224 }
 0x26f   : > { %v2195_v63 = vpop.xlane.xlu1 %2194  ;;  %v2256_v0 = vmul.f32 %v2219_v62, %v4506_v14  ;;  %v2258_v13 = vmul.f32 %v2225_v1, %v4506_v14 }
 0x270   : > { %v2248_v8 = vmul.f32 %v2195_v63, %v4506_v14 }
 0x271   : > { %v5150_v3 = vsub.f32 %v2184_v35, %v2256_v0  ;;  %v5178_v23 = vsub.f32 %v5100_v37, %v2258_v13 }
 0x272   : > { %v5169_v19 = vsub.f32 %v2176_v36, %v2248_v8 }
 0x273   : > { %v2288_v4 = vmul.f32 %v5150_v3, %v5150_v3  ;;  %v2290_v32 = vmul.f32 %v5178_v23, %v5178_v23 }
 0x274   : > { %v2280_v30 = vmul.f32 %v5169_v19, %v5169_v19 }
 0x275   : > { %v2320_v5 = vsel %vm628_vm1, %v2288_v4, 0.0  ;;  %v2326_v37 = vsel %vm628_vm1, %v2290_v32, 0.0 }
 0x276   : > { %v2222_v6 = vpop.xlane.xlu0 %2221  ;;  %2321 = vadd.xlane.f32.xlu0 %v2320_v5  ;;  %v2228_v11 = vpop.xlane.xlu2 %2227  ;;  %v2296_v36 = vsel %vm628_vm1, %v2280_v30, 0.0 }
 0x277   : > { %v2198_v7 = vpop.xlane.xlu1 %2197  ;;  %v2257_v9 = vmul.f32 %v2222_v6, %v4506_v14  ;;  %v2259_v15 = vmul.f32 %v2228_v11, %v4506_v14 }
 0x278   : > { %v2249_v10 = vmul.f32 %v2198_v7, %v4506_v14 }
 0x279   : > { %v5163_v16 = vsub.f32 %v2185_v2, %v2257_v9  ;;  %v5171_v20 = vsub.f32 %v2187_v42, %v2259_v15 }
 0x27a   : > { %v5165_v17 = vsub.f32 %v2177_v41, %v2249_v10 }
 0x27b   : > { %v2289_v21 = vmul.f32 %v5163_v16, %v5163_v16  ;;  %v2291_v29 = vmul.f32 %v5171_v20, %v5171_v20 }
 0x27c   : > { %v2281_v22 = vmul.f32 %v5165_v17, %v5165_v17 }
 0x27d   : > { %v2323_v24 = vsel %vm628_vm1, %v2289_v21, 0.0  ;;  %v2329_v35 = vsel %vm628_vm1, %v2291_v29, 0.0 }
 0x27e   : > { %v2299_v25 = vsel %vm628_vm1, %v2281_v22, 0.0  ;;  %2212 = vadd.xlane.f32.xlu0 %v2211_v18  ;;  %2324 = vadd.xlane.f32.xlu1 %v2323_v24  ;;  %v2201_v26 = vpop.xlane.xlu0 %2200  ;;  %v2231_v28 = vpop.xlane.xlu2 %2230 }
 0x27f   : > { %v2204_v27 = vpop.xlane.xlu1 %2203  ;;  %2300 = vadd.xlane.f32.xlu2 %v2299_v25  ;;  %v2260_v31 = vmul.f32 %v2231_v28, %v4506_v14  ;;  %v2250_v2 = vmul.f32 %v2201_v26, %v4506_v14 }
 0x280   : > { %v2251_v33 = vmul.f32 %v2204_v27, %v4506_v14 }
 0x281   : > { %v5190_v34 = vsub.f32 %v2188_v48, %v2260_v31  ;;  %v5209_v48 = vsub.f32 %v5113_v46, %v2250_v2 }
 0x282   : > { %v5196_v38 = vsub.f32 %v5116_v47, %v2251_v33 }
 0x283   : > { %v2292_v42 = vmul.f32 %v5190_v34, %v5190_v34 }
 0x284   : > { %v2283_v45 = vmul.f32 %v5196_v38, %v5196_v38 }
 0x285   : > { %v2332_v50 = vsel %vm628_vm1, %v2292_v42, 0.0 }
 0x286   : > { %2330 = vadd.xlane.f32.xlu0 %v2329_v35  ;;  %2297 = vadd.xlane.f32.xlu1 %v2296_v36  ;;  %v2234_v39 = vpop.xlane.xlu0 %2233  ;;  %v2210_v41 = vpop.xlane.xlu2 %2209  ;;  %v2305_v55 = vsel %vm628_vm1, %v2283_v45, 0.0 }
 0x287   : > { %v2207_v40 = vpop.xlane.xlu1 %2206  ;;  %2327 = vadd.xlane.f32.xlu2 %v2326_v37  ;;  %v2253_v43 = vmul.f32 %v2210_v41, %v4506_v14  ;;  %v2261_v60 = vmul.f32 %v2234_v39, %v4506_v14 }
 0x288   : > { %v2252_v47 = vmul.f32 %v2207_v40, %v4506_v14 }
 0x289   : > { %v5212_v49 = vsub.f32 %v5131_v54, %v2253_v43  ;;  %v2282_v54 = vmul.f32 %v5209_v48, %v5209_v48 }
 0x28a   : > { %v5219_v56 = vsub.f32 %v5128_v53, %v2252_v47  ;;  %v5230_v53 = vsub.f32 %v5125_v52, %v2261_v60 }
 0x28b   : > { %v2285_v46 = vmul.f32 %v5212_v49, %v5212_v49  ;;  %v2302_v0 = vsel %vm628_vm1, %v2282_v54, 0.0 }
 0x28c   : > { %v2284_v62 = vmul.f32 %v5219_v56, %v5219_v56  ;;  %v2293_v7 = vmul.f32 %v5230_v53, %v5230_v53 }
 0x28d   : > { %v2311_v63 = vsel %vm628_vm1, %v2285_v46, 0.0 }
 0x28e   : > { %2333 = vadd.xlane.f32.xlu0 %v2332_v50  ;;  %2215 = vadd.xlane.f32.xlu1 %v2214_v51  ;;  %v2240_v57 = vpop.xlane.xlu0 %2239  ;;  %v2308_v4 = vsel %vm628_vm1, %v2284_v62, 0.0  ;;  %v2237_v5 = vpop.xlane.xlu2 %2236 }
 0x28f   : > { %2306 = vadd.xlane.f32.xlu2 %v2305_v55  ;;  %v2263_v61 = vmul.f32 %v2240_v57, %v4506_v14  ;;  %v2262_v6 = vmul.f32 %v2237_v5, %v4506_v14 }
 0x291   : > { %v5235_v1 = vsub.f32 %v5140_v58, %v2263_v61  ;;  %v5244_v8 = vsub.f32 %v5143_v59, %v2262_v6  ;;  %v2335_v58 = vsel %vm628_vm1, %v2293_v7, 0.0  ;;  %v2600_v59 = vld [vmem:[%s6409_s12] sm:$0x3] }
 0x292   : > { %v2631_v21 = vsel %vm2629_vm10, %v2600_v59, 0 }
 0x293   : > { %v2295_v52 = vmul.f32 %v5235_v1, %v5235_v1  ;;  %v2294_v10 = vmul.f32 %v5244_v8, %v5244_v8  ;;  %3954 = vmatpush.bf16.msra.mxu2 %v2631_v21  ;;  %2640 = vmatpush.bf16.msra.mxu0 %v2631_v21 }
 0x295   : > { %v2341_v9 = vsel %vm628_vm1, %v2295_v52, 0.0  ;;  %v2338_v11 = vsel %vm628_vm1, %v2294_v10, 0.0 }
 0x296   : > { %2312 = vadd.xlane.f32.xlu0 %v2311_v63  ;;  %2303 = vadd.xlane.f32.xlu1 %v2302_v0 }
 0x297   : > { %2309 = vadd.xlane.f32.xlu2 %v2308_v4 }
 0x29e   : > { %2336 = vadd.xlane.f32.xlu1 %v2335_v58 }
 0x29f   : > { %2342 = vadd.xlane.f32.xlu2 %v2341_v9 }
 0x2a6   : > { %2339 = vadd.xlane.f32.xlu1 %v2338_v11 }
 0x2e9   : > { %v2322_v13 = vpop.xlane.xlu0 %2321 }
 0x2ea   : > { %v2352_v15 = vmul.f32 %v2322_v13, %v4506_v14 }
 0x2ec   : > { %v2368_v18 = vadd.f32 1e-06, %v2352_v15 }
 0x2ee   : > { %4175 = vrsqrt.f32 %v2368_v18  ;;  %vm2462_vm12 = vweird.f32 %v2368_v18 }
 0x2f1   : > { %v2213_v22 = vpop.xlane.xlu0 %2212  ;;  %v2325_v24 = vpop.xlane.xlu1 %2324 }
 0x2f2   : > { %v2254_v25 = vmul.f32 %v2213_v22, %v4506_v14  ;;  %v2301_v26 = vpop.xlane.xlu2 %2300  ;;  %v2353_v27 = vmul.f32 %v2325_v24, %v4506_v14 }
 0x2f3   : > { %v2345_v28 = vmul.f32 %v2301_v26, %v4506_v14 }
 0x2f4   : > { %v5258_v29 = vpop.eup %4175  ;;  %v5261_v30 = vsub.f32 %v5159_v12, %v2254_v25  ;;  %v2369_v31 = vadd.f32 1e-06, %v2353_v27 }
 0x2f5   : > { %v2457_v32 = vmul.f32 %v5258_v29, %v2368_v18  ;;  %v5264_v33 = vadd.f32 1e-06, %v2345_v28  ;;  %vm2463_vm11 = vweird.f32 %v5258_v29 }
 0x2f6   : > { %4177 = vrsqrt.f32 %v2369_v31  ;;  %v2286_v35 = vmul.f32 %v5261_v30, %v5261_v30  ;;  %vm5299_vm13 = vmor %vm2462_vm12, %vm2463_vm11  ;;  %vm2472_vm15 = vweird.f32 %v2369_v31 }
 0x2f7   : > { %v2458_v36 = vmul.f32 %v5258_v29, %v2457_v32  ;;  %4179 = vrsqrt.f32 %v5264_v33  ;;  %vm2392_vm0 = vweird.f32 %v5264_v33 }
 0x2f8   : > { %v2314_v37 = vsel %vm628_vm1, %v2286_v35, 0.0  ;;  %v5341_v35 = vld [vmem:[%s6407_s10] ss:$0 sm:$0xff] }
 0x2f9   : > { %v2459_v39 = vmul.f32 0.5, %v2458_v36  ;;  %2315 = vadd.xlane.f32.xlu0 %v2314_v37  ;;  %v2331_v40 = vpop.xlane.xlu0 %2330  ;;  %v2298_v12 = vpop.xlane.xlu1 %2297 }
 0x2fa   : > { %v2355_v2 = vmul.f32 %v2331_v40, %v4506_v14  ;;  %v2328_v41 = vpop.xlane.xlu2 %2327  ;;  %v2344_v42 = vmul.f32 %v2298_v12, %v4506_v14 }
 0x2fb   : > { %v2354_v43 = vmul.f32 %v2328_v41, %v4506_v14  ;;  %v2460_v55 = vsub.f32 1.5, %v2459_v39 }
 0x2fc   : > { %v5274_v45 = vpop.eup %4177  ;;  %v5276_v47 = vadd.f32 1e-06, %v2355_v2  ;;  %v5278_v50 = vadd.f32 1e-06, %v2344_v42 }
 0x2fd   : > { %v5280_v51 = vpop.eup %4179  ;;  %v2467_v57 = vmul.f32 %v5274_v45, %v2369_v31  ;;  %v5283_v60 = vadd.f32 1e-06, %v2354_v43  ;;  %v2461_v62 = vmul.f32 %v5258_v29, %v2460_v55  ;;  %vm2473_vm14 = vweird.f32 %v5274_v45 }
 0x2fe   : > { %v2387_v46 = vmul.f32 %v5280_v51, %v5264_v33  ;;  %4181 = vrsqrt.f32 %v5276_v47  ;;  %vm5329_vm2 = vmor %vm2472_vm15, %vm2473_vm14  ;;  %vm2393_vm3 = vweird.f32 %v5280_v51  ;;  %vm2492_vm4 = vweird.f32 %v5276_v47 }
 0x2ff   : > { %v2468_v54 = vmul.f32 %v5274_v45, %v2467_v57  ;;  %4183 = vrsqrt.f32 %v5283_v60  ;;  %v2465_v24 = vsel %vm5299_vm13, %v5258_v29, %v2461_v62  ;;  %vm5359_vm5 = vmor %vm2392_vm0, %vm2393_vm3  ;;  %vm2482_vm6 = vweird.f32 %v5283_v60 }
 0x300   : > { %v2388_v61 = vmul.f32 %v5280_v51, %v2387_v46  ;;  %4185 = vrsqrt.f32 %v5278_v50  ;;  %v2544_v32 = vmul.f32 %v2465_v24, %v5150_v3  ;;  %vm2382_vm9 = vweird.f32 %v5278_v50 }
 0x301   : > { %v2469_v63 = vmul.f32 0.5, %v2468_v54  ;;  %v2334_v0 = vpop.xlane.xlu0 %2333  ;;  %v2216_v4 = vpop.xlane.xlu1 %2215 }
 0x302   : > { %v2356_v5 = vmul.f32 %v2334_v0, %v4506_v14  ;;  %v2307_v6 = vpop.xlane.xlu2 %2306  ;;  %v2255_v7 = vmul.f32 %v2216_v4, %v4506_v14  ;;  %v2389_v52 = vmul.f32 0.5, %v2388_v61  ;;  %v2564_v62 = vmul.f32 %v5341_v35, %v2544_v32 }
 0x303   : > { %v2470_v58 = vsub.f32 1.5, %v2469_v63  ;;  %v2347_v9 = vmul.f32 %v2307_v6, %v4506_v14  ;;  %v5371_v63 = vld [vmem:[%s6408_s11] ss:$0 sm:$0xff] }
 0x304   : > { %v5297_v10 = vpop.eup %4181  ;;  %v5304_v13 = vadd.f32 1e-06, %v2356_v5  ;;  %v5307_v15 = vsub.f32 %v5203_v44, %v2255_v7  ;;  %v2390_v26 = vsub.f32 1.5, %v2389_v52 }
 0x305   : > { %v5309_v59 = vpop.eup %4183  ;;  %v2471_v18 = vmul.f32 %v5274_v45, %v2470_v58  ;;  %v2487_v21 = vmul.f32 %v5297_v10, %v5276_v47  ;;  %v5314_v22 = vadd.f32 1e-06, %v2347_v9  ;;  %vm2493_vm11 = vweird.f32 %v5297_v10 }
 0x306   : > { %v5319_v25 = vpop.eup %4185  ;;  %v2477_v44 = vmul.f32 %v5309_v59, %v5283_v60  ;;  %4187 = vrsqrt.f32 %v5304_v13  ;;  %v2287_v31 = vmul.f32 %v5307_v15, %v5307_v15  ;;  %v2391_v43 = vmul.f32 %v5280_v51, %v2390_v26  ;;  %vm5430_vm13 = vmor %vm2492_vm4, %vm2493_vm11 }
 0x307   : > { %v2377_v27 = vmul.f32 %v5319_v25, %v5278_v50  ;;  %4189 = vrsqrt.f32 %v5314_v22  ;;  %v2488_v36 = vmul.f32 %v5297_v10, %v2487_v21  ;;  %v2475_v12 = vsel %vm5329_vm2, %v5274_v45, %v2471_v18 }
 0x308   : > { %v2478_v29 = vmul.f32 %v5309_v59, %v2477_v44  ;;  %v2317_v41 = vsel %vm628_vm1, %v2287_v31, 0.0  ;;  %v2545_v61 = vmul.f32 %v2475_v12, %v5163_v16  ;;  %vm2383_vm7 = vweird.f32 %v5319_v25 }
 0x309   : > { %v2378_v37 = vmul.f32 %v5319_v25, %v2377_v27  ;;  %v2313_v39 = vpop.xlane.xlu0 %2312  ;;  %v2304_v40 = vpop.xlane.xlu1 %2303  ;;  %2318 = vadd.xlane.f32.xlu1 %v2317_v41  ;;  %v2489_v33 = vmul.f32 0.5, %v2488_v36  ;;  %vm2483_vm8 = vweird.f32 %v5309_v59  ;;  %v2395_v9 = vsel %vm5359_vm5, %v5280_v51, %v2391_v43  ;;  %vm2384_vm10 = vmor %vm2382_vm9, %vm2383_vm7 }
 0x30a   : > { %v2349_v2 = vmul.f32 %v2313_v39, %v4506_v14  ;;  %v2310_v3 = vpop.xlane.xlu2 %2309  ;;  %v2346_v42 = vmul.f32 %v2304_v40, %v4506_v14  ;;  %v2479_v55 = vmul.f32 0.5, %v2478_v29  ;;  %v2565_v50 = vmul.f32 %v5341_v35, %v2545_v61  ;;  %vm5412_vm12 = vmor %vm2482_vm6, %vm2483_vm8 }
 0x30b   : > { %v2379_v57 = vmul.f32 0.5, %v2378_v37  ;;  %v2348_v46 = vmul.f32 %v2310_v3, %v4506_v14  ;;  %v2584_v18 = vadd.f32 %v5371_v63, %v2564_v62  ;;  %v2490_v21 = vsub.f32 1.5, %v2489_v33 }
 0x30c   : > { %v5364_v54 = vadd.f32 1e-06, %v2349_v2  ;;  %v5373_v0 = vpop.eup %4187  ;;  %v5376_v5 = vadd.f32 1e-06, %v2346_v42  ;;  %v2480_v7 = vsub.f32 1.5, %v2479_v55  ;;  %v2585_v51 = vadd.f32 %v5371_v63, %v2565_v50 }
 0x30d   : > { %v2380_v4 = vsub.f32 1.5, %v2379_v57  ;;  %v5378_v6 = vpop.eup %4189  ;;  %v5383_v16 = vadd.f32 1e-06, %v2348_v46  ;;  %v2497_v11 = vmul.f32 %v5373_v0, %v5304_v13  ;;  %v2537_v31 = vmul.f32 %v2395_v9, %v5165_v17 }
 0x30e   : > { %4191 = vrsqrt.f32 %v5364_v54  ;;  %v2407_v58 = vmul.f32 %v5378_v6, %v5314_v22  ;;  %v2481_v32 = vmul.f32 %v5309_v59, %v2480_v7  ;;  %v2596_v17 = vpack.c.bf16 %v2585_v51, %v2584_v18 }
 0x30f   : > { %v2381_v52 = vmul.f32 %v5319_v25, %v2380_v4  ;;  %4193 = vrsqrt.f32 %v5383_v16  ;;  %v2491_v2 = vmul.f32 %v5297_v10, %v2490_v21  ;;  %v2557_v42 = vmul.f32 %v5341_v35, %v2537_v31 }
 0x310   : > { %v2408_v24 = vmul.f32 %v5378_v6, %v2407_v58  ;;  %4195 = vrsqrt.f32 %v5376_v5  ;;  %vm2412_vm14 = vweird.f32 %v5314_v22  ;;  %3916 = vmatmul.msk.bf16.vlgmr.msra.gmra.mxu2 %vm628_vm1, %v2596_v17  ;;  %vm2413_vm15 = vweird.f32 %v5378_v6 }
 0x311   : > { %v2337_v44 = vpop.xlane.xlu1 %2336  ;;  %v2385_v26 = vsel %vm2384_vm10, %v5319_v25, %v2381_v52  ;;  %v2485_v45 = vsel %vm5412_vm12, %v5309_v59, %v2481_v32  ;;  %v2577_v7 = vadd.f32 %v5371_v63, %v2557_v42  ;;  %v2495_v58 = vsel %vm5430_vm13, %v5297_v10, %v2491_v2  ;;  %vm5456_vm0 = vmor %vm2412_vm14, %vm2413_vm15 }
 0x312   : > { %v2343_v27 = vpop.xlane.xlu2 %2342  ;;  %v2357_v28 = vmul.f32 %v2337_v44, %v4506_v14  ;;  %v2536_v29 = vmul.f32 %v2385_v26, %v5169_v19  ;;  %v2409_v36 = vmul.f32 0.5, %v2408_v24  ;;  %v2498_v19 = vmul.f32 %v5373_v0, %v2497_v11 }
 0x313   : > { %v2359_v37 = vmul.f32 %v2343_v27, %v4506_v14  ;;  %v2546_v50 = vmul.f32 %v2485_v45, %v5178_v23  ;;  %v2547_v18 = vmul.f32 %v2495_v58, %v5171_v20  ;;  %vm2402_vm2 = vweird.f32 %v5376_v5 }
 0x314   : > { %v5406_v39 = vpop.eup %4191  ;;  %v5417_v40 = vadd.f32 1e-06, %v2357_v28  ;;  %v2556_v12 = vmul.f32 %v5341_v35, %v2536_v29  ;;  %v2410_v3 = vsub.f32 1.5, %v2409_v36  ;;  %v2499_v61 = vmul.f32 0.5, %v2498_v19 }
 0x315   : > { %v2427_v41 = vmul.f32 %v5406_v39, %v5364_v54  ;;  %v5424_v60 = vpop.eup %4193  ;;  %v5436_v55 = vadd.f32 1e-06, %v2359_v37  ;;  %v2566_v26 = vmul.f32 %v5341_v35, %v2546_v50  ;;  %v2567_v51 = vmul.f32 %v5341_v35, %v2547_v18 }
 0x316   : > { %4197 = vrsqrt.f32 %v5417_v40  ;;  %v4196_v57 = vpop.eup %4195  ;;  %v2417_v46 = vmul.f32 %v5424_v60, %v5383_v16  ;;  %v2576_v47 = vadd.f32 %v5371_v63, %v2556_v12  ;;  %v2411_v62 = vmul.f32 %v5378_v6, %v2410_v3 }
 0x317   : > { %v2397_v33 = vmul.f32 %v4196_v57, %v5376_v5  ;;  %v2428_v4 = vmul.f32 %v5406_v39, %v2427_v41  ;;  %4199 = vrsqrt.f32 %v5436_v55  ;;  %vm2403_vm3 = vweird.f32 %v4196_v57 }
 0x318   : > { %v2418_v21 = vmul.f32 %v5424_v60, %v2417_v46  ;;  %v2592_v24 = vpack.c.bf16 %v2577_v7, %v2576_v47  ;;  %v2500_v27 = vsub.f32 1.5, %v2499_v61  ;;  %v2415_v20 = vsel %vm5456_vm0, %v5378_v6, %v2411_v62  ;;  %vm5482_vm6 = vmor %vm2402_vm2, %vm2403_vm3 }
 0x319   : > { %v2340_v52 = vpop.xlane.xlu1 %2339  ;;  %v2398_v9 = vmul.f32 %v4196_v57, %v2397_v33  ;;  %v2429_v23 = vmul.f32 0.5, %v2428_v4  ;;  %vm2502_vm4 = vweird.f32 %v5304_v13  ;;  %vm2503_vm5 = vweird.f32 %v5373_v0 }
 0x31a   : > { %v2358_v11 = vmul.f32 %v2340_v52, %v4506_v14  ;;  %3912 = vmatmul.msk.bf16.vlgmr.msra.gmra.mxu0 %vm628_vm1, %v2592_v24  ;;  %v2419_v32 = vmul.f32 0.5, %v2418_v21  ;;  %v2586_v25 = vadd.f32 %v5371_v63, %v2566_v26  ;;  %v2587_v19 = vadd.f32 %v5371_v63, %v2567_v51  ;;  %vm5491_vm9 = vmor %vm2502_vm4, %vm2503_vm5 }
 0x31b   : > { %v2399_v44 = vmul.f32 0.5, %v2398_v9  ;;  %v2539_v17 = vmul.f32 %v2415_v20, %v5196_v38  ;;  %v2501_v13 = vmul.f32 %v5373_v0, %v2500_v27  ;;  %vm2512_vm7 = vweird.f32 %v5417_v40 }
 0x31c   : > { %v4198_v10 = vpop.eup %4197  ;;  %v5465_v22 = vadd.f32 1e-06, %v2358_v11  ;;  %v2430_v2 = vsub.f32 1.5, %v2429_v23  ;;  %v2420_v41 = vsub.f32 1.5, %v2419_v32  ;;  %vm2432_vm10 = vweird.f32 %v5364_v54 }
 0x31d   : > { %v2507_v28 = vmul.f32 %v4198_v10, %v5417_v40  ;;  %v2400_v29 = vsub.f32 1.5, %v2399_v44  ;;  %v5475_v31 = vpop.eup %4199  ;;  %vm2513_vm8 = vweird.f32 %v4198_v10  ;;  %v2597_v47 = vpack.c.bf16 %v2587_v19, %v2586_v25 }
 0x31e   : > { %4201 = vrsqrt.f32 %v5465_v22  ;;  %v2527_v42 = vmul.f32 %v5475_v31, %v5436_v55  ;;  %vm5501_vm11 = vmor %vm2512_vm7, %vm2513_vm8  ;;  %v2559_v45 = vmul.f32 %v5341_v35, %v2539_v17  ;;  %vm2433_vm12 = vweird.f32 %v5406_v39 }
 0x31f   : > { %v2508_v37 = vmul.f32 %v4198_v10, %v2507_v28  ;;  %v2401_v6 = vmul.f32 %v4196_v57, %v2400_v29  ;;  %v2505_v62 = vsel %vm5491_vm9, %v5373_v0, %v2501_v13  ;;  %vm2422_vm13 = vweird.f32 %v5383_v16  ;;  %vm5522_vm15 = vmor %vm2432_vm10, %vm2433_vm12 }
 0x320   : > { %vm2423_vm14 = vweird.f32 %v5424_v60  ;;  %3917 = vmatmul.msk.bf16.gmra.mxu2 %vm628_vm1, %v2597_v47  ;;  %v2421_v4 = vmul.f32 %v5424_v60, %v2420_v41  ;;  %v2528_v7 = vmul.f32 %v5475_v31, %v2527_v42  ;;  %v2579_v59 = vadd.f32 %v5371_v63, %v2559_v45 }
 0x321   : > { %v2509_v12 = vmul.f32 0.5, %v2508_v37  ;;  %v2405_v3 = vsel %vm5482_vm6, %v4196_v57, %v2401_v6  ;;  %v2548_v9 = vmul.f32 %v2505_v62, %v5190_v34  ;;  %vm2424_vm0 = vmor %vm2422_vm13, %vm2423_vm14  ;;  %vm2522_vm2 = vweird.f32 %v5465_v22 }
 0x322   : > { %v2538_v38 = vmul.f32 %v2405_v3, %v5209_v48  ;;  %v2431_v48 = vmul.f32 %v5406_v39, %v2430_v2  ;;  %v2529_v24 = vmul.f32 0.5, %v2528_v7  ;;  %vm2532_vm4 = vweird.f32 %v5436_v55 }
 0x323   : > { %v2510_v43 = vsub.f32 1.5, %v2509_v12  ;;  %v2568_v54 = vmul.f32 %v5341_v35, %v2548_v9  ;;  %vm2533_vm5 = vweird.f32 %v5475_v31 }
 0x324   : > { %v4202_v46 = vpop.eup %4201  ;;  %v2558_v33 = vmul.f32 %v5341_v35, %v2538_v38  ;;  %v2435_v44 = vsel %vm5522_vm15, %v5406_v39, %v2431_v48  ;;  %vm2534_vm7 = vmor %vm2532_vm4, %vm2533_vm5 }
 0x325   : > { %v2511_v57 = vmul.f32 %v4198_v10, %v2510_v43  ;;  %v2517_v61 = vmul.f32 %v4202_v46, %v5465_v22  ;;  %vm2523_vm3 = vweird.f32 %v4202_v46  ;;  %v2541_v27 = vmul.f32 %v2435_v44, %v5212_v49 }
 0x326   : > { %v2578_v16 = vadd.f32 %v5371_v63, %v2558_v33  ;;  %v2588_v28 = vadd.f32 %v5371_v63, %v2568_v54  ;;  %vm2524_vm6 = vmor %vm2522_vm2, %vm2523_vm3 }
 0x327   : > { %v2518_v52 = vmul.f32 %v4202_v46, %v2517_v61  ;;  %v2515_v58 = vsel %vm5501_vm11, %v4198_v10, %v2511_v57  ;;  %v2425_v10 = vsel %vm2424_vm0, %v5424_v60, %v2421_v4  ;;  %v2561_v23 = vmul.f32 %v5341_v35, %v2541_v27 }
 0x328   : > { %v2549_v11 = vmul.f32 %v2515_v58, %v5230_v53  ;;  %v2593_v18 = vpack.c.bf16 %v2579_v59, %v2578_v16  ;;  %v2530_v53 = vsub.f32 1.5, %v2529_v24  ;;  %v2540_v51 = vmul.f32 %v2425_v10, %v5219_v56 }
 0x329   : > { %v2519_v50 = vmul.f32 0.5, %v2518_v52  ;;  %v2581_v55 = vadd.f32 %v5371_v63, %v2561_v23  ;;  %v5567_v52 = vld [vmem:[%s6410_s13] ss:$0 sm:$0xff] }
 0x32a   : > { %v2569_v21 = vmul.f32 %v5341_v35, %v2549_v11  ;;  %3913 = vmatmul.msk.bf16.gmra.mxu0 %vm628_vm1, %v2593_v18  ;;  %v2531_v20 = vmul.f32 %v5475_v31, %v2530_v53  ;;  %v2560_v22 = vmul.f32 %v5341_v35, %v2540_v51 }
 0x32b   : > { %v2520_v26 = vsub.f32 1.5, %v2519_v50 }
 0x32c   : > { %v2589_v34 = vadd.f32 %v5371_v63, %v2569_v21  ;;  %v2535_v49 = vsel %vm2534_vm7, %v5475_v31, %v2531_v20  ;;  %v2580_v56 = vadd.f32 %v5371_v63, %v2560_v22 }
 0x32d   : > { %v2521_v39 = vmul.f32 %v4202_v46, %v2520_v26  ;;  %v2551_v36 = vmul.f32 %v2535_v49, %v5235_v1 }
 0x32e   : > { %v2598_v60 = vpack.c.bf16 %v2589_v34, %v2588_v28  ;;  %v2594_v37 = vpack.c.bf16 %v2581_v55, %v2580_v56 }
 0x32f   : > { %v2525_v29 = vsel %vm2524_vm6, %v4202_v46, %v2521_v39  ;;  %v2571_v25 = vmul.f32 %v5341_v35, %v2551_v36 }
 0x330   : > { %3918 = vmatmul.msk.bf16.gmra.mxu2 %vm628_vm1, %v2598_v60  ;;  %v2550_v32 = vmul.f32 %v2525_v29, %v5244_v8 }
 0x331   : > { %v2591_v17 = vadd.f32 %v5371_v63, %v2571_v25 }
 0x332   : > { %v2570_v6 = vmul.f32 %v5341_v35, %v2550_v32 }
 0x334   : > { %v2590_v19 = vadd.f32 %v5371_v63, %v2570_v6 }
 0x336   : > { %v2599_v31 = vpack.c.bf16 %v2591_v17, %v2590_v19 }
 0x33a   : > { %3914 = vmatmul.msk.bf16.gmra.mxu0 %vm628_vm1, %v2594_v37 }
 0x340   : > { %3919 = vmatmul.msk.bf16.gmra.mxu2 %vm628_vm1, %v2599_v31 }
 0x36c   : > { %v2316_v13 = vpop.xlane.xlu0 %2315 }
 0x36d   : > { %v2350_v12 = vmul.f32 %v2316_v13, %v4506_v14 }
 0x36f   : > { %v2366_v8 = vadd.f32 1e-06, %v2350_v12 }
 0x371   : > { %4203 = vrsqrt.f32 %v2366_v8  ;;  %vm2442_vm8 = vweird.f32 %v2366_v8 }
 0x377   : > { %v4204_v1 = vpop.eup %4203 }
 0x378   : > { %v2437_v5 = vmul.f32 %v4204_v1, %v2366_v8  ;;  %vm2443_vm9 = vweird.f32 %v4204_v1 }
 0x379   : > { %vm2444_vm10 = vmor %vm2442_vm8, %vm2443_vm9 }
 0x37a   : > { %v2438_v2 = vmul.f32 %v4204_v1, %v2437_v5 }
 0x37c   : > { %v2319_v3 = vpop.xlane.xlu1 %2318  ;;  %v2439_v43 = vmul.f32 0.5, %v2438_v2 }
 0x37d   : > { %v2351_v41 = vmul.f32 %v2319_v3, %v4506_v14 }
 0x37e   : > { %v2440_v38 = vsub.f32 1.5, %v2439_v43 }
 0x37f   : > { %v2367_v42 = vadd.f32 1e-06, %v2351_v41 }
 0x380   : > { %v2441_v40 = vmul.f32 %v4204_v1, %v2440_v38 }
 0x381   : > { %4205 = vrsqrt.f32 %v2367_v42  ;;  %vm2452_vm12 = vweird.f32 %v2367_v42 }
 0x382   : > { %v2445_v57 = vsel %vm2444_vm10, %v4204_v1, %v2441_v40 }
 0x383   : > { %v2542_v48 = vmul.f32 %v2445_v57, %v5261_v30 }
 0x385   : > { %v2562_v7 = vmul.f32 %v5341_v35, %v2542_v48 }
 0x387   : > { %v4206_v46 = vpop.eup %4205  ;;  %v2582_v16 = vadd.f32 %v5371_v63, %v2562_v7 }
 0x388   : > { %v2447_v47 = vmul.f32 %v4206_v46, %v2367_v42  ;;  %vm2453_vm11 = vweird.f32 %v4206_v46 }
 0x389   : > { %vm2454_vm13 = vmor %vm2452_vm12, %vm2453_vm11 }
 0x38a   : > { %v2448_v45 = vmul.f32 %v4206_v46, %v2447_v47 }
 0x38c   : > { %v2449_v61 = vmul.f32 0.5, %v2448_v45 }
 0x38e   : > { %v2450_v62 = vsub.f32 1.5, %v2449_v61 }
 0x390   : > { %v2451_v33 = vmul.f32 %v4206_v46, %v2450_v62 }
 0x392   : > { %v2455_v14 = vsel %vm2454_vm13, %v4206_v46, %v2451_v33 }
 0x393   : > { %v2543_v4 = vmul.f32 %v2455_v14, %v5307_v15  ;;  %v2662_v0 = vpop.f32.mrf.mxu2 }
 0x394   : > { %v5573_v59 = vadd.f32 %v5567_v52, %v2662_v0 }
 0x395   : > { %v2563_v58 = vmul.f32 %v5341_v35, %v2543_v4 }
 0x396   : > { %v5579_v50 = vmul.f32 0.70710677, %v5573_v59 }
 0x397   : > { %v2583_v30 = vadd.f32 %v5371_v63, %v2563_v58  ;;  %v2642_v9 = vpop.f32.mrf.mxu0 }
 0x398   : > { %v5576_v15 = vadd.f32 %v5567_v52, %v2642_v9  ;;  %v3034_v35 = vmul.f32 %v5579_v50, %v5579_v50 }
 0x399   : > { %v2595_v11 = vpack.c.bf16 %v2583_v30, %v2582_v16 }
 0x39a   : > { %v5582_v18 = vmul.f32 0.70710677, %v5576_v15  ;;  %v5589_v21 = vmin.f32 %v3034_v35, 16.0 }
 0x39b   : > { %3915 = vmatmul.msk.bf16.gmra.mxu0 %vm628_vm1, %v2595_v11  ;;  %v2664_v54 = vpop.f32.mrf.mxu2 }
 0x39c   : > { %v2714_v63 = vmul.f32 %v5582_v18, %v5582_v18  ;;  %v3036_v10 = vmul.f32 2.1237322e-06, %v5589_v21  ;;  %v3047_v44 = vmul.f32 3.8918573e-05, %v5589_v21  ;;  %v5596_v26 = vadd.f32 %v5567_v52, %v2664_v54 }
 0x39e   : > { %v5591_v24 = vmin.f32 %v2714_v63, 16.0  ;;  %v3037_v28 = vadd.f32 0.00028619796, %v3036_v10  ;;  %v3048_v39 = vadd.f32 0.001143296, %v3047_v44 }
 0x39f   : > { %v2644_v34 = vpop.f32.mrf.mxu0  ;;  %v5604_v20 = vmul.f32 0.70710677, %v5596_v26 }
 0x3a0   : > { %v2716_v53 = vmul.f32 2.1237322e-06, %v5591_v24  ;;  %v2727_v51 = vmul.f32 3.8918573e-05, %v5591_v24  ;;  %v5601_v27 = vadd.f32 %v5567_v52, %v2644_v34  ;;  %v3049_v22 = vmul.f32 %v3048_v39, %v5589_v21 }
 0x3a1   : > { %v3038_v49 = vmul.f32 %v3037_v28, %v5589_v21  ;;  %v3074_v55 = vmul.f32 %v5604_v20, %v5604_v20 }
 0x3a2   : > { %v2728_v60 = vadd.f32 0.001143296, %v2727_v51  ;;  %v2717_v23 = vadd.f32 0.00028619796, %v2716_v53  ;;  %v5608_v29 = vmul.f32 0.70710677, %v5601_v27 }
 0x3a3   : > { %v3050_v32 = vadd.f32 0.014752088, %v3049_v22  ;;  %v5616_v6 = vmin.f32 %v3074_v55, 16.0  ;;  %v3039_v31 = vadd.f32 0.0036580483, %v3038_v49  ;;  %v2667_v16 = vpop.f32.mrf.mxu2 }
 0x3a4   : > { %v2729_v56 = vmul.f32 %v2728_v60, %v5591_v24  ;;  %v2754_v36 = vmul.f32 %v5608_v29, %v5608_v29  ;;  %v2718_v19 = vmul.f32 %v2717_v23, %v5591_v24  ;;  %v5644_v44 = vadd.f32 %v5567_v52, %v2667_v16 }
 0x3a5   : > { %v3051_v25 = vmul.f32 %v3050_v32, %v5589_v21  ;;  %v3076_v12 = vmul.f32 2.1237322e-06, %v5616_v6  ;;  %v3087_v8 = vmul.f32 3.8918573e-05, %v5616_v6  ;;  %v3040_v38 = vmul.f32 %v3039_v31, %v5589_v21 }
 0x3a6   : > { %v2730_v37 = vadd.f32 0.014752088, %v2729_v56  ;;  %v5620_v17 = vmin.f32 %v2754_v36, 16.0  ;;  %v2719_v42 = vadd.f32 0.0036580483, %v2718_v19 }
 0x3a7   : > { %v3052_v1 = vadd.f32 0.112945676, %v3051_v25  ;;  %v3077_v2 = vadd.f32 0.00028619796, %v3076_v12  ;;  %v3088_v43 = vadd.f32 0.001143296, %v3087_v8  ;;  %v2647_v28 = vpop.f32.mrf.mxu0 }
 0x3a8   : > { %v2731_v13 = vmul.f32 %v2730_v37, %v5591_v24  ;;  %v2756_v3 = vmul.f32 2.1237322e-06, %v5620_v17  ;;  %v2767_v40 = vmul.f32 3.8918573e-05, %v5620_v17  ;;  %v2720_v33 = vmul.f32 %v2719_v42, %v5591_v24 }
 0x3a9   : > { %v3053_v41 = vmul.f32 %v3052_v1, %v5589_v21  ;;  %v3078_v45 = vmul.f32 %v3077_v2, %v5616_v6  ;;  %v3089_v57 = vmul.f32 %v3088_v43, %v5616_v6  ;;  %v3041_v4 = vadd.f32 0.05243302, %v3040_v38 }
 0x3aa   : > { %v2732_v5 = vadd.f32 0.112945676, %v2731_v13  ;;  %v2757_v62 = vadd.f32 0.00028619796, %v2756_v3  ;;  %v2768_v58 = vadd.f32 0.001143296, %v2767_v40  ;;  %v5656_v32 = vadd.f32 %v5567_v52, %v2647_v28 }
 0x3ab   : > { %v3054_v47 = vadd.f32 0.4994258, %v3053_v41  ;;  %v3090_v14 = vadd.f32 0.014752088, %v3089_v57  ;;  %v3079_v0 = vadd.f32 0.0036580483, %v3078_v45  ;;  %v3042_v10 = vmul.f32 %v3041_v4, %v5589_v21 }
 0x3ac   : > { %v2733_v46 = vmul.f32 %v2732_v5, %v5591_v24  ;;  %v2758_v11 = vmul.f32 %v2757_v62, %v5620_v17  ;;  %v2721_v35 = vadd.f32 0.05243302, %v2720_v33  ;;  %v2769_v54 = vmul.f32 %v2768_v58, %v5620_v17 }
 0x3ad   : > { %v3055_v48 = vmul.f32 %v3054_v47, %v5589_v21  ;;  %v3091_v9 = vmul.f32 %v3090_v14, %v5616_v6  ;;  %v3080_v34 = vmul.f32 %v3079_v0, %v5616_v6  ;;  %v3043_v22 = vadd.f32 0.18741608, %v3042_v10  ;;  %v2669_v0 = vpop.f32.mrf.mxu2 }
 0x3ae   : > { %v2734_v61 = vadd.f32 0.4994258, %v2733_v46  ;;  %v2759_v51 = vadd.f32 0.0036580483, %v2758_v11  ;;  %v2722_v39 = vmul.f32 %v2721_v35, %v5591_v24  ;;  %v2770_v60 = vadd.f32 0.014752088, %v2769_v54 }
 0x3af   : > { %v5635_v30 = vadd.f32 1.0, %v3055_v48  ;;  %v3092_v53 = vadd.f32 0.112945676, %v3091_v9  ;;  %v5652_v49 = vmul.f32 0.70710677, %v5644_v44  ;;  %v3044_v13 = vmul.f32 %v3043_v22, %v5589_v21 }
 0x3b0   : > { %v2735_v7 = vmul.f32 %v2734_v61, %v5591_v24  ;;  %v3081_v56 = vadd.f32 0.05243302, %v3080_v34  ;;  %v2771_v55 = vmul.f32 %v2770_v60, %v5620_v17  ;;  %v2760_v37 = vmul.f32 %v2759_v51, %v5620_v17 }
 0x3b1   : > { %4207 = vrcp.f32 %v5635_v30  ;;  %v3093_v23 = vmul.f32 %v3092_v53, %v5616_v6  ;;  %v2723_v25 = vadd.f32 0.18741608, %v2722_v39  ;;  %v3114_v8 = vmul.f32 %v5652_v49, %v5652_v49 }
 0x3b2   : > { %v5639_v63 = vadd.f32 1.0, %v2735_v7  ;;  %v2772_v19 = vadd.f32 0.112945676, %v2771_v55  ;;  %v3082_v5 = vmul.f32 %v3081_v56, %v5616_v6  ;;  %v5670_v3 = vmul.f32 0.70710677, %v5656_v32 }
 0x3b3   : > { %v3094_v36 = vadd.f32 0.4994258, %v3093_v23  ;;  %v2761_v42 = vadd.f32 0.05243302, %v2760_v37  ;;  %v5674_v43 = vmin.f32 %v3114_v8, 16.0  ;;  %v5677_v21 = vmul.f32 0.5, %v5573_v59 }
 0x3b4   : > { %4209 = vrcp.f32 %v5639_v63  ;;  %v2773_v2 = vmul.f32 %v2772_v19, %v5620_v17  ;;  %v2724_v46 = vmul.f32 %v2723_v25, %v5591_v24  ;;  %v3045_v47 = vadd.f32 1.1283791, %v3044_v13 }
 0x3b5   : > { %v3095_v12 = vmul.f32 %v3094_v36, %v5616_v6  ;;  %v5683_v45 = vmul.f32 0.5, %v5576_v15  ;;  %v5689_v61 = vmul.f32 0.5, %v5596_v26  ;;  %v3083_v59 = vadd.f32 0.18741608, %v3082_v5 }
 0x3b6   : > { %v2774_v40 = vadd.f32 0.4994258, %v2773_v2  ;;  %v2794_v48 = vmul.f32 %v5670_v3, %v5670_v3  ;;  %v5695_v24 = vmul.f32 0.5, %v5601_v27  ;;  %v2762_v15 = vmul.f32 %v2761_v42, %v5620_v17 }
 0x3b7   : > { %v5659_v31 = vpop.eup %4207  ;;  %v5672_v41 = vadd.f32 1.0, %v3095_v12  ;;  %v3116_v33 = vmul.f32 2.1237322e-06, %v5674_v43  ;;  %v3127_v14 = vmul.f32 3.8918573e-05, %v5674_v43  ;;  %v5704_v16 = vmul.f32 %v3045_v47, %v5579_v50 }
 0x3b8   : > { %v3058_v38 = vmul.f32 %v5659_v31, %v5635_v30  ;;  %v2775_v62 = vmul.f32 %v2774_v40, %v5620_v17  ;;  %v3066_v7 = vand.u32 2147483647, %v5635_v30  ;;  %v2725_v26 = vadd.f32 1.1283791, %v2724_v46 }
 0x3b9   : > { %4211 = vrcp.f32 %v5672_v41  ;;  %v3117_v11 = vadd.f32 0.00028619796, %v3116_v33  ;;  %v3128_v27 = vadd.f32 0.001143296, %v3127_v14  ;;  %v3068_v35 = vand.u32 2147483648, %v5635_v30 }
 0x3ba   : > { %v5665_v1 = vpop.eup %4209  ;;  %v3059_v4 = vsub.f32 1.0, %v3058_v38  ;;  %v5701_v58 = vadd.f32 1.0, %v2775_v62  ;;  %v2746_v54 = vand.u32 2147483647, %v5639_v63  ;;  %v3084_v10 = vmul.f32 %v3083_v59, %v5616_v6 }
 0x3bb   : > { %v2738_v57 = vmul.f32 %v5665_v1, %v5639_v63  ;;  %v5709_v34 = vmin.f32 %v2794_v48, 16.0  ;;  %v2763_v51 = vadd.f32 0.18741608, %v2762_v15  ;;  %v3129_v28 = vmul.f32 %v3128_v27, %v5674_v43 }
 0x3bc   : > { %4213 = vrcp.f32 %v5701_v58  ;;  %v2670_v50 = vadd.f32 %v5567_v52, %v2669_v0  ;;  %v3060_v39 = vmul.f32 %v5659_v31, %v3059_v4  ;;  %vm3062_vm14 = vweird.f32 %v5635_v30  ;;  %v2672_v30 = vpop.f32.mrf.mxu2 }
 0x3bd   : > { %v2739_v9 = vsub.f32 1.0, %v2738_v57  ;;  %v5719_v60 = vmul.f32 %v2725_v26, %v5582_v18  ;;  %vm2742_vm15 = vweird.f32 %v5639_v63  ;;  %v2748_v22 = vand.u32 2147483648, %v5639_v63 }
 0x3be   : > { %v3118_v23 = vmul.f32 %v3117_v11, %v5674_v43  ;;  %v3130_v56 = vadd.f32 0.014752088, %v3129_v28  ;;  %vm5725_vm0 = vcmp.eq.f32.partialorder %v3066_v7, 8.507059e+37  ;;  %v3069_v36 = vor.u32 1.1754944e-38, %v3068_v35 }
 0x3bf   : > { %v5711_v53 = vpop.eup %4211  ;;  %v2740_v6 = vmul.f32 %v5665_v1, %v2739_v9  ;;  %v5732_v18 = vmul.f32 0.5, %v5644_v44  ;;  %v2807_v25 = vmul.f32 3.8918573e-05, %v5709_v34  ;;  %vm5735_vm2 = vcmp.eq.f32.partialorder %v2746_v54, 8.507059e+37 }
 0x3c0   : > { %v3098_v37 = vmul.f32 %v5711_v53, %v5672_v41  ;;  %v3085_v13 = vadd.f32 1.1283791, %v3084_v10  ;;  %v2764_v12 = vmul.f32 %v2763_v51, %v5620_v17  ;;  %v3131_v8 = vmul.f32 %v3130_v56, %v5674_v43 }
 0x3c1   : > { %v5741_v5 = vmul.f32 0.70710677, %v2670_v50  ;;  %v3061_v2 = vadd.f32 %v5659_v31, %v3060_v39  ;;  %vm3063_vm3 = vweird.f32 %v5659_v31  ;;  %vm2743_vm4 = vweird.f32 %v5665_v1  ;;  %v2649_v39 = vpop.f32.mrf.mxu0 }
 0x3c2   : > { %v2808_v44 = vadd.f32 0.001143296, %v2807_v25  ;;  %v5746_v42 = vpop.eup %4213  ;;  %v2741_v38 = vadd.f32 %v5665_v1, %v2740_v6  ;;  %v3119_v46 = vadd.f32 0.0036580483, %v3118_v23  ;;  %v3132_v40 = vadd.f32 0.112945676, %v3131_v8  ;;  %vm5755_vm5 = vmor %vm3062_vm14, %vm3063_vm3 }
 0x3c3   : > { %v2796_v47 = vmul.f32 2.1237322e-06, %v5709_v34  ;;  %v2749_v17 = vor.u32 1.1754944e-38, %v2748_v22  ;;  %v3099_v57 = vsub.f32 1.0, %v3098_v37  ;;  %v3154_v62 = vmul.f32 %v5741_v5, %v5741_v5  ;;  %vm5773_vm6 = vmor %vm2742_vm15, %vm2743_vm4 }
 0x3c4   : > { %v2809_v59 = vmul.f32 %v2808_v44, %v5709_v34  ;;  %v5760_v15 = vmul.f32 %v3085_v13, %v5604_v20  ;;  %v2765_v33 = vadd.f32 1.1283791, %v2764_v12  ;;  %v3133_v14 = vmul.f32 %v3132_v40, %v5674_v43 }
 0x3c5   : > { %v5764_v4 = vmul.f32 0.5, %v5656_v32  ;;  %v3065_v7 = vsel %vm5755_vm5, %v5659_v31, %v3061_v2  ;;  %v2778_v20 = vmul.f32 %v5746_v42, %v5701_v58  ;;  %v5779_v0 = vmin.f32 %v3154_v62, 16.0 }
 0x3c6   : > { %v2810_v26 = vadd.f32 0.014752088, %v2809_v59  ;;  %v2745_v32 = vsel %vm5773_vm6, %v5665_v1, %v2741_v38  ;;  %v3120_v31 = vmul.f32 %v3119_v46, %v5674_v43  ;;  %v3134_v9 = vadd.f32 0.4994258, %v3133_v14 }
 0x3c7   : > { %v2797_v11 = vadd.f32 0.00028619796, %v2796_v47  ;;  %v3100_v63 = vmul.f32 %v5711_v53, %v3099_v57  ;;  %v5787_v35 = vmul.f32 0.5, %v2670_v50  ;;  %v3156_v54 = vmul.f32 2.1237322e-06, %v5779_v0 }
 0x3c8   : > { %v2811_v27 = vmul.f32 %v2810_v26, %v5709_v34  ;;  %v3070_v10 = vsel %vm5725_vm0, %v3069_v36, %v3065_v7  ;;  %v3106_v51 = vand.u32 2147483647, %v5672_v41  ;;  %v3108_v28 = vand.u32 2147483648, %v5672_v41 }
 0x3c9   : > { %v3135_v1 = vmul.f32 %v3134_v9, %v5674_v43  ;;  %v2750_v6 = vsel %vm5735_vm2, %v2749_v17, %v2745_v32  ;;  %vm3103_vm7 = vweird.f32 %v5711_v53  ;;  %v2779_v22 = vsub.f32 1.0, %v2778_v20 }
 0x3ca   : > { %v2812_v50 = vadd.f32 0.112945676, %v2811_v27  ;;  %v3121_v23 = vadd.f32 0.05243302, %v3120_v31  ;;  %v2798_v55 = vmul.f32 %v2797_v11, %v5709_v34  ;;  %v3167_v36 = vmul.f32 3.8918573e-05, %v5779_v0 }
 0x3cb   : > { %v5798_v56 = vadd.f32 1.0, %v3135_v1  ;;  %v3101_v37 = vadd.f32 %v5711_v53, %v3100_v63  ;;  %v3157_v13 = vadd.f32 0.00028619796, %v3156_v54  ;;  %v5805_v12 = vadd.f32 %v5567_v52, %v2649_v39 }
 0x3cc   : > { %v2813_v25 = vmul.f32 %v2812_v50, %v5709_v34  ;;  %v3071_v19 = vmul.f32 %v3070_v10, %v5704_v16  ;;  %vm3102_vm8 = vweird.f32 %v5672_v41  ;;  %v5810_v8 = vmul.f32 %v2765_v33, %v5608_v29  ;;  %v2652_v10 = vpop.f32.mrf.mxu0 }
 0x3cd   : > { %4215 = vrcp.f32 %v5798_v56  ;;  %v2751_v2 = vmul.f32 %v2750_v6, %v5719_v60  ;;  %vm5814_vm9 = vcmp.eq.f32.partialorder %v3106_v51, 8.507059e+37  ;;  %v3109_v38 = vor.u32 1.1754944e-38, %v3108_v28  ;;  %vm5821_vm10 = vmor %vm3102_vm8, %vm3103_vm7 }
 0x3ce   : > { %v2780_v46 = vmul.f32 %v5746_v42, %v2779_v22  ;;  %v3122_v29 = vmul.f32 %v3121_v23, %v5674_v43  ;;  %v2799_v41 = vadd.f32 0.0036580483, %v2798_v55  ;;  %v2814_v40 = vadd.f32 0.4994258, %v2813_v25 }
 0x3cf   : > { %v3168_v47 = vadd.f32 0.001143296, %v3167_v36  ;;  %v3105_v60 = vsel %vm5821_vm10, %v5711_v53, %v3101_v37  ;;  %vm2782_vm11 = vweird.f32 %v5701_v58  ;;  %v3158_v17 = vmul.f32 %v3157_v13, %v5779_v0 }
 0x3d0   : > { %v5832_v57 = vmul.f32 0.70710677, %v5805_v12  ;;  %v3928_v59 = vclamps-f32 %v3071_v19, 1.0  ;;  %v2786_v62 = vand.u32 2147483647, %v5701_v58  ;;  %v2815_v48 = vmul.f32 %v2814_v40, %v5709_v34 }
 0x3d1   : > { %v3169_v33 = vmul.f32 %v3168_v47, %v5779_v0  ;;  %v2781_v14 = vadd.f32 %v5746_v42, %v2780_v46  ;;  %vm2783_vm12 = vweird.f32 %v5746_v42  ;;  %v2788_v53 = vand.u32 2147483648, %v5701_v58 }
 0x3d2   : > { %v2834_v7 = vmul.f32 %v5832_v57, %v5832_v57  ;;  %v3110_v26 = vsel %vm5814_vm9, %v3109_v38, %v3105_v60  ;;  %v3123_v32 = vadd.f32 0.18741608, %v3122_v29  ;;  %v2800_v31 = vmul.f32 %v2799_v41, %v5709_v34  ;;  %vm5857_vm13 = vmor %vm2782_vm11, %vm2783_vm12 }
 0x3d3   : > { %v5842_v20 = vpop.eup %4215  ;;  %v3170_v9 = vadd.f32 0.014752088, %v3169_v33  ;;  %v5849_v63 = vadd.f32 1.0, %v2815_v48  ;;  %v3159_v27 = vadd.f32 0.0036580483, %v3158_v17  ;;  %v3362_v51 = vadd.f32 1.0, %v3928_v59 }
 0x3d4   : > { %v3138_v11 = vmul.f32 %v5842_v20, %v5798_v56  ;;  %v5851_v54 = vmin.f32 %v2834_v7, 16.0  ;;  %v3920_v28 = vclamps-f32 %v2751_v2, 1.0  ;;  %vm2787_vm14 = vcmp.eq.f32.partialorder %v2786_v62, 8.507059e+37 }
 0x3d5   : > { %v5862_v39 = vadd.f32 %v5567_v52, %v2672_v30  ;;  %v3111_v6 = vmul.f32 %v3110_v26, %v5760_v15  ;;  %v2785_v22 = vsel %vm5857_vm13, %v5746_v42, %v2781_v14  ;;  %v2789_v50 = vor.u32 1.1754944e-38, %v2788_v53 }
 0x3d6   : > { %v3171_v23 = vmul.f32 %v3170_v9, %v5779_v0  ;;  %v3124_v55 = vmul.f32 %v3123_v32, %v5674_v43  ;;  %v3139_v58 = vsub.f32 1.0, %v3138_v11  ;;  %v2847_v36 = vmul.f32 3.8918573e-05, %v5851_v54 }
 0x3d7   : > { %v5872_v37 = vadd.f32 %v5567_v52, %v2652_v10  ;;  %v2801_v25 = vadd.f32 0.05243302, %v2800_v31  ;;  %4217 = vrcp.f32 %v5849_v63  ;;  %v3160_v15 = vmul.f32 %v3159_v27, %v5779_v0 }
 0x3d8   : > { %v3172_v13 = vadd.f32 0.112945676, %v3171_v23  ;;  %v2790_v19 = vsel %vm2787_vm14, %v2789_v50, %v2785_v22  ;;  %v2836_v42 = vmul.f32 2.1237322e-06, %v5851_v54  ;;  %v2848_v2 = vadd.f32 0.001143296, %v2847_v36 }
 0x3d9   : > { %v5878_v44 = vmul.f32 0.70710677, %v5862_v39  ;;  %v5881_v43 = vmul.f32 %v3362_v51, %v5677_v21  ;;  %v5883_v38 = vadd.f32 1.0, %v3920_v28  ;;  %v3929_v46 = vclamps-f32 %v3111_v6, 1.0 }
 0x3da   : > { %v3173_v16 = vmul.f32 %v3172_v13, %v5779_v0  ;;  %v3140_v29 = vmul.f32 %v5842_v20, %v3139_v58  ;;  %v2849_v41 = vmul.f32 %v2848_v2, %v5851_v54  ;;  %v5891_v47 = vmul.f32 0.70710677, %v5872_v37 }
 0x3db   : > { %v3194_v40 = vmul.f32 %v5878_v44, %v5878_v44  ;;  %v2791_v60 = vmul.f32 %v2790_v19, %v5810_v8  ;;  %v3125_v17 = vadd.f32 1.1283791, %v3124_v55  ;;  %v2802_v21 = vmul.f32 %v2801_v25, %v5709_v34  ;;  %v2674_v19 = vpop.f32.mrf.mxu2 }
 0x3dc   : > { %v3161_v59 = vadd.f32 0.05243302, %v3160_v15  ;;  %vm3142_vm15 = vweird.f32 %v5798_v56  ;;  %v3174_v62 = vadd.f32 0.4994258, %v3173_v16  ;;  %v2837_v48 = vadd.f32 0.00028619796, %v2836_v42 }
 0x3dd   : > { %v2850_v33 = vadd.f32 0.014752088, %v2849_v41  ;;  %v5896_v14 = vpop.eup %4217  ;;  %vm3143_vm0 = vweird.f32 %v5842_v20  ;;  %v3146_v53 = vand.u32 2147483647, %v5798_v56  ;;  %v3148_v7 = vand.u32 2147483648, %v5798_v56 }
 0x3de   : > { %v5901_v30 = vmin.f32 %v3194_v40, 16.0  ;;  %v3141_v8 = vadd.f32 %v5842_v20, %v3140_v29  ;;  %v3175_v26 = vmul.f32 %v3174_v62, %v5779_v0  ;;  %v2874_v31 = vmul.f32 %v5891_v47, %v5891_v47  ;;  %vm5922_vm2 = vmor %vm3142_vm15, %vm3143_vm0 }
 0x3df   : > { %v2851_v32 = vmul.f32 %v2850_v33, %v5851_v54  ;;  %v3921_v9 = vclamps-f32 %v2791_v60, 1.0  ;;  %v2803_v11 = vadd.f32 0.18741608, %v2802_v21  ;;  %v3162_v27 = vmul.f32 %v3161_v59, %v5779_v0 }
 0x3e0   : > { %v3196_v10 = vmul.f32 2.1237322e-06, %v5901_v30  ;;  %v2818_v51 = vmul.f32 %v5896_v14, %v5849_v63  ;;  %v5912_v28 = vadd.f32 1.0, %v3175_v26  ;;  %v2838_v1 = vmul.f32 %v2837_v48, %v5851_v54 }
 0x3e1   : > { %v2852_v6 = vadd.f32 0.112945676, %v2851_v32  ;;  %v5915_v22 = vadd.f32 1.0, %v3929_v46  ;;  %v3126_v50 = vmul.f32 %v3125_v17, %v5652_v49  ;;  %v3207_v58 = vmul.f32 3.8918573e-05, %v5901_v30 }
 0x3e2   : > { %v3197_v55 = vadd.f32 0.00028619796, %v3196_v10  ;;  %v3145_v36 = vsel %vm5922_vm2, %v5842_v20, %v3141_v8  ;;  %vm3147_vm3 = vcmp.eq.f32.partialorder %v3146_v53, 8.507059e+37  ;;  %4219 = vrcp.f32 %v5912_v28 }
 0x3e3   : > { %v5931_v25 = vmin.f32 %v2874_v31, 16.0  ;;  %v3149_v49 = vor.u32 1.1754944e-38, %v3148_v7  ;;  %v2804_v15 = vmul.f32 %v2803_v11, %v5709_v34  ;;  %v3163_v56 = vadd.f32 0.18741608, %v3162_v27 }
 0x3e4   : > { %v2853_v13 = vmul.f32 %v2852_v6, %v5851_v54  ;;  %v5935_v42 = vadd.f32 1.0, %v3921_v9  ;;  %v2819_v2 = vsub.f32 1.0, %v2818_v51  ;;  %v2826_v46 = vand.u32 2147483647, %v5849_v63 }
 0x3e5   : > { %v2839_v16 = vadd.f32 0.0036580483, %v2838_v1  ;;  %v3150_v29 = vsel %vm3147_vm3, %v3149_v49, %v3145_v36  ;;  %v3198_v41 = vmul.f32 %v3197_v55, %v5901_v30  ;;  %v3208_v40 = vadd.f32 0.001143296, %v3207_v58  ;;  %v2654_v49 = vpop.f32.mrf.mxu0 }
 0x3e6   : > { %v2854_v20 = vadd.f32 0.4994258, %v2853_v13  ;;  %v2828_v60 = vand.u32 2147483648, %v5849_v63  ;;  %v2876_v17 = vmul.f32 2.1237322e-06, %v5931_v25  ;;  %v5943_v21 = vadd.f32 %v5567_v52, %v2674_v19 }
 0x3e7   : > { %v2887_v34 = vmul.f32 3.8918573e-05, %v5931_v25  ;;  %v5945_v59 = vadd.f32 1.1283791, %v2804_v15  ;;  %v3164_v62 = vmul.f32 %v3163_v56, %v5779_v0  ;;  %v3209_v33 = vmul.f32 %v3208_v40, %v5901_v30 }
 0x3e8   : > { %v2855_v48 = vmul.f32 %v2854_v20, %v5851_v54  ;;  %v5950_v53 = vpop.eup %4219  ;;  %v5952_v7 = vmul.f32 %v3150_v29, %v3126_v50  ;;  %v2820_v8 = vmul.f32 %v5896_v14, %v2819_v2  ;;  %v2840_v26 = vmul.f32 %v2839_v16, %v5851_v54 }
 0x3e9   : > { %v2888_v32 = vadd.f32 0.001143296, %v2887_v34  ;;  %vm2822_vm4 = vweird.f32 %v5849_v63  ;;  %v3178_v31 = vmul.f32 %v5950_v53, %v5912_v28  ;;  %v3199_v9 = vadd.f32 0.0036580483, %v3198_v41 }
 0x3ea   : > { %v2877_v0 = vadd.f32 0.00028619796, %v2876_v17  ;;  %vm5959_vm5 = vcmp.eq.f32.partialorder %v2826_v46, 8.507059e+37  ;;  %v2829_v27 = vor.u32 1.1754944e-38, %v2828_v60  ;;  %v5963_v10 = vadd.f32 1.0, %v2855_v48 }
 0x3eb   : > { %v3210_v51 = vadd.f32 0.014752088, %v3209_v33  ;;  %v5966_v1 = vmul.f32 0.70710677, %v5943_v21  ;;  %vm2823_vm6 = vweird.f32 %v5896_v14  ;;  %v5969_v6 = vadd.f32 1.1283791, %v3164_v62 }
 0x3ec   : > { %v3179_v50 = vsub.f32 1.0, %v3178_v31  ;;  %v2889_v23 = vmul.f32 %v2888_v32, %v5931_v25  ;;  %v3930_v55 = vclamps-f32 %v5952_v7, 1.0  ;;  %v2821_v58 = vadd.f32 %v5896_v14, %v2820_v8  ;;  %vm5987_vm8 = vmor %vm2822_vm4, %vm2823_vm6 }
 0x3ed   : > { %v2841_v36 = vadd.f32 0.05243302, %v2840_v26  ;;  %4221 = vrcp.f32 %v5963_v10  ;;  %v3200_v56 = vmul.f32 %v3199_v9, %v5901_v30  ;;  %v3211_v13 = vmul.f32 %v3210_v51, %v5901_v30 }
 0x3ee   : > { %v3180_v15 = vmul.f32 %v5950_v53, %v3179_v50  ;;  %v2878_v19 = vmul.f32 %v2877_v0, %v5931_v25  ;;  %vm3182_vm7 = vweird.f32 %v5912_v28  ;;  %v3186_v2 = vand.u32 2147483647, %v5912_v28 }
 0x3ef   : > { %v2890_v46 = vadd.f32 0.014752088, %v2889_v23  ;;  %v3234_v16 = vmul.f32 %v5966_v1, %v5966_v1  ;;  %vm3183_vm9 = vweird.f32 %v5950_v53  ;;  %v3212_v41 = vadd.f32 0.112945676, %v3211_v13 }
 0x3f0   : > { %v3181_v20 = vadd.f32 %v5950_v53, %v3180_v15  ;;  %v5994_v40 = vadd.f32 %v5567_v52, %v2654_v49  ;;  %v2825_v60 = vsel %vm5987_vm8, %v5896_v14, %v2821_v58  ;;  %v3188_v17 = vand.u32 2147483648, %v5912_v28  ;;  %vm6013_vm10 = vmor %vm3182_vm7, %vm3183_vm9  ;;  %v3953_v28 = vld [vmem:[%s6411_s14] sm:$0xff] }
 0x3f1   : > { %v2891_v63 = vmul.f32 %v2890_v46, %v5931_v25  ;;  %v6001_v34 = vmin.f32 %v3234_v16, 16.0  ;;  %v2842_v62 = vmul.f32 %v2841_v36, %v5851_v54  ;;  %v3201_v48 = vadd.f32 0.05243302, %v3200_v56  ;;  %3955 = vmatpush.bf16.msra.mxu3 %v3953_v28  ;;  %3438 = vmatpush.bf16.msra.mxu1 %v3953_v28 }
 0x3f2   : > { %v3213_v33 = vmul.f32 %v3212_v41, %v5901_v30  ;;  %v2879_v7 = vadd.f32 0.0036580483, %v2878_v19  ;;  %v6009_v26 = vmul.f32 %v5883_v38, %v5683_v45  ;;  %v2830_v0 = vsel %vm5959_vm5, %v2829_v27, %v2825_v60 }
 0x3f3   : > { %v6005_v8 = vpop.eup %4221  ;;  %v2892_v32 = vadd.f32 0.112945676, %v2891_v63  ;;  %v3236_v31 = vmul.f32 2.1237322e-06, %v6001_v34  ;;  %v3247_v9 = vmul.f32 3.8918573e-05, %v6001_v34  ;;  %v3185_v51 = vsel %vm6013_vm10, %v5950_v53, %v3181_v20  ;;  %v2677_v20 = vpop.f32.mrf.mxu2 }
 0x3f4   : > { %vm6024_vm11 = vcmp.eq.f32.partialorder %v3186_v2, 8.507059e+37  ;;  %v6029_v38 = vmul.f32 0.70710677, %v5994_v40  ;;  %v2858_v50 = vmul.f32 %v6005_v8, %v5963_v10  ;;  %v3214_v11 = vadd.f32 0.4994258, %v3213_v33 }
 0x3f5   : > { %v2893_v27 = vmul.f32 %v2892_v32, %v5931_v25  ;;  %v3237_v23 = vadd.f32 0.00028619796, %v3236_v31  ;;  %v3189_v58 = vor.u32 1.1754944e-38, %v3188_v17  ;;  %v2843_v53 = vadd.f32 0.18741608, %v2842_v62 }
 0x3f6   : > { %v3202_v36 = vmul.f32 %v3201_v48, %v5901_v30  ;;  %v3248_v49 = vadd.f32 0.001143296, %v3247_v9  ;;  %v3215_v15 = vmul.f32 %v3214_v11, %v5901_v30  ;;  %v2880_v56 = vmul.f32 %v2879_v7, %v5931_v25 }
 0x3f7   : > { %v2894_v13 = vadd.f32 0.4994258, %v2893_v27  ;;  %v3238_v19 = vmul.f32 %v3237_v23, %v6001_v34  ;;  %v2806_v2 = vmul.f32 %v5945_v59, %v5670_v3  ;;  %v3190_v46 = vsel %vm6024_vm11, %v3189_v58, %v3185_v51 }
 0x3f8   : > { %v3249_v16 = vmul.f32 %v3248_v49, %v6001_v34  ;;  %v2914_v29 = vmul.f32 %v6029_v38, %v6029_v38  ;;  %v2859_v41 = vsub.f32 1.0, %v2858_v50  ;;  %v6048_v60 = vadd.f32 1.0, %v3215_v15 }
 0x3f9   : > { %v2895_v17 = vmul.f32 %v2894_v13, %v5931_v25  ;;  %v3239_v63 = vadd.f32 0.0036580483, %v3238_v19  ;;  %v3364_v62 = vadd.f32 1.0, %v3930_v55  ;;  %v2831_v48 = vmul.f32 %v2830_v0, %v2806_v2 }
 0x3fa   : > { %v3166_v3 = vmul.f32 %v5969_v6, %v5741_v5  ;;  %v3250_v59 = vadd.f32 0.014752088, %v3249_v16  ;;  %v2844_v33 = vmul.f32 %v2843_v53, %v5851_v54  ;;  %v3203_v7 = vadd.f32 0.18741608, %v3202_v36 }
 0x3fb   : > { %4223 = vrcp.f32 %v6048_v60  ;;  %v2881_v14 = vadd.f32 0.05243302, %v2880_v56  ;;  %v6056_v31 = vmul.f32 0.5, %v5805_v12  ;;  %v6058_v9 = vadd.f32 1.0, %v2895_v17  ;;  %v2679_v15 = vpop.f32.mrf.mxu2 }
 0x3fc   : > { %v3191_v32 = vmul.f32 %v3190_v46, %v3166_v3  ;;  %v6060_v51 = vmin.f32 %v2914_v29, 16.0  ;;  %v6064_v55 = vmul.f32 %v5915_v22, %v5689_v61  ;;  %v2860_v5 = vmul.f32 %v6005_v8, %v2859_v41 }
 0x3fd   : > { %v3240_v54 = vmul.f32 %v3239_v63, %v6001_v34  ;;  %v3251_v6 = vmul.f32 %v3250_v59, %v6001_v34  ;;  %v6071_v0 = vmul.f32 %v5935_v42, %v5695_v24  ;;  %v6074_v12 = vmul.f32 %v3364_v62, %v5732_v18 }
 0x3fe   : > { %v3922_v45 = vclamps-f32 %v2831_v48, 1.0  ;;  %v6077_v28 = vmul.f32 0.5, %v5943_v21  ;;  %v2845_v50 = vadd.f32 1.1283791, %v2844_v33  ;;  %v2866_v61 = vand.u32 2147483647, %v5963_v10 }
 0x3ff   : > { %v3204_v22 = vmul.f32 %v3203_v7, %v5901_v30  ;;  %v2882_v11 = vmul.f32 %v2881_v14, %v5931_v25  ;;  %v3931_v27 = vclamps-f32 %v3191_v32, 1.0  ;;  %4225 = vrcp.f32 %v6058_v9 }
 0x400   : > { %v3252_v23 = vadd.f32 0.112945676, %v3251_v6  ;;  %v2916_v24 = vmul.f32 2.1237322e-06, %v6060_v51  ;;  %v2861_v18 = vadd.f32 %v6005_v8, %v2860_v5  ;;  %vm2863_vm12 = vweird.f32 %v6005_v8 }
 0x401   : > { %v6084_v42 = vpop.eup %4223  ;;  %v3241_v21 = vadd.f32 0.05243302, %v3240_v54  ;;  %v2927_v58 = vmul.f32 3.8918573e-05, %v6060_v51  ;;  %v2868_v53 = vand.u32 2147483648, %v5963_v10  ;;  %v6094_v49 = vadd.f32 %v5567_v52, %v2677_v20 }
 0x402   : > { %v3218_v30 = vmul.f32 %v6084_v42, %v6048_v60  ;;  %v3253_v36 = vmul.f32 %v3252_v23, %v6001_v34  ;;  %vm2862_vm13 = vweird.f32 %v5963_v10  ;;  %v2883_v56 = vadd.f32 0.18741608, %v2882_v11 }
 0x403   : > { %v2917_v13 = vadd.f32 0.00028619796, %v2916_v24  ;;  %v2928_v19 = vadd.f32 0.001143296, %v2927_v58  ;;  %v6097_v2 = vadd.f32 1.0, %v3922_v45  ;;  %v3365_v46 = vadd.f32 1.0, %v3931_v27  ;;  %vm6099_vm14 = vmor %vm2862_vm13, %vm2863_vm12 }
 0x404   : > { %v3205_v29 = vadd.f32 1.1283791, %v3204_v22  ;;  %v3254_v41 = vadd.f32 0.4994258, %v3253_v36  ;;  %v2865_v20 = vsel %vm6099_vm14, %v6005_v8, %v2861_v18  ;;  %v3242_v17 = vmul.f32 %v3241_v21, %v6001_v34 }
 0x405   : > { %v2918_v10 = vmul.f32 %v2917_v13, %v6060_v51  ;;  %v6109_v63 = vadd.f32 %v5567_v52, %v2679_v15  ;;  %v6111_v62 = vpop.eup %4225  ;;  %v3219_v48 = vsub.f32 1.0, %v3218_v30  ;;  %v2929_v59 = vmul.f32 %v2928_v19, %v6060_v51 }
 0x406   : > { %v3255_v3 = vmul.f32 %v3254_v41, %v6001_v34  ;;  %v6116_v33 = vmul.f32 0.70710677, %v6094_v49  ;;  %v2846_v7 = vmul.f32 %v2845_v50, %v5832_v57  ;;  %vm2867_vm15 = vcmp.eq.f32.partialorder %v2866_v61, 8.507059e+37 }
 0x407   : > { %v2869_v8 = vor.u32 1.1754944e-38, %v2868_v53  ;;  %v2884_v14 = vmul.f32 %v2883_v56, %v5931_v25  ;;  %v2919_v52 = vadd.f32 0.0036580483, %v2918_v10  ;;  %v2930_v5 = vadd.f32 0.014752088, %v2929_v59 }
 0x408   : > { %v6120_v32 = vadd.f32 1.0, %v3255_v3  ;;  %v3274_v54 = vmul.f32 %v6116_v33, %v6116_v33  ;;  %v2898_v45 = vmul.f32 %v6111_v62, %v6058_v9  ;;  %v3243_v22 = vadd.f32 0.18741608, %v3242_v17 }
 0x409   : > { %v2870_v6 = vsel %vm2867_vm15, %v2869_v8, %v2865_v20  ;;  %v6127_v11 = vmul.f32 0.70710677, %v6109_v63  ;;  %v6130_v57 = vmul.f32 %v3365_v46, %v5787_v35  ;;  %v6133_v25 = vmul.f32 %v3205_v29, %v5878_v44 }
 0x40a   : > { %v3220_v50 = vmul.f32 %v6084_v42, %v3219_v48  ;;  %4227 = vrcp.f32 %v6120_v32  ;;  %vm3222_vm0 = vweird.f32 %v6048_v60  ;;  %v3226_v61 = vand.u32 2147483647, %v6048_v60 }
 0x40b   : > { %v3228_v27 = vand.u32 2147483648, %v6048_v60  ;;  %v6140_v23 = vadd.f32 1.1283791, %v2884_v14  ;;  %v6142_v24 = vmul.f32 %v2870_v6, %v2846_v7  ;;  %v2920_v35 = vmul.f32 %v2919_v52, %v6060_v51 }
 0x40c   : > { %v2931_v18 = vmul.f32 %v2930_v5, %v6060_v51  ;;  %v6146_v44 = vmin.f32 %v3274_v54, 16.0  ;;  %v2899_v21 = vsub.f32 1.0, %v2898_v45  ;;  %v3244_v58 = vmul.f32 %v3243_v22, %v6001_v34 }
 0x40d   : > { %v3314_v53 = vmul.f32 %v6127_v11, %v6127_v11  ;;  %v3390_v30 = vpack.c.bf16 %v6064_v55, %v5881_v43  ;;  %v3221_v36 = vadd.f32 %v6084_v42, %v3220_v50  ;;  %vm3223_vm2 = vweird.f32 %v6084_v42 }
 0x40e   : > { %v2932_v15 = vadd.f32 0.112945676, %v2931_v18  ;;  %v3276_v56 = vmul.f32 2.1237322e-06, %v6146_v44  ;;  %vm6156_vm3 = vcmp.eq.f32.partialorder %v3226_v61, 8.507059e+37  ;;  %v3229_v19 = vor.u32 1.1754944e-38, %v3228_v27  ;;  %vm6168_vm5 = vmor %vm3222_vm0, %vm3223_vm2 }
 0x40f   : > { %v2906_v34 = vand.u32 2147483647, %v6058_v9  ;;  %v3287_v46 = vmul.f32 3.8918573e-05, %v6146_v44  ;;  %v6162_v16 = vmin.f32 %v3314_v53, 16.0  ;;  %vm3406_vm4 = vcmask 130048  }
 0x410   : > { %v4228_v29 = vpop.eup %4227  ;;  %v2921_v43 = vadd.f32 0.05243302, %v2920_v35  ;;  %v2933_v55 = vmul.f32 %v2932_v15, %v6060_v51  ;;  %v3277_v41 = vadd.f32 0.00028619796, %v3276_v56  ;;  %v3923_v20 = vclamps-f32 %v6142_v24, 1.0  ;;  %3944 = vmatmul.msk.bf16.vlgmr.msra.gmra.mxu3 %vm3406_vm4, %v3390_v30 }
 0x411   : > { %v2900_v10 = vmul.f32 %v6111_v62, %v2899_v21  ;;  %v3245_v48 = vadd.f32 1.1283791, %v3244_v58  ;;  %v3258_v3 = vmul.f32 %v4228_v29, %v6120_v32  ;;  %v3225_v59 = vsel %vm6168_vm5, %v6084_v42, %v3221_v36 }
 0x412   : > { %v2934_v7 = vadd.f32 0.4994258, %v2933_v55  ;;  %v3278_v8 = vmul.f32 %v3277_v41, %v6146_v44  ;;  %v3288_v14 = vadd.f32 0.001143296, %v3287_v46  ;;  %vm2902_vm6 = vweird.f32 %v6058_v9 }
 0x413   : > { %v3259_v60 = vsub.f32 1.0, %v3258_v3  ;;  %v3266_v52 = vand.u32 2147483647, %v6120_v32  ;;  %v3268_v5 = vand.u32 2147483648, %v6120_v32  ;;  %v3316_v54 = vmul.f32 2.1237322e-06, %v6162_v16 }
 0x414   : > { %v2922_v6 = vmul.f32 %v2921_v43, %v6060_v51  ;;  %v2935_v45 = vmul.f32 %v2934_v7, %v6060_v51  ;;  %v3289_v22 = vmul.f32 %v3288_v14, %v6146_v44  ;;  %v3327_v42 = vmul.f32 3.8918573e-05, %v6162_v16 }
 0x415   : > { %v3260_v50 = vmul.f32 %v4228_v29, %v3259_v60  ;;  %vm3263_vm7 = vweird.f32 %v4228_v29  ;;  %v3279_v61 = vadd.f32 0.0036580483, %v3278_v8  ;;  %v3317_v27 = vadd.f32 0.00028619796, %v3316_v54 }
 0x416   : > { %vm2903_vm8 = vweird.f32 %v6111_v62  ;;  %v6188_v24 = vadd.f32 1.0, %v2935_v45  ;;  %v3290_v35 = vadd.f32 0.014752088, %v3289_v22  ;;  %v3328_v18 = vadd.f32 0.001143296, %v3327_v42 }
 0x417   : > { %v3261_v21 = vadd.f32 %v4228_v29, %v3260_v50  ;;  %vm3262_vm9 = vweird.f32 %v6120_v32  ;;  %v3318_v58 = vmul.f32 %v3317_v27, %v6162_v16  ;;  %v3386_v53 = vpack.c.bf16 %v6071_v0, %v6009_v26  ;;  %vm6211_vm12 = vmor %vm2902_vm6, %vm2903_vm8 }
 0x418   : > { %v3230_v30 = vsel %vm6156_vm3, %v3229_v19, %v3225_v59  ;;  %vm3264_vm10 = vmor %vm3262_vm9, %vm3263_vm7  ;;  %v3269_v36 = vor.u32 1.1754944e-38, %v3268_v5  ;;  %v2923_v15 = vadd.f32 0.18741608, %v2922_v6  ;;  %4229 = vrcp.f32 %v6188_v24 }
 0x419   : > { %v2901_v56 = vadd.f32 %v6111_v62, %v2900_v10  ;;  %v3265_v46 = vsel %vm3264_vm10, %v4228_v29, %v3261_v21  ;;  %vm3267_vm11 = vcmp.eq.f32.partialorder %v3266_v52, 8.507059e+37  ;;  %v3291_v43 = vmul.f32 %v3290_v35, %v6146_v44  ;;  %3940 = vmatmul.msk.bf16.vlgmr.msra.gmra.mxu1 %vm3406_vm4, %v3386_v53 }
 0x41a   : > { %v2908_v32 = vand.u32 2147483648, %v6058_v9  ;;  %v3270_v55 = vsel %vm3267_vm11, %v3269_v36, %v3265_v46  ;;  %v3280_v26 = vmul.f32 %v3279_v61, %v6146_v44  ;;  %v3329_v0 = vmul.f32 %v3328_v18, %v6162_v16 }
 0x41b   : > { %v3231_v13 = vmul.f32 %v3230_v30, %v6133_v25  ;;  %v3246_v19 = vmul.f32 %v3245_v48, %v5966_v1  ;;  %v3292_v41 = vadd.f32 0.112945676, %v3291_v43  ;;  %v3319_v17 = vadd.f32 0.0036580483, %v3318_v58 }
 0x41c   : > { %v3372_v29 = vmul.f32 %v6097_v2, %v5764_v4  ;;  %v3357_v10 = vadd.f32 1.0, %v3923_v20  ;;  %v2924_v59 = vmul.f32 %v2923_v15, %v6060_v51  ;;  %v3330_v7 = vadd.f32 0.014752088, %v3329_v0 }
 0x41d   : > { %v2905_v1 = vsel %vm6211_vm12, %v6111_v62, %v2901_v56  ;;  %v3271_v25 = vmul.f32 %v3270_v55, %v3246_v19  ;;  %v3293_v48 = vmul.f32 %v3292_v41, %v6146_v44  ;;  %v3391_v4 = vpack.c.bf16 %v6130_v57, %v6074_v12  ;;  %v2657_v56 = vpop.f32.mrf.mxu0 }
 0x41e   : > { %v4230_v2 = vpop.eup %4229  ;;  %v2886_v20 = vmul.f32 %v6140_v23, %v5891_v47  ;;  %v2909_v8 = vor.u32 1.1754944e-38, %v2908_v32  ;;  %v3281_v14 = vadd.f32 0.05243302, %v3280_v26  ;;  %v3331_v60 = vmul.f32 %v3330_v7, %v6162_v16 }
 0x41f   : > { %v3932_v51 = vclamps-f32 %v3231_v13, 1.0  ;;  %vm2907_vm13 = vcmp.eq.f32.partialorder %v2906_v34, 8.507059e+37  ;;  %v2938_v62 = vmul.f32 %v4230_v2, %v6188_v24  ;;  %v3320_v52 = vmul.f32 %v3319_v17, %v6162_v16 }
 0x420   : > { %v2910_v5 = vsel %vm2907_vm13, %v2909_v8, %v2905_v1  ;;  %v2925_v54 = vadd.f32 1.1283791, %v2924_v59  ;;  %v3294_v6 = vadd.f32 0.4994258, %v3293_v48  ;;  %v3332_v12 = vadd.f32 0.112945676, %v3331_v60  ;;  %3945 = vmatmul.msk.bf16.gmra.mxu3 %vm3406_vm4, %v3391_v4 }
 0x421   : > { %v3373_v57 = vmul.f32 %v3357_v10, %v6056_v31  ;;  %v3933_v45 = vclamps-f32 %v3271_v25, 1.0  ;;  %v2939_v47 = vsub.f32 1.0, %v2938_v62  ;;  %v2946_v23 = vand.u32 2147483647, %v6188_v24 }
 0x422   : > { %v2948_v22 = vand.u32 2147483648, %v6188_v24  ;;  %v3282_v9 = vmul.f32 %v3281_v14, %v6146_v44  ;;  %v3295_v34 = vmul.f32 %v3294_v6, %v6146_v44  ;;  %v3333_v42 = vmul.f32 %v3332_v12, %v6162_v16 }
 0x423   : > { %v2911_v50 = vmul.f32 %v2910_v5, %v2886_v20  ;;  %v2940_v61 = vmul.f32 %v4230_v2, %v2939_v47  ;;  %vm2943_vm14 = vweird.f32 %v4230_v2  ;;  %v3321_v27 = vadd.f32 0.05243302, %v3320_v52 }
 0x424   : > { %v3366_v35 = vadd.f32 1.0, %v3932_v51  ;;  %v2926_v31 = vmul.f32 %v2925_v54, %v6029_v38  ;;  %v3296_v18 = vadd.f32 1.0, %v3295_v34  ;;  %v3334_v21 = vadd.f32 0.4994258, %v3333_v42  ;;  %v6243_v38 = vld [vmem:[%s6410_s13] ss:$0 sm:$0xff] }
 0x425   : > { %v3367_v58 = vadd.f32 1.0, %v3933_v45  ;;  %v2941_v53 = vadd.f32 %v4230_v2, %v2940_v61  ;;  %vm2942_vm15 = vweird.f32 %v6188_v24  ;;  %v3387_v30 = vpack.c.bf16 %v3373_v57, %v3372_v29 }
 0x426   : > { %vm2944_vm0 = vmor %vm2942_vm15, %vm2943_vm14  ;;  %vm2947_vm2 = vcmp.eq.f32.partialorder %v2946_v23, 8.507059e+37  ;;  %v2949_v36 = vor.u32 1.1754944e-38, %v2948_v22  ;;  %v3283_v15 = vadd.f32 0.18741608, %v3282_v9  ;;  %4231 = vrcp.f32 %v3296_v18 }
 0x427   : > { %v2945_v46 = vsel %vm2944_vm0, %v4230_v2, %v2941_v53  ;;  %v3322_v43 = vmul.f32 %v3321_v27, %v6162_v16  ;;  %v3335_v32 = vmul.f32 %v3334_v21, %v6162_v16  ;;  %v6246_v55 = vadd.f32 %v6243_v38, %v2657_v56 }
 0x428   : > { %v2694_v24 = vmul.f32 0.5, %v5862_v39  ;;  %v2950_v26 = vsel %vm2947_vm2, %v2949_v36, %v2945_v46  ;;  %v3383_v0 = vmul.f32 %v3367_v58, %v6077_v28  ;;  %v3924_v17 = vclamps-f32 %v2911_v50, 1.0 }
 0x429   : > { %v2951_v13 = vmul.f32 %v2950_v26, %v2926_v31  ;;  %v3336_v19 = vadd.f32 1.0, %v3335_v32  ;;  %3941 = vmatmul.msk.bf16.gmra.mxu1 %vm3406_vm4, %v3387_v30  ;;  %v6252_v29 = vmul.f32 0.70710677, %v6246_v55  ;;  %v3284_v3 = vmul.f32 %v3283_v15, %v6146_v44  ;;  %v2659_v15 = vpop.f32.mrf.mxu0 }
 0x42a   : > { %v3382_v41 = vmul.f32 %v3366_v35, %v2694_v24  ;;  %v3323_v59 = vadd.f32 0.18741608, %v3322_v43  ;;  %v3358_v48 = vadd.f32 1.0, %v3924_v17  ;;  %v2687_v2 = vmul.f32 0.5, %v5994_v40 }
 0x42b   : > { %v3925_v10 = vclamps-f32 %v2951_v13, 1.0  ;;  %4233 = vrcp.f32 %v3336_v19  ;;  %v2954_v39 = vmul.f32 %v6252_v29, %v6252_v29  ;;  %v3285_v20 = vadd.f32 1.1283791, %v3284_v3 }
 0x42c   : > { %v4232_v7 = vpop.eup %4231  ;;  %v3392_v25 = vpack.c.bf16 %v3383_v0, %v3382_v41  ;;  %v3324_v14 = vmul.f32 %v3323_v59, %v6162_v16  ;;  %v2686_v44 = vmul.f32 0.5, %v5872_v37  ;;  %v3306_v60 = vand.u32 2147483647, %v3296_v18 }
 0x42d   : > { %v3359_v1 = vadd.f32 1.0, %v3925_v10  ;;  %v3298_v28 = vmul.f32 %v4232_v7, %v3296_v18  ;;  %v6257_v4 = vmin.f32 %v2954_v39, 16.0  ;;  %v3308_v51 = vand.u32 2147483648, %v3296_v18 }
 0x42e   : > { %vm3303_vm3 = vweird.f32 %v4232_v7  ;;  %v3374_v6 = vmul.f32 %v3358_v48, %v2686_v44  ;;  %v3286_v40 = vmul.f32 %v3285_v20, %v6116_v33  ;;  %vm3302_vm5 = vweird.f32 %v3296_v18 }
 0x42f   : > { %v3299_v8 = vsub.f32 1.0, %v3298_v28  ;;  %v2967_v62 = vmul.f32 3.8918573e-05, %v6257_v4  ;;  %v3375_v5 = vmul.f32 %v3359_v1, %v2687_v2  ;;  %v3325_v16 = vadd.f32 1.1283791, %v3324_v14  ;;  %vm3304_vm6 = vmor %vm3302_vm5, %vm3303_vm3 }
 0x430   : > { %3946 = vmatmul.msk.bf16.gmra.mxu3 %vm3406_vm4, %v3392_v25  ;;  %vm3307_vm7 = vcmp.eq.f32.partialorder %v3306_v60, 8.507059e+37  ;;  %v3309_v37 = vor.u32 1.1754944e-38, %v3308_v51  ;;  %v3346_v9 = vand.u32 2147483647, %v3336_v19  ;;  %v3348_v34 = vand.u32 2147483648, %v3336_v19 }
 0x431   : > { %v4234_v52 = vpop.eup %4233  ;;  %v3300_v54 = vmul.f32 %v4232_v7, %v3299_v8  ;;  %v2968_v57 = vadd.f32 0.001143296, %v2967_v62  ;;  %v3388_v42 = vpack.c.bf16 %v3375_v5, %v3374_v6  ;;  %vm3342_vm9 = vweird.f32 %v3336_v19 }
 0x432   : > { %v3338_v12 = vmul.f32 %v4234_v52, %v3336_v19  ;;  %vm3343_vm8 = vweird.f32 %v4234_v52  ;;  %v3349_v18 = vor.u32 1.1754944e-38, %v3348_v34  ;;  %v3326_v58 = vmul.f32 %v3325_v16, %v6127_v11 }
 0x433   : > { %v3301_v45 = vadd.f32 %v4232_v7, %v3300_v54  ;;  %v2969_v23 = vmul.f32 %v2968_v57, %v6257_v4  ;;  %vm3344_vm10 = vmor %vm3342_vm9, %vm3343_vm8  ;;  %vm3347_vm11 = vcmp.eq.f32.partialorder %v3346_v9, 8.507059e+37  ;;  %v6270_v46 = vadd.f32 %v6243_v38, %v2659_v15 }
 0x434   : > { %v3339_v47 = vsub.f32 1.0, %v3338_v12  ;;  %v2696_v0 = vmul.f32 0.5, %v6094_v49  ;;  %v2697_v11 = vmul.f32 0.5, %v6109_v63  ;;  %v2956_v59 = vmul.f32 2.1237322e-06, %v6257_v4 }
 0x435   : > { %v3305_v22 = vsel %vm3304_vm6, %v4232_v7, %v3301_v45  ;;  %v2970_v27 = vadd.f32 0.014752088, %v2969_v23  ;;  %v6274_v26 = vmul.f32 0.70710677, %v6270_v46 }
 0x436   : > { %v3310_v50 = vsel %vm3307_vm7, %v3309_v37, %v3305_v22  ;;  %v3340_v61 = vmul.f32 %v4234_v52, %v3339_v47  ;;  %v2957_v28 = vadd.f32 0.00028619796, %v2956_v59  ;;  %v2689_v59 = vmul.f32 0.5, %v6270_v46  ;;  %v6300_v46 = vld [vmem:[%s6413_s16] ss:$0 sm:$0xff] }
 0x437   : > { %v3311_v35 = vmul.f32 %v3310_v50, %v3286_v40  ;;  %v2971_v33 = vmul.f32 %v2970_v27, %v6257_v4  ;;  %v2994_v19 = vmul.f32 %v6274_v26, %v6274_v26 }
 0x438   : > { %v3341_v31 = vadd.f32 %v4234_v52, %v3340_v61  ;;  %v2958_v20 = vmul.f32 %v2957_v28, %v6257_v4 }
 0x439   : > { %3942 = vmatmul.msk.bf16.gmra.mxu1 %vm3406_vm4, %v3388_v42  ;;  %v3934_v21 = vclamps-f32 %v3311_v35, 1.0  ;;  %v2972_v36 = vadd.f32 0.112945676, %v2971_v33  ;;  %v2995_v38 = vmin.f32 %v2994_v19, 16.0 }
 0x43a   : > { %v3345_v53 = vsel %vm3344_vm10, %v4234_v52, %v3341_v31  ;;  %v2959_v60 = vadd.f32 0.0036580483, %v2958_v20 }
 0x43b   : > { %v3350_v30 = vsel %vm3347_vm11, %v3349_v18, %v3345_v53  ;;  %v3368_v43 = vadd.f32 1.0, %v3934_v21  ;;  %v2973_v24 = vmul.f32 %v2972_v36, %v6257_v4  ;;  %v2996_v7 = vmul.f32 2.1237322e-06, %v2995_v38 }
 0x43c   : > { %v3351_v56 = vmul.f32 %v3350_v30, %v3326_v58  ;;  %v3007_v39 = vmul.f32 3.8918573e-05, %v2995_v38  ;;  %v2960_v5 = vmul.f32 %v2959_v60, %v6257_v4 }
 0x43d   : > { %v3384_v41 = vmul.f32 %v3368_v43, %v2696_v0  ;;  %v2974_v10 = vadd.f32 0.4994258, %v2973_v24  ;;  %v2997_v49 = vadd.f32 0.00028619796, %v2996_v7  ;;  %v2688_v7 = vmul.f32 0.5, %v6246_v55 }
 0x43e   : > { %v3935_v32 = vclamps-f32 %v3351_v56, 1.0  ;;  %v3008_v63 = vadd.f32 0.001143296, %v3007_v39  ;;  %v2961_v40 = vadd.f32 0.05243302, %v2960_v5 }
 0x43f   : > { %v2975_v1 = vmul.f32 %v2974_v10, %v6257_v4  ;;  %v2998_v25 = vmul.f32 %v2997_v49, %v2995_v38 }
 0x440   : > { %v3369_v13 = vadd.f32 1.0, %v3935_v32  ;;  %v3009_v48 = vmul.f32 %v3008_v63, %v2995_v38  ;;  %v2962_v47 = vmul.f32 %v2961_v40, %v6257_v4 }
 0x441   : > { %v2976_v2 = vadd.f32 1.0, %v2975_v1  ;;  %v2999_v14 = vadd.f32 0.0036580483, %v2998_v25 }
 0x442   : > { %v3385_v17 = vmul.f32 %v3369_v13, %v2697_v11  ;;  %v3010_v8 = vadd.f32 0.014752088, %v3009_v48  ;;  %v2963_v34 = vadd.f32 0.18741608, %v2962_v47 }
 0x443   : > { %4235 = vrcp.f32 %v2976_v2  ;;  %v3000_v62 = vmul.f32 %v2999_v14, %v2995_v38  ;;  %v2988_v18 = vand.u32 2147483648, %v2976_v2  ;;  %vm2982_vm14 = vweird.f32 %v2976_v2 }
 0x444   : > { %v3393_v3 = vpack.c.bf16 %v3385_v17, %v3384_v41  ;;  %v3011_v44 = vmul.f32 %v3010_v8, %v2995_v38  ;;  %v2964_v35 = vmul.f32 %v2963_v34, %v6257_v4  ;;  %v2986_v53 = vand.u32 2147483647, %v2976_v2  ;;  %v4241_v8 = vld [vmem:[%s4467_s25] sm:$0xff]  ;;  %v4245_v34 = vld [vmem:[%s4467_s25 + $0x10] sm:$0xff] }
 0x445   : > { %v3001_v12 = vadd.f32 0.05243302, %v3000_v62  ;;  %v2989_v32 = vor.u32 1.1754944e-38, %v2988_v18  ;;  %v4246_v18 = vld [vmem:[%s4467_s25 + $0x58] sm:$0xff] }
 0x446   : > { %3947 = vmatmul.msk.bf16.gmra.mxu3 %vm3406_vm4, %v3393_v3  ;;  %v3012_v51 = vadd.f32 0.112945676, %v3011_v44  ;;  %v2965_v15 = vadd.f32 1.1283791, %v2964_v35  ;;  %vm2987_vm5 = vcmp.eq.f32.partialorder %v2986_v53, 8.507059e+37 }
 0x447   : > { %v3002_v37 = vmul.f32 %v3001_v12, %v2995_v38  ;;  %v4243_v12 = vld [vmem:[%s4467_s25 + $0x8] sm:$0xff] }
 0x448   : > { %v3013_v52 = vmul.f32 %v3012_v51, %v2995_v38  ;;  %v2966_v13 = vmul.f32 %v2965_v15, %v6252_v29  ;;  %v6295_v29 = vld [vmem:[%s6412_s15] ss:$0 sm:$0xff] }
 0x449   : > { %v4236_v6 = vpop.eup %4235  ;;  %v3003_v22 = vadd.f32 0.18741608, %v3002_v37 }
 0x44a   : > { %v3014_v54 = vadd.f32 0.4994258, %v3013_v52  ;;  %v2978_v45 = vmul.f32 %v4236_v6, %v2976_v2  ;;  %vm2983_vm12 = vweird.f32 %v4236_v6  ;;  %v4240_v2 = vld [vmem:[%s4467_s25 + $0x40] sm:$0xff] }
 0x44b   : > { %v3004_v61 = vmul.f32 %v3003_v22, %v2995_v38  ;;  %vm2984_vm15 = vmor %vm2982_vm14, %vm2983_vm12  ;;  %v4244_v22 = vld [vmem:[%s4467_s25 + $0x50] sm:$0xff] }
 0x44c   : > { %v3015_v57 = vmul.f32 %v3014_v54, %v2995_v38  ;;  %v2979_v23 = vsub.f32 1.0, %v2978_v45  ;;  %v4242_v54 = vld [vmem:[%s4467_s25 + $0x48] sm:$0xff] }
 0x44d   : > { %v3005_v30 = vadd.f32 1.1283791, %v3004_v61 }
 0x44e   : > { %v3016_v16 = vadd.f32 1.0, %v3015_v57  ;;  %v2980_v42 = vmul.f32 %v4236_v6, %v2979_v23 }
 0x44f   : > { %v3006_v4 = vmul.f32 %v3005_v30, %v6274_v26 }
 0x450   : > { %4237 = vrcp.f32 %v3016_v16  ;;  %v2981_v31 = vadd.f32 %v4236_v6, %v2980_v42  ;;  %v3028_v33 = vand.u32 2147483648, %v3016_v16  ;;  %v3026_v58 = vand.u32 2147483647, %v3016_v16 }
 0x451   : > { %vm3022_vm0 = vweird.f32 %v3016_v16 }
 0x452   : > { %v2985_v56 = vsel %vm2984_vm15, %v4236_v6, %v2981_v31  ;;  %v3029_v43 = vor.u32 1.1754944e-38, %v3028_v33  ;;  %vm3027_vm3 = vcmp.eq.f32.partialorder %v3026_v58, 8.507059e+37  ;;  %v4247_v58 = vld [vmem:[%s4467_s25 + $0x18] sm:$0xff] }
 0x453   : > { %v2990_v11 = vsel %vm2987_vm5, %v2989_v32, %v2985_v56 }
 0x454   : > { %v2991_v41 = vmul.f32 %v2990_v11, %v2966_v13 }
 0x456   : > { %v4238_v9 = vpop.eup %4237  ;;  %v3926_v10 = vclamps-f32 %v2991_v41, 1.0 }
 0x457   : > { %v3018_v50 = vmul.f32 %v4238_v9, %v3016_v16  ;;  %vm3023_vm13 = vweird.f32 %v4238_v9 }
 0x458   : > { %vm3024_vm2 = vmor %vm3022_vm0, %vm3023_vm13  ;;  %v3360_v3 = vadd.f32 1.0, %v3926_v10 }
 0x459   : > { %v3019_v27 = vsub.f32 1.0, %v3018_v50 }
 0x45a   : > { %v3376_v1 = vmul.f32 %v3360_v3, %v2688_v7  ;;  %v4250_v3 = vld [vmem:[%s4467_s25 + $0x68] sm:$0xff] }
 0x45b   : > { %v3020_v21 = vmul.f32 %v4238_v9, %v3019_v27  ;;  %v4251_v7 = vld [vmem:[%s4467_s25 + $0x28] sm:$0xff] }
 0x45d   : > { %v3021_v36 = vadd.f32 %v4238_v9, %v3020_v21 }
 0x45f   : > { %v3025_v24 = vsel %vm3024_vm2, %v4238_v9, %v3021_v36 }
 0x460   : > { %v3030_v0 = vsel %vm3027_vm3, %v3029_v43, %v3025_v24  ;;  %v4248_v24 = vld [vmem:[%s4467_s25 + $0x60] sm:$0xff] }
 0x461   : > { %v3031_v19 = vmul.f32 %v3030_v0, %v3006_v4  ;;  %v4249_v0 = vld [vmem:[%s4467_s25 + $0x20] sm:$0xff] }
 0x463   : > { %v3927_v17 = vclamps-f32 %v3031_v19, 1.0 }
 0x465   : > { %v3361_v38 = vadd.f32 1.0, %v3927_v17 }
 0x467   : > { %v3377_v39 = vmul.f32 %v3361_v38, %v2689_v59 }
 0x469   : > { %v3389_v26 = vpack.c.bf16 %v3377_v39, %v3376_v1 }
 0x46b   : > { %3943 = vmatmul.msk.bf16.gmra.mxu1 %vm3406_vm4, %v3389_v26 }
 0x493   : > { %v3460_v49 = vpop.f32.mrf.mxu3 }
 0x494   : > { %v3461_v55 = vadd.f32 %v6295_v29, %v3460_v49 }
 0x496   : > { %v3440_v28 = vpop.f32.mrf.mxu1  ;;  %v3492_v25 = vmul.f32 %v6300_v46, %v3461_v55  ;;  %v4252_v55 = vld [vmem:[%s4467_s25 + $0x70] sm:$0xff] }
 0x497   : > { %v3441_v63 = vadd.f32 %v6295_v29, %v3440_v28 }
 0x498   : > { %v3508_v20 = vadd.f32 %v4240_v2, %v3492_v25  ;;  %v4253_v2 = vld [vmem:[%s4467_s25 + $0x78] sm:$0xff] }
 0x499   : > { %v3484_v48 = vmul.f32 %v6300_v46, %v3441_v63 }
 0x49a   : > { %3524 = vst.msk [vmem:[%s4467_s25 + $0x40] sm:$0xff] %vm628_vm1, %v3508_v20 }
 0x49b   : > { %v3500_v14 = vadd.f32 %v4241_v8, %v3484_v48  ;;  %v3462_v44 = vpop.f32.mrf.mxu3 }
 0x49c   : > { %v3463_v60 = vadd.f32 %v6295_v29, %v3462_v44 }
 0x49d   : > { %3516 = vst.msk [vmem:[%s4467_s25] sm:$0xff] %vm628_vm1, %v3500_v14 }
 0x49e   : > { %v3442_v51 = vpop.f32.mrf.mxu1  ;;  %v3493_v52 = vmul.f32 %v6300_v46, %v3463_v60  ;;  %v4254_v60 = vld [vmem:[%s4467_s25 + $0x30] sm:$0xff] }
 0x49f   : > { %v3443_v62 = vadd.f32 %v6295_v29, %v3442_v51 }
 0x4a0   : > { %v3509_v6 = vadd.f32 %v4242_v54, %v3493_v52  ;;  %v4255_v54 = vld [vmem:[%s4467_s25 + $0x38] sm:$0xff] }
 0x4a1   : > { %v3485_v5 = vmul.f32 %v6300_v46, %v3443_v62 }
 0x4a2   : > { %3525 = vst.msk [vmem:[%s4467_s25 + $0x48] sm:$0xff] %vm628_vm1, %v3509_v6 }
 0x4a3   : > { %v3501_v57 = vadd.f32 %v4243_v12, %v3485_v5  ;;  %v3465_v40 = vpop.f32.mrf.mxu3 }
 0x4a4   : > { %v3466_v45 = vadd.f32 %v6295_v29, %v3465_v40 }
 0x4a5   : > { %3517 = vst.msk [vmem:[%s4467_s25 + $0x8] sm:$0xff] %vm628_vm1, %v3501_v57 }
 0x4a6   : > { %v3445_v16 = vpop.f32.mrf.mxu1  ;;  %v3494_v47 = vmul.f32 %v6300_v46, %v3466_v45 }
 0x4a7   : > { %v3446_v37 = vadd.f32 %v6295_v29, %v3445_v16 }
 0x4a8   : > { %v3510_v9 = vadd.f32 %v4244_v22, %v3494_v47 }
 0x4a9   : > { %v3486_v23 = vmul.f32 %v6300_v46, %v3446_v37 }
 0x4aa   : > { %3526 = vst.msk [vmem:[%s4467_s25 + $0x50] sm:$0xff] %vm628_vm1, %v3510_v9 }
 0x4ab   : > { %v3502_v42 = vadd.f32 %v4245_v34, %v3486_v23  ;;  %v3467_v50 = vpop.f32.mrf.mxu3 }
 0x4ac   : > { %v3468_v61 = vadd.f32 %v6295_v29, %v3467_v50 }
 0x4ad   : > { %3518 = vst.msk [vmem:[%s4467_s25 + $0x10] sm:$0xff] %vm628_vm1, %v3502_v42 }
 0x4ae   : > { %v3447_v27 = vpop.f32.mrf.mxu1  ;;  %v3495_v31 = vmul.f32 %v6300_v46, %v3468_v61 }
 0x4af   : > { %v3448_v35 = vadd.f32 %v6295_v29, %v3447_v27 }
 0x4b0   : > { %v3511_v21 = vadd.f32 %v4246_v18, %v3495_v31 }
 0x4b1   : > { %v3487_v33 = vmul.f32 %v6300_v46, %v3448_v35 }
 0x4b2   : > { %3527 = vst.msk [vmem:[%s4467_s25 + $0x58] sm:$0xff] %vm628_vm1, %v3511_v21 }
 0x4b3   : > { %v3503_v53 = vadd.f32 %v4247_v58, %v3487_v33  ;;  %v3470_v30 = vpop.f32.mrf.mxu3 }
 0x4b4   : > { %v3471_v36 = vadd.f32 %v6295_v29, %v3470_v30 }
 0x4b5   : > { %3519 = vst.msk [vmem:[%s4467_s25 + $0x18] sm:$0xff] %vm628_vm1, %v3503_v53 }
 0x4b6   : > { %v3450_v15 = vpop.f32.mrf.mxu1  ;;  %v3496_v43 = vmul.f32 %v6300_v46, %v3471_v36 }
 0x4b7   : > { %v3451_v56 = vadd.f32 %v6295_v29, %v3450_v15 }
 0x4b8   : > { %v3512_v4 = vadd.f32 %v4248_v24, %v3496_v43 }
 0x4b9   : > { %v3488_v32 = vmul.f32 %v6300_v46, %v3451_v56 }
 0x4ba   : > { %3528 = vst.msk [vmem:[%s4467_s25 + $0x60] sm:$0xff] %vm628_vm1, %v3512_v4 }
 0x4bb   : > { %v3504_v11 = vadd.f32 %v4249_v0, %v3488_v32  ;;  %v3472_v13 = vpop.f32.mrf.mxu3 }
 0x4bc   : > { %v3473_v19 = vadd.f32 %v6295_v29, %v3472_v13 }
 0x4bd   : > { %3520 = vst.msk [vmem:[%s4467_s25 + $0x20] sm:$0xff] %vm628_vm1, %v3504_v11 }
 0x4be   : > { %v3452_v41 = vpop.f32.mrf.mxu1  ;;  %v3497_v10 = vmul.f32 %v6300_v46, %v3473_v19 }
 0x4bf   : > { %v3453_v17 = vadd.f32 %v6295_v29, %v3452_v41 }
 0x4c0   : > { %v3513_v59 = vadd.f32 %v4250_v3, %v3497_v10 }
 0x4c1   : > { %v3489_v38 = vmul.f32 %v6300_v46, %v3453_v17 }
 0x4c2   : > { %3529 = vst.msk [vmem:[%s4467_s25 + $0x68] sm:$0xff] %vm628_vm1, %v3513_v59 }
 0x4c3   : > { %v3505_v39 = vadd.f32 %v4251_v7, %v3489_v38 }
 0x4c5   : > { %3521 = vst.msk [vmem:[%s4467_s25 + $0x28] sm:$0xff] %vm628_vm1, %v3505_v39 }
 0x4c9   : > { %v3475_v1 = vpop.f32.mrf.mxu3 }
 0x4ca   : > { %v3476_v26 = vadd.f32 %v6295_v29, %v3475_v1 }
 0x4cc   : > { %v3498_v49 = vmul.f32 %v6300_v46, %v3476_v26 }
 0x4ce   : > { %v3514_v28 = vadd.f32 %v4252_v55, %v3498_v49 }
 0x4d0   : > { %3530 = vst.msk [vmem:[%s4467_s25 + $0x70] sm:$0xff] %vm628_vm1, %v3514_v28 }
 0x4d1   : > { %v3477_v63 = vpop.f32.mrf.mxu3 }
 0x4d2   : > { %v3478_v25 = vadd.f32 %v6295_v29, %v3477_v63 }
 0x4d4   : > { %v3499_v48 = vmul.f32 %v6300_v46, %v3478_v25 }
 0x4d6   : > { %v3515_v20 = vadd.f32 %v4253_v2, %v3499_v48 }
 0x4d8   : > { %3531 = vst.msk [vmem:[%s4467_s25 + $0x78] sm:$0xff] %vm628_vm1, %v3515_v20 }
 0x4e8   : > { %v3455_v8 = vpop.f32.mrf.mxu1 }
 0x4e9   : > { %v3456_v14 = vadd.f32 %v6295_v29, %v3455_v8 }
 0x4eb   : > { %v3490_v44 = vmul.f32 %v6300_v46, %v3456_v14 }
 0x4ed   : > { %v3506_v51 = vadd.f32 %v4254_v60, %v3490_v44 }
 0x4ef   : > { %3522 = vst.msk [vmem:[%s4467_s25 + $0x30] sm:$0xff] %vm628_vm1, %v3506_v51 }
 0x4f0   : > { %v3457_v62 = vpop.f32.mrf.mxu1 }
 0x4f1   : > { %v3458_v52 = vadd.f32 %v6295_v29, %v3457_v62 }
 0x4f3   : > { %v3491_v5 = vmul.f32 %v6300_v46, %v3458_v52 }
 0x4f5   : > { %v3507_v6 = vadd.f32 %v4255_v54, %v3491_v5 }
 0x4f7   : > { %3523 = vst.msk [vmem:[%s4467_s25 + $0x38] sm:$0xff] %vm628_vm1, %v3507_v6 }
 0x4f8 PF: > { %s27_s28 = sadd.s32 1, %s4302_s28   ;;  %s6482_s25 = sld [smem:[#allocation3_spill]] }
 0x4f9   : > { %p24_p0 = scmp.ge.s32.totalorder %s27_s28, 6   ;;  %s6483_s30 = sld [smem:[#allocation4_spill]] }
 0x4fa   : > { %s6484_s27 = sld [smem:[#allocation5_spill]]  ;;  %s6485_s24 = smov %s4294_s26 }
 0x4fb   :  { %26 = sbr.rel (!%p24_p0) target bundleno = 6 (0x6), region = 309 }
 0x4ff   : > { %s6486_s26 = smov %s6483_s30 }

</bundles_post_ra>
